<compile_context>
chip_gen: v6e
topology: v6e:2x2x1
jax: 0.10.0
libtpu: 0.0.40
codegen_flags: <defaults>
</compile_context>

<pallas_src>
import math
from functools import partial

import jax
import jax.numpy as jnp
import numpy as np
from jax import lax
from jax.experimental import pallas as pl
from jax.experimental.pallas import tpu as pltpu


LAYER_WEIGHT_NAMES = ('sa_qkv_w', 'sa_qkv_b', 'sa_o_w', 'sa_o_b',
                      'ca_q_w', 'ca_q_b', 'ca_kv_w', 'ca_kv_b', 'ca_o_w', 'ca_o_b',
                      'ff_w1', 'ff_b1', 'ff_w2', 'ff_b2',
                      'ln_g', 'ln_b')
CONST_WEIGHT_NAMES = ('out_w', 'out_b')


# ---------------------------------------------------------------------------
# In-kernel helpers (traced inside the Pallas kernel body)
# ---------------------------------------------------------------------------
def _layernorm(x, g, b, eps=1e-5):
    mu = jnp.mean(x, axis=-1, keepdims=True)
    var = jnp.mean(jnp.square(x - mu), axis=-1, keepdims=True)
    return (x - mu) * lax.rsqrt(var + eps) * g + b


def _bf16_dot(x, w_bf16):
    """bf16 x bf16 MXU matmul with f32 accumulation."""
    return jnp.dot(x.astype(jnp.bfloat16), w_bf16, preferred_element_type=jnp.float32)


# ---------------------------------------------------------------------------
# Pallas kernel: ONE decoder layer per grid step (layer axis = grid dim 1);
# activations carried across layers in a VMEM scratch slab.
# ---------------------------------------------------------------------------
def decoder_layer_kernel(tgt_ref, mem_ref,
                         sa_qkv_w_ref, sa_qkv_b_ref, sa_o_w_ref, sa_o_b_ref,
                         ca_q_w_ref, ca_q_b_ref, ca_kv_w_ref, ca_kv_b_ref,
                         ca_o_w_ref, ca_o_b_ref,
                         ff_w1_ref, ff_b1_ref, ff_w2_ref, ff_b2_ref,
                         ln_g_ref, ln_b_ref, out_w_ref, out_b_ref,
                         o_ref, x_ref, *, num_heads):
    l = pl.program_id(1)
    Bt, T, H = tgt_ref.shape
    M = mem_ref.shape[1]
    N = Bt * T
    nh = num_heads
    hd = H // nh
    scale = 1.0 / math.sqrt(hd)

    # first layer: load the (pos-encoded) target embeddings into the carried slab
    @pl.when(l == 0)
    def _():
        x_ref[...] = tgt_ref[...].reshape(N, H)

    x = x_ref[...]                               # (N, H) f32, batch-folded
    memf = mem_ref[...].reshape(Bt * M, H)       # (Bt*M, H) f32, batch-folded

    # (T, T) boolean causal mask — only mask that is ever materialized
    rowi = lax.broadcasted_iota(jnp.int32, (T, T), 0)
    coli = lax.broadcasted_iota(jnp.int32, (T, T), 1)
    causal_ok = coli <= rowi

    def mha(q, k, v, wo_bf16, bo, causal):
        """q: (Bt, T, H) f32 (already scaled); k, v: (Bt, S, H) f32.
        Per-sequence batched attention; bf16 operands on the MXU, f32 accumulation."""
        ctxs = []
        for h in range(nh):                      # static unroll (few heads at these sizes)
            sl = slice(h * hd, (h + 1) * hd)
            qh = q[..., sl].astype(jnp.bfloat16)
            kh = k[..., sl].astype(jnp.bfloat16)
            vh = v[..., sl].astype(jnp.bfloat16)
            s = jnp.einsum('btd,bsd->bts', qh, kh,
                           preferred_element_type=jnp.float32)        # (Bt, T, S) f32
            if causal:
                s = jnp.where(causal_ok[None], s, -1e30)
            m = jnp.max(s, axis=-1, keepdims=True)
            e = jnp.exp(s - m)
            p = e * pl.reciprocal(jnp.sum(e, axis=-1, keepdims=True), approx=True)
            ctxs.append(jnp.einsum('bts,bsd->btd', p.astype(jnp.bfloat16), vh,
                                   preferred_element_type=jnp.float32))
        # assemble all heads into one (N, H) slab -> single K=H W_o matmul
        ctx = jnp.concatenate(ctxs, axis=-1).reshape(N, H)
        return _bf16_dot(ctx, wo_bf16) + bo

    # --- self attention (causal, fused QKV) + residual + norm1 ---
    qkv = _bf16_dot(x, sa_qkv_w_ref[0]) + sa_qkv_b_ref[0]             # (N, 3H)
    q = (qkv[:, :H] * scale).reshape(Bt, T, H)
    k = qkv[:, H:2 * H].reshape(Bt, T, H)
    v = qkv[:, 2 * H:].reshape(Bt, T, H)
    sa = mha(q, k, v, sa_o_w_ref[0], sa_o_b_ref[0], causal=True)
    x = _layernorm(x + sa, ln_g_ref[0, 0], ln_b_ref[0, 0])

    # --- cross attention (fused KV on memory, no mask) + residual + norm2 ---
    qc = ((_bf16_dot(x, ca_q_w_ref[0]) + ca_q_b_ref[0]) * scale).reshape(Bt, T, H)
    kv = _bf16_dot(memf, ca_kv_w_ref[0]) + ca_kv_b_ref[0]             # (Bt*M, 2H)
    kc = kv[:, :H].reshape(Bt, M, H)
    vc = kv[:, H:].reshape(Bt, M, H)
    ca = mha(qc, kc, vc, ca_o_w_ref[0], ca_o_b_ref[0], causal=False)
    x = _layernorm(x + ca, ln_g_ref[0, 1], ln_b_ref[0, 1])

    # --- feed-forward (Linear -> ReLU -> Linear) + residual + norm3 ---
    # h1 kept in bf16 (it is cast to bf16 for the ff_w2 matmul anyway) to halve its VMEM.
    h1 = jnp.maximum(_bf16_dot(x, ff_w1_ref[0]) + ff_b1_ref[0], 0.0).astype(jnp.bfloat16)
    f = jnp.dot(h1, ff_w2_ref[0], preferred_element_type=jnp.float32) + ff_b2_ref[0]
    x = _layernorm(x + f, ln_g_ref[0, 2], ln_b_ref[0, 2])

    x_ref[...] = x                               # carry to next layer grid step

    # --- final vocabulary projection on the last layer step ---
    # TODO(synk): add a vocab grid dimension (tile out_w columns, last dim multiple of 128)
    # once V grows beyond toy sizes so the full (H, V) weight never has to be VMEM-resident.
    @pl.when(l == pl.num_programs(1) - 1)
    def _():
        logits = _bf16_dot(x, out_w_ref[...]) + out_b_ref[...]
        o_ref[...] = logits.reshape(o_ref.shape)


def run_decoder(tgt, memory, params, *, num_layers, num_heads, batch_tile=None):
    """tgt: (B, T, H) f32, memory: (B, M, H) f32 -> (B, T, vocab) f32."""
    B, T, H = tgt.shape
    M = memory.shape[1]
    V = params['out_w'].shape[1]
    # >= 2 batch grid steps so the "parallel" axis can split across v7x's 2 TensorCores.
    Bt = batch_tile if batch_tile is not None else max(1, B // 2)
    assert B % Bt == 0, "TODO(synk): pad batch to a multiple of the batch tile"

    layer_ws = [params[k] for k in LAYER_WEIGHT_NAMES]
    const_ws = [params[k] for k in CONST_WEIGHT_NAMES]

    def layer_spec(arr):
        # one layer's slice per grid step; default double-buffering overlaps the next
        # layer's weight DMA with this layer's compute.
        nd = arr.ndim
        return pl.BlockSpec((1,) + arr.shape[1:],
                            lambda b, l, _nd=nd: (l,) + (0,) * (_nd - 1))

    def const_spec(arr):
        nd = arr.ndim
        return pl.BlockSpec(arr.shape, lambda b, l, _nd=nd: (0,) * _nd)

    return pl.pallas_call(
        partial(decoder_layer_kernel, num_heads=num_heads),
        out_shape=jax.ShapeDtypeStruct((B, T, V), jnp.float32),
        grid_spec=pltpu.PrefetchScalarGridSpec(
            num_scalar_prefetch=0,
            grid=(B // Bt, num_layers),
            in_specs=[pl.BlockSpec((Bt, T, H), lambda b, l: (b, 0, 0)),
                      pl.BlockSpec((Bt, M, H), lambda b, l: (b, 0, 0))]
                     + [layer_spec(w) for w in layer_ws]
                     + [const_spec(w) for w in const_ws],
            out_specs=pl.BlockSpec((Bt, T, V), lambda b, l: (b, 0, 0)),
            scratch_shapes=[pltpu.VMEM((Bt * T, H), jnp.float32)],
        ),
        # batch tiles independent -> v7x can split them; layer axis is a sequential carry.
        compiler_params=pltpu.CompilerParams(
            dimension_semantics=("parallel", "arbitrary")),
    )(tgt, memory, *layer_ws, *const_ws)


# ---------------------------------------------------------------------------
# Glue (plain JAX): parameters, embedding + positional encoding, wrapper
# ---------------------------------------------------------------------------
def init_params(key, *, embed_size, hidden_size, vocab_size, num_layers, heads, ff_dim):
    # The torch model implicitly requires embed_size == hidden_size (pe add broadcast).
    assert embed_size == hidden_size
    H, V, L, F = hidden_size, vocab_size, num_layers, ff_dim
    ks = jax.random.split(key, 20)
    s = 0.02

    def w(k, shape):   # matmul weights live in bf16 (halves HBM/VMEM traffic)
        return (jax.random.normal(k, shape, jnp.float32) * s).astype(jnp.bfloat16)

    def b(k, shape):   # biases / LN params stay f32
        return jax.random.normal(k, shape, jnp.float32) * s

    p = dict(
        embed=jax.random.normal(ks[0], (V, H), jnp.float32) * s,
        sa_qkv_w=w(ks[1], (L, H, 3 * H)), sa_qkv_b=b(ks[2], (L, 1, 3 * H)),
        sa_o_w=w(ks[3], (L, H, H)),       sa_o_b=b(ks[4], (L, 1, H)),
        ca_q_w=w(ks[5], (L, H, H)),       ca_q_b=b(ks[6], (L, 1, H)),
        ca_kv_w=w(ks[7], (L, H, 2 * H)),  ca_kv_b=b(ks[8], (L, 1, 2 * H)),
        ca_o_w=w(ks[9], (L, H, H)),       ca_o_b=b(ks[10], (L, 1, H)),
        ff_w1=w(ks[11], (L, H, F)),       ff_b1=b(ks[12], (L, 1, F)),
        ff_w2=w(ks[13], (L, F, H)),       ff_b2=b(ks[14], (L, 1, H)),
        ln_g=jnp.ones((L, 3, 1, H), jnp.float32),
        ln_b=jnp.zeros((L, 3, 1, H), jnp.float32),
        out_w=w(ks[15], (H, V)),          out_b=b(ks[16], (1, V)),
    )
    # PositionalEncoding buffer: pe (max_len = embed_size, 1, d_model = hidden_size)
    max_len = embed_size
    position = jnp.arange(max_len, dtype=jnp.float32)[:, None]
    div_term = jnp.exp(jnp.arange(0, H, 2, dtype=jnp.float32) * (-math.log(10000.0) / H))
    pe = jnp.zeros((max_len, 1, H), jnp.float32)
    pe = pe.at[:, 0, 0::2].set(jnp.sin(position * div_term))
    pe = pe.at[:, 0, 1::2].set(jnp.cos(position * div_term))
    p['pe'] = pe
    return p


def embed_and_pos(params, captions):
    """captions: (B, T) int32 -> (B, T, H) f32.
    TODO(synk): embedding gather stays in plain JAX (data-dependent gather; no clean
    rectangular BlockSpec), positional-encoding add comes along for free."""
    T = captions.shape[1]
    max_len = params['pe'].shape[0]
    assert T <= max_len, "PyTorch module hazard: pe max_len == embed_size limits T"
    emb = params['embed'][captions]                  # (B, T, H)
    return emb + params['pe'][:T, 0][None]           # dropout = identity (eval)


def decoder_transformer_forward(params, features, captions, *, num_layers, heads):
    """features: (B, M, H) f32; captions: (B, T) int32 -> (B, T, vocab) f32."""
    x = embed_and_pos(params, captions)
    return run_decoder(x, features, params, num_layers=num_layers, num_heads=heads)


# ---------------------------------------------------------------------------
# Pure-JAX reference (same math, independent formulation) for checking.
# ---------------------------------------------------------------------------
def reference_forward(params, features, captions, *, num_layers, heads):
    x = embed_and_pos(params, captions)
    B, T, H = x.shape
    M = features.shape[1]
    hd = H // heads
    scale = 1.0 / math.sqrt(hd)

    def bdot(a, w):
        return jnp.dot(a.astype(jnp.bfloat16), w, preferred_element_type=jnp.float32)

    def ln(y, g, b):
        mu = y.mean(-1, keepdims=True)
        var = ((y - mu) ** 2).mean(-1, keepdims=True)
        return (y - mu) * lax.rsqrt(var + 1e-5) * g + b

    def mha(q, k, v, wo, bo, causal):
        # q: (B, T, H) f32 (already scaled); k, v: (B, S, H) f32
        S = k.shape[1]
        qh = q.reshape(B, T, heads, hd).astype(jnp.bfloat16)
        kh = k.reshape(B, S, heads, hd).astype(jnp.bfloat16)
        vh = v.reshape(B, S, heads, hd).astype(jnp.bfloat16)
        s = jnp.einsum('bthd,bshd->bhts', qh, kh, preferred_element_type=jnp.float32)
        if causal:
            mask = jnp.tril(jnp.ones((T, S), bool))
            s = jnp.where(mask, s, -1e30)
        p = jax.nn.softmax(s, axis=-1)
        ctx = jnp.einsum('bhts,bshd->bthd', p.astype(jnp.bfloat16), vh,
                         preferred_element_type=jnp.float32).reshape(B, T, H)
        return bdot(ctx, wo) + bo

    for l in range(num_layers):
        # self attention
        qkv = bdot(x, params['sa_qkv_w'][l]) + params['sa_qkv_b'][l]
        q, k, v = qkv[..., :H] * scale, qkv[..., H:2 * H], qkv[..., 2 * H:]
        sa = mha(q, k, v, params['sa_o_w'][l], params['sa_o_b'][l], causal=True)
        x = ln(x + sa, params['ln_g'][l, 0], params['ln_b'][l, 0])

        # cross attention
        qc = (bdot(x, params['ca_q_w'][l]) + params['ca_q_b'][l]) * scale
        kv = bdot(features, params['ca_kv_w'][l]) + params['ca_kv_b'][l]
        kc, vc = kv[..., :H], kv[..., H:]
        ca = mha(qc, kc, vc, params['ca_o_w'][l], params['ca_o_b'][l], causal=False)
        x = ln(x + ca, params['ln_g'][l, 1], params['ln_b'][l, 1])

        # feed-forward
        h1 = jax.nn.relu(bdot(x, params['ff_w1'][l]) + params['ff_b1'][l]).astype(jnp.bfloat16)
        f = jnp.dot(h1, params['ff_w2'][l], preferred_element_type=jnp.float32) + params['ff_b2'][l]
        x = ln(x + f, params['ln_g'][l, 2], params['ln_b'][l, 2])

    return bdot(x, params['out_w']) + params['out_b']


if __name__ == "__main__":
    # small shapes consistent with the module
    embed_size = 32       # == hidden_size (required by the torch forward's pe-add)
    hidden_size = 32
    vocab_size = 128
    num_layers = 2
    heads = 4
    ff_dim = 2048         # nn.TransformerDecoderLayer default dim_feedforward
    B, T, M = 2, 8, 8     # batch, target seq len, memory (encoder feature) seq len

    key = jax.random.PRNGKey(0)
    kp, kf, kc = jax.random.split(key, 3)
    params = init_params(kp, embed_size=embed_size, hidden_size=hidden_size,
                         vocab_size=vocab_size, num_layers=num_layers,
                         heads=heads, ff_dim=ff_dim)
    # TODO(synk): EncoderVIT (pretrained torchvision ViT-B/16) has no Pallas equivalent;
    # `features` stands in for its (B, M, hidden) output.
    features = jax.random.normal(kf, (B, M, hidden_size), jnp.float32)
    captions = jax.random.randint(kc, (B, T), 0, vocab_size, jnp.int32)

    out = decoder_transformer_forward(params, features, captions,
                                      num_layers=num_layers, heads=heads)
    out = jax.block_until_ready(out)

    ref = jax.block_until_ready(
        reference_forward(params, features, captions, num_layers=num_layers, heads=heads))

    assert out.shape == (B, T, vocab_size), out.shape
    np.testing.assert_allclose(np.asarray(out), np.asarray(ref), rtol=2e-2, atol=2e-2)
    print("KERNEL_OK")
</pallas_src>

<mosaic_0001>
module attributes {stable_mosaic.version = 11 : i64} {
  func.func @decoder_layer_kernel(%arg0: i32, %arg1: i32, %arg2: memref<1x8x32xf32, #tpu.memory_space<vmem>>, %arg3: memref<1x8x32xf32, #tpu.memory_space<vmem>>, %arg4: memref<1x32x96xbf16, #tpu.memory_space<vmem>>, %arg5: memref<1x1x96xf32, #tpu.memory_space<vmem>>, %arg6: memref<1x32x32xbf16, #tpu.memory_space<vmem>>, %arg7: memref<1x1x32xf32, #tpu.memory_space<vmem>>, %arg8: memref<1x32x32xbf16, #tpu.memory_space<vmem>>, %arg9: memref<1x1x32xf32, #tpu.memory_space<vmem>>, %arg10: memref<1x32x64xbf16, #tpu.memory_space<vmem>>, %arg11: memref<1x1x64xf32, #tpu.memory_space<vmem>>, %arg12: memref<1x32x32xbf16, #tpu.memory_space<vmem>>, %arg13: memref<1x1x32xf32, #tpu.memory_space<vmem>>, %arg14: memref<1x32x2048xbf16, #tpu.memory_space<vmem>>, %arg15: memref<1x1x2048xf32, #tpu.memory_space<vmem>>, %arg16: memref<1x2048x32xbf16, #tpu.memory_space<vmem>>, %arg17: memref<1x1x32xf32, #tpu.memory_space<vmem>>, %arg18: memref<1x3x1x32xf32, #tpu.memory_space<vmem>>, %arg19: memref<1x3x1x32xf32, #tpu.memory_space<vmem>>, %arg20: memref<32x128xbf16, #tpu.memory_space<vmem>>, %arg21: memref<1x128xf32, #tpu.memory_space<vmem>>, %arg22: memref<1x8x128xf32, #tpu.memory_space<vmem>>, %arg23: memref<8x32xf32, #tpu.memory_space<vmem>>) attributes {dimension_semantics = [#tpu.dimension_semantics<parallel>, #tpu.dimension_semantics<arbitrary>], iteration_bounds = array<i64: 2, 2>, scalar_prefetch = 0 : i64, scratch_operands = 1 : i64, tpu.core_type = #tpu.core_type<tc>, window_params = [{transform_indices = @transform_0, window_bounds = array<i64: 1, 8, 32>}, {transform_indices = @transform_1, window_bounds = array<i64: 1, 8, 32>}, {transform_indices = @transform_2, window_bounds = array<i64: 1, 32, 96>}, {transform_indices = @transform_3, window_bounds = array<i64: 1, 1, 96>}, {transform_indices = @transform_4, window_bounds = array<i64: 1, 32, 32>}, {transform_indices = @transform_5, window_bounds = array<i64: 1, 1, 32>}, {transform_indices = @transform_6, window_bounds = array<i64: 1, 32, 32>}, {transform_indices = @transform_7, window_bounds = array<i64: 1, 1, 32>}, {transform_indices = @transform_8, window_bounds = array<i64: 1, 32, 64>}, {transform_indices = @transform_9, window_bounds = array<i64: 1, 1, 64>}, {transform_indices = @transform_10, window_bounds = array<i64: 1, 32, 32>}, {transform_indices = @transform_11, window_bounds = array<i64: 1, 1, 32>}, {transform_indices = @transform_12, window_bounds = array<i64: 1, 32, 2048>}, {transform_indices = @transform_13, window_bounds = array<i64: 1, 1, 2048>}, {transform_indices = @transform_14, window_bounds = array<i64: 1, 2048, 32>}, {transform_indices = @transform_15, window_bounds = array<i64: 1, 1, 32>}, {transform_indices = @transform_16, window_bounds = array<i64: 1, 3, 1, 32>}, {transform_indices = @transform_17, window_bounds = array<i64: 1, 3, 1, 32>}, {pipeline_mode = #tpu.pipeline_mode<synchronous>, transform_indices = @transform_18, window_bounds = array<i64: 32, 128>}, {pipeline_mode = #tpu.pipeline_mode<synchronous>, transform_indices = @transform_19, window_bounds = array<i64: 1, 128>}, {transform_indices = @transform_20, window_bounds = array<i64: 1, 8, 128>}]} {
    %c0_i32 = arith.constant 0 : i32
    %0 = arith.cmpi eq, %arg1, %c0_i32 : i32
    %1 = arith.extui %0 : i1 to i32
    %c0_i32_0 = arith.constant 0 : i32
    %2 = arith.cmpi ne, %1, %c0_i32_0 : i32
    scf.if %2 {
      %c0_132 = arith.constant 0 : index
      %c0_133 = arith.constant 0 : index
      %c0_134 = arith.constant 0 : index
      %335 = vector.load %arg2[%c0_132, %c0_133, %c0_134] : memref<1x8x32xf32, #tpu.memory_space<vmem>>, vector<1x8x32xf32>
      %336 = vector.shape_cast %335 : vector<1x8x32xf32> to vector<8x32xf32>
      %c0_135 = arith.constant 0 : index
      %c0_136 = arith.constant 0 : index
      %337 = vector.load %arg23[%c0_135, %c0_136] : memref<8x32xf32, #tpu.memory_space<vmem>>, vector<8x32xf32>
      tpu.vector_store %arg23[%c0_135, %c0_136], %336 {strides = array<i32>} : memref<8x32xf32, #tpu.memory_space<vmem>>, vector<8x32xf32>,
    } else {
    }
    %c0 = arith.constant 0 : index
    %c0_1 = arith.constant 0 : index
    %3 = vector.load %arg23[%c0, %c0_1] : memref<8x32xf32, #tpu.memory_space<vmem>>, vector<8x32xf32>
    %c0_2 = arith.constant 0 : index
    %c0_3 = arith.constant 0 : index
    %c0_4 = arith.constant 0 : index
    %4 = vector.load %arg3[%c0_2, %c0_3, %c0_4] : memref<1x8x32xf32, #tpu.memory_space<vmem>>, vector<1x8x32xf32>
    %5 = vector.shape_cast %4 : vector<1x8x32xf32> to vector<8x32xf32>
    %6 = tpu.iota {dimensions = array<i32: 0>} : vector<8x8xi32>
    %7 = tpu.iota {dimensions = array<i32: 1>} : vector<8x8xi32>
    %8 = arith.cmpi sle, %7, %6 : vector<8x8xi32>
    %c0_5 = arith.constant 0 : index
    %c0_6 = arith.constant 0 : index
    %c0_7 = arith.constant 0 : index
    %9 = vector.load %arg4[%c0_5, %c0_6, %c0_7] : memref<1x32x96xbf16, #tpu.memory_space<vmem>>, vector<1x32x96xbf16>
    %10 = vector.shape_cast %9 : vector<1x32x96xbf16> to vector<32x96xbf16>
    %11 = arith.truncf %3 : vector<8x32xf32> to vector<8x32xbf16>
    %cst = arith.constant dense<0.000000e+00> : vector<8x96xf32>
    %12 = tpu.matmul %11, %10, %cst {dimension_numbers = #tpu.dot_dimension_numbers<[1], [0], [0], [1], [0, 0, 1, 1], [], []>} : vector<8x32xbf16>, vector<32x96xbf16>, vector<8x96xf32> -> vector<8x96xf32>
    %c0_8 = arith.constant 0 : index
    %c0_9 = arith.constant 0 : index
    %c0_10 = arith.constant 0 : index
    %13 = vector.load %arg5[%c0_8, %c0_9, %c0_10] : memref<1x1x96xf32, #tpu.memory_space<vmem>>, vector<1x1x96xf32>
    %14 = vector.shape_cast %13 : vector<1x1x96xf32> to vector<1x96xf32>
    %15 = vector.broadcast %14 : vector<1x96xf32> to vector<8x96xf32>
    %16 = arith.addf %12, %15 : vector<8x96xf32>
    %17 = vector.extract_strided_slice %16 {offsets = [0, 0], sizes = [8, 32], strides = [1, 1]} : vector<8x96xf32> to vector<8x32xf32>
    %cst_11 = arith.constant 0.353553385 : f32
    %18 = vector.broadcast %cst_11 : f32 to vector<8x32xf32>
    %19 = arith.mulf %17, %18 : vector<8x32xf32>
    %20 = vector.shape_cast %19 : vector<8x32xf32> to vector<1x8x32xf32>
    %21 = vector.extract_strided_slice %16 {offsets = [0, 32], sizes = [8, 32], strides = [1, 1]} : vector<8x96xf32> to vector<8x32xf32>
    %22 = vector.shape_cast %21 : vector<8x32xf32> to vector<1x8x32xf32>
    %23 = vector.extract_strided_slice %16 {offsets = [0, 64], sizes = [8, 32], strides = [1, 1]} : vector<8x96xf32> to vector<8x32xf32>
    %24 = vector.shape_cast %23 : vector<8x32xf32> to vector<1x8x32xf32>
    %c0_12 = arith.constant 0 : index
    %c0_13 = arith.constant 0 : index
    %c0_14 = arith.constant 0 : index
    %25 = vector.load %arg6[%c0_12, %c0_13, %c0_14] : memref<1x32x32xbf16, #tpu.memory_space<vmem>>, vector<1x32x32xbf16>
    %26 = vector.shape_cast %25 : vector<1x32x32xbf16> to vector<32x32xbf16>
    %c0_15 = arith.constant 0 : index
    %c0_16 = arith.constant 0 : index
    %c0_17 = arith.constant 0 : index
    %27 = vector.load %arg7[%c0_15, %c0_16, %c0_17] : memref<1x1x32xf32, #tpu.memory_space<vmem>>, vector<1x1x32xf32>
    %28 = vector.shape_cast %27 : vector<1x1x32xf32> to vector<1x32xf32>
    %29 = vector.extract_strided_slice %20 {offsets = [0, 0, 0], sizes = [1, 8, 8], strides = [1, 1, 1]} : vector<1x8x32xf32> to vector<1x8x8xf32>
    %30 = arith.truncf %29 : vector<1x8x8xf32> to vector<1x8x8xbf16>
    %31 = vector.extract_strided_slice %22 {offsets = [0, 0, 0], sizes = [1, 8, 8], strides = [1, 1, 1]} : vector<1x8x32xf32> to vector<1x8x8xf32>
    %32 = arith.truncf %31 : vector<1x8x8xf32> to vector<1x8x8xbf16>
    %33 = vector.extract_strided_slice %24 {offsets = [0, 0, 0], sizes = [1, 8, 8], strides = [1, 1, 1]} : vector<1x8x32xf32> to vector<1x8x8xf32>
    %34 = arith.truncf %33 : vector<1x8x8xf32> to vector<1x8x8xbf16>
    "tpu.trace_start"() <{level = 10 : i32, message = "btd,bsd->bts"}> : () -> ()
    %cst_18 = arith.constant dense<0.000000e+00> : vector<1x8x8xf32>
    %35 = tpu.matmul %30, %32, %cst_18 {dimension_numbers = #tpu.dot_dimension_numbers<[2], [2], [1], [1], [0, 0, 0, 1, 1, 1], [0], [0]>} : vector<1x8x8xbf16>, vector<1x8x8xbf16>, vector<1x8x8xf32> -> vector<1x8x8xf32>
    "tpu.trace_stop"() : () -> ()
    %36 = vector.shape_cast %8 : vector<8x8xi1> to vector<1x8x8xi1>
    %cst_19 = arith.constant -1.000000e+30 : f32
    %37 = vector.broadcast %cst_19 : f32 to vector<1x8x8xf32>
    %38 = arith.select %36, %35, %37 : vector<1x8x8xi1>, vector<1x8x8xf32>
    %cst_20 = arith.constant dense<0xFF800000> : vector<1x8xf32>
    %39 = vector.multi_reduction <maximumf>, %38, %cst_20 [2] : vector<1x8x8xf32> to vector<1x8xf32>
    %40 = vector.shape_cast %39 : vector<1x8xf32> to vector<1x8x1xf32>
    %41 = vector.broadcast %40 : vector<1x8x1xf32> to vector<1x8x8xf32>
    %42 = arith.subf %38, %41 : vector<1x8x8xf32>
    %43 = math.exp %42 : vector<1x8x8xf32>
    %cst_21 = arith.constant dense<0.000000e+00> : vector<1x8xf32>
    %44 = vector.multi_reduction <add>, %43, %cst_21 [2] : vector<1x8x8xf32> to vector<1x8xf32>
    %45 = vector.shape_cast %44 : vector<1x8xf32> to vector<1x8x1xf32>
    %46 = tpu.reciprocal %45 {approx = true} : vector<1x8x1xf32> -> vector<1x8x1xf32>
    %47 = vector.broadcast %46 : vector<1x8x1xf32> to vector<1x8x8xf32>
    %48 = arith.mulf %43, %47 : vector<1x8x8xf32>
    %49 = arith.truncf %48 : vector<1x8x8xf32> to vector<1x8x8xbf16>
    "tpu.trace_start"() <{level = 10 : i32, message = "bts,bsd->btd"}> : () -> ()
    %cst_22 = arith.constant dense<0.000000e+00> : vector<1x8x8xf32>
    %50 = tpu.matmul %49, %34, %cst_22 {dimension_numbers = #tpu.dot_dimension_numbers<[2], [1], [1], [2], [0, 0, 0, 1, 1, 2], [0], [0]>} : vector<1x8x8xbf16>, vector<1x8x8xbf16>, vector<1x8x8xf32> -> vector<1x8x8xf32>
    "tpu.trace_stop"() : () -> ()
    %51 = vector.extract_strided_slice %20 {offsets = [0, 0, 8], sizes = [1, 8, 8], strides = [1, 1, 1]} : vector<1x8x32xf32> to vector<1x8x8xf32>
    %52 = arith.truncf %51 : vector<1x8x8xf32> to vector<1x8x8xbf16>
    %53 = vector.extract_strided_slice %22 {offsets = [0, 0, 8], sizes = [1, 8, 8], strides = [1, 1, 1]} : vector<1x8x32xf32> to vector<1x8x8xf32>
    %54 = arith.truncf %53 : vector<1x8x8xf32> to vector<1x8x8xbf16>
    %55 = vector.extract_strided_slice %24 {offsets = [0, 0, 8], sizes = [1, 8, 8], strides = [1, 1, 1]} : vector<1x8x32xf32> to vector<1x8x8xf32>
    %56 = arith.truncf %55 : vector<1x8x8xf32> to vector<1x8x8xbf16>
    "tpu.trace_start"() <{level = 10 : i32, message = "btd,bsd->bts"}> : () -> ()
    %cst_23 = arith.constant dense<0.000000e+00> : vector<1x8x8xf32>
    %57 = tpu.matmul %52, %54, %cst_23 {dimension_numbers = #tpu.dot_dimension_numbers<[2], [2], [1], [1], [0, 0, 0, 1, 1, 1], [0], [0]>} : vector<1x8x8xbf16>, vector<1x8x8xbf16>, vector<1x8x8xf32> -> vector<1x8x8xf32>
    "tpu.trace_stop"() : () -> ()
    %58 = vector.shape_cast %8 : vector<8x8xi1> to vector<1x8x8xi1>
    %cst_24 = arith.constant -1.000000e+30 : f32
    %59 = vector.broadcast %cst_24 : f32 to vector<1x8x8xf32>
    %60 = arith.select %58, %57, %59 : vector<1x8x8xi1>, vector<1x8x8xf32>
    %cst_25 = arith.constant dense<0xFF800000> : vector<1x8xf32>
    %61 = vector.multi_reduction <maximumf>, %60, %cst_25 [2] : vector<1x8x8xf32> to vector<1x8xf32>
    %62 = vector.shape_cast %61 : vector<1x8xf32> to vector<1x8x1xf32>
    %63 = vector.broadcast %62 : vector<1x8x1xf32> to vector<1x8x8xf32>
    %64 = arith.subf %60, %63 : vector<1x8x8xf32>
    %65 = math.exp %64 : vector<1x8x8xf32>
    %cst_26 = arith.constant dense<0.000000e+00> : vector<1x8xf32>
    %66 = vector.multi_reduction <add>, %65, %cst_26 [2] : vector<1x8x8xf32> to vector<1x8xf32>
    %67 = vector.shape_cast %66 : vector<1x8xf32> to vector<1x8x1xf32>
    %68 = tpu.reciprocal %67 {approx = true} : vector<1x8x1xf32> -> vector<1x8x1xf32>
    %69 = vector.broadcast %68 : vector<1x8x1xf32> to vector<1x8x8xf32>
    %70 = arith.mulf %65, %69 : vector<1x8x8xf32>
    %71 = arith.truncf %70 : vector<1x8x8xf32> to vector<1x8x8xbf16>
    "tpu.trace_start"() <{level = 10 : i32, message = "bts,bsd->btd"}> : () -> ()
    %cst_27 = arith.constant dense<0.000000e+00> : vector<1x8x8xf32>
    %72 = tpu.matmul %71, %56, %cst_27 {dimension_numbers = #tpu.dot_dimension_numbers<[2], [1], [1], [2], [0, 0, 0, 1, 1, 2], [0], [0]>} : vector<1x8x8xbf16>, vector<1x8x8xbf16>, vector<1x8x8xf32> -> vector<1x8x8xf32>
    "tpu.trace_stop"() : () -> ()
    %73 = vector.extract_strided_slice %20 {offsets = [0, 0, 16], sizes = [1, 8, 8], strides = [1, 1, 1]} : vector<1x8x32xf32> to vector<1x8x8xf32>
    %74 = arith.truncf %73 : vector<1x8x8xf32> to vector<1x8x8xbf16>
    %75 = vector.extract_strided_slice %22 {offsets = [0, 0, 16], sizes = [1, 8, 8], strides = [1, 1, 1]} : vector<1x8x32xf32> to vector<1x8x8xf32>
    %76 = arith.truncf %75 : vector<1x8x8xf32> to vector<1x8x8xbf16>
    %77 = vector.extract_strided_slice %24 {offsets = [0, 0, 16], sizes = [1, 8, 8], strides = [1, 1, 1]} : vector<1x8x32xf32> to vector<1x8x8xf32>
    %78 = arith.truncf %77 : vector<1x8x8xf32> to vector<1x8x8xbf16>
    "tpu.trace_start"() <{level = 10 : i32, message = "btd,bsd->bts"}> : () -> ()
    %cst_28 = arith.constant dense<0.000000e+00> : vector<1x8x8xf32>
    %79 = tpu.matmul %74, %76, %cst_28 {dimension_numbers = #tpu.dot_dimension_numbers<[2], [2], [1], [1], [0, 0, 0, 1, 1, 1], [0], [0]>} : vector<1x8x8xbf16>, vector<1x8x8xbf16>, vector<1x8x8xf32> -> vector<1x8x8xf32>
    "tpu.trace_stop"() : () -> ()
    %80 = vector.shape_cast %8 : vector<8x8xi1> to vector<1x8x8xi1>
    %cst_29 = arith.constant -1.000000e+30 : f32
    %81 = vector.broadcast %cst_29 : f32 to vector<1x8x8xf32>
    %82 = arith.select %80, %79, %81 : vector<1x8x8xi1>, vector<1x8x8xf32>
    %cst_30 = arith.constant dense<0xFF800000> : vector<1x8xf32>
    %83 = vector.multi_reduction <maximumf>, %82, %cst_30 [2] : vector<1x8x8xf32> to vector<1x8xf32>
    %84 = vector.shape_cast %83 : vector<1x8xf32> to vector<1x8x1xf32>
    %85 = vector.broadcast %84 : vector<1x8x1xf32> to vector<1x8x8xf32>
    %86 = arith.subf %82, %85 : vector<1x8x8xf32>
    %87 = math.exp %86 : vector<1x8x8xf32>
    %cst_31 = arith.constant dense<0.000000e+00> : vector<1x8xf32>
    %88 = vector.multi_reduction <add>, %87, %cst_31 [2] : vector<1x8x8xf32> to vector<1x8xf32>
    %89 = vector.shape_cast %88 : vector<1x8xf32> to vector<1x8x1xf32>
    %90 = tpu.reciprocal %89 {approx = true} : vector<1x8x1xf32> -> vector<1x8x1xf32>
    %91 = vector.broadcast %90 : vector<1x8x1xf32> to vector<1x8x8xf32>
    %92 = arith.mulf %87, %91 : vector<1x8x8xf32>
    %93 = arith.truncf %92 : vector<1x8x8xf32> to vector<1x8x8xbf16>
    "tpu.trace_start"() <{level = 10 : i32, message = "bts,bsd->btd"}> : () -> ()
    %cst_32 = arith.constant dense<0.000000e+00> : vector<1x8x8xf32>
    %94 = tpu.matmul %93, %78, %cst_32 {dimension_numbers = #tpu.dot_dimension_numbers<[2], [1], [1], [2], [0, 0, 0, 1, 1, 2], [0], [0]>} : vector<1x8x8xbf16>, vector<1x8x8xbf16>, vector<1x8x8xf32> -> vector<1x8x8xf32>
    "tpu.trace_stop"() : () -> ()
    %95 = vector.extract_strided_slice %20 {offsets = [0, 0, 24], sizes = [1, 8, 8], strides = [1, 1, 1]} : vector<1x8x32xf32> to vector<1x8x8xf32>
    %96 = arith.truncf %95 : vector<1x8x8xf32> to vector<1x8x8xbf16>
    %97 = vector.extract_strided_slice %22 {offsets = [0, 0, 24], sizes = [1, 8, 8], strides = [1, 1, 1]} : vector<1x8x32xf32> to vector<1x8x8xf32>
    %98 = arith.truncf %97 : vector<1x8x8xf32> to vector<1x8x8xbf16>
    %99 = vector.extract_strided_slice %24 {offsets = [0, 0, 24], sizes = [1, 8, 8], strides = [1, 1, 1]} : vector<1x8x32xf32> to vector<1x8x8xf32>
    %100 = arith.truncf %99 : vector<1x8x8xf32> to vector<1x8x8xbf16>
    "tpu.trace_start"() <{level = 10 : i32, message = "btd,bsd->bts"}> : () -> ()
    %cst_33 = arith.constant dense<0.000000e+00> : vector<1x8x8xf32>
    %101 = tpu.matmul %96, %98, %cst_33 {dimension_numbers = #tpu.dot_dimension_numbers<[2], [2], [1], [1], [0, 0, 0, 1, 1, 1], [0], [0]>} : vector<1x8x8xbf16>, vector<1x8x8xbf16>, vector<1x8x8xf32> -> vector<1x8x8xf32>
    "tpu.trace_stop"() : () -> ()
    %102 = vector.shape_cast %8 : vector<8x8xi1> to vector<1x8x8xi1>
    %cst_34 = arith.constant -1.000000e+30 : f32
    %103 = vector.broadcast %cst_34 : f32 to vector<1x8x8xf32>
    %104 = arith.select %102, %101, %103 : vector<1x8x8xi1>, vector<1x8x8xf32>
    %cst_35 = arith.constant dense<0xFF800000> : vector<1x8xf32>
    %105 = vector.multi_reduction <maximumf>, %104, %cst_35 [2] : vector<1x8x8xf32> to vector<1x8xf32>
    %106 = vector.shape_cast %105 : vector<1x8xf32> to vector<1x8x1xf32>
    %107 = vector.broadcast %106 : vector<1x8x1xf32> to vector<1x8x8xf32>
    %108 = arith.subf %104, %107 : vector<1x8x8xf32>
    %109 = math.exp %108 : vector<1x8x8xf32>
    %cst_36 = arith.constant dense<0.000000e+00> : vector<1x8xf32>
    %110 = vector.multi_reduction <add>, %109, %cst_36 [2] : vector<1x8x8xf32> to vector<1x8xf32>
    %111 = vector.shape_cast %110 : vector<1x8xf32> to vector<1x8x1xf32>
    %112 = tpu.reciprocal %111 {approx = true} : vector<1x8x1xf32> -> vector<1x8x1xf32>
    %113 = vector.broadcast %112 : vector<1x8x1xf32> to vector<1x8x8xf32>
    %114 = arith.mulf %109, %113 : vector<1x8x8xf32>
    %115 = arith.truncf %114 : vector<1x8x8xf32> to vector<1x8x8xbf16>
    "tpu.trace_start"() <{level = 10 : i32, message = "bts,bsd->btd"}> : () -> ()
    %cst_37 = arith.constant dense<0.000000e+00> : vector<1x8x8xf32>
    %116 = tpu.matmul %115, %100, %cst_37 {dimension_numbers = #tpu.dot_dimension_numbers<[2], [1], [1], [2], [0, 0, 0, 1, 1, 2], [0], [0]>} : vector<1x8x8xbf16>, vector<1x8x8xbf16>, vector<1x8x8xf32> -> vector<1x8x8xf32>
    "tpu.trace_stop"() : () -> ()
    %117 = tpu.concatenate %50, %72, %94, %116 in 2 : vector<1x8x8xf32>, vector<1x8x8xf32>, vector<1x8x8xf32>, vector<1x8x8xf32> -> vector<1x8x32xf32>
    %118 = vector.shape_cast %117 : vector<1x8x32xf32> to vector<8x32xf32>
    %119 = arith.truncf %118 : vector<8x32xf32> to vector<8x32xbf16>
    %cst_38 = arith.constant dense<0.000000e+00> : vector<8x32xf32>
    %120 = tpu.matmul %119, %26, %cst_38 {dimension_numbers = #tpu.dot_dimension_numbers<[1], [0], [0], [1], [0, 0, 1, 1], [], []>} : vector<8x32xbf16>, vector<32x32xbf16>, vector<8x32xf32> -> vector<8x32xf32>
    %121 = vector.broadcast %28 : vector<1x32xf32> to vector<8x32xf32>
    %122 = arith.addf %120, %121 : vector<8x32xf32>
    %123 = arith.addf %3, %122 : vector<8x32xf32>
    %c0_39 = arith.constant 0 : index
    %c0_40 = arith.constant 0 : index
    %c0_41 = arith.constant 0 : index
    %c0_42 = arith.constant 0 : index
    %124 = vector.load %arg18[%c0_39, %c0_40, %c0_41, %c0_42] : memref<1x3x1x32xf32, #tpu.memory_space<vmem>>, vector<1x1x1x32xf32>
    %125 = vector.shape_cast %124 : vector<1x1x1x32xf32> to vector<1x32xf32>
    %c0_43 = arith.constant 0 : index
    %c0_44 = arith.constant 0 : index
    %c0_45 = arith.constant 0 : index
    %c0_46 = arith.constant 0 : index
    %126 = vector.load %arg19[%c0_43, %c0_44, %c0_45, %c0_46] : memref<1x3x1x32xf32, #tpu.memory_space<vmem>>, vector<1x1x1x32xf32>
    %127 = vector.shape_cast %126 : vector<1x1x1x32xf32> to vector<1x32xf32>
    %cst_47 = arith.constant dense<0.000000e+00> : vector<8xf32>
    %128 = vector.multi_reduction <add>, %123, %cst_47 [1] : vector<8x32xf32> to vector<8xf32>
    %129 = vector.shape_cast %128 : vector<8xf32> to vector<8x1xf32>
    %cst_48 = arith.constant 3.200000e+01 : f32
    %130 = vector.broadcast %cst_48 : f32 to vector<8x1xf32>
    %131 = arith.divf %129, %130 : vector<8x1xf32>
    %132 = vector.broadcast %131 : vector<8x1xf32> to vector<8x32xf32>
    %133 = arith.subf %123, %132 : vector<8x32xf32>
    %134 = arith.mulf %133, %133 : vector<8x32xf32>
    %cst_49 = arith.constant dense<0.000000e+00> : vector<8xf32>
    %135 = vector.multi_reduction <add>, %134, %cst_49 [1] : vector<8x32xf32> to vector<8xf32>
    %136 = vector.shape_cast %135 : vector<8xf32> to vector<8x1xf32>
    %cst_50 = arith.constant 3.200000e+01 : f32
    %137 = vector.broadcast %cst_50 : f32 to vector<8x1xf32>
    %138 = arith.divf %136, %137 : vector<8x1xf32>
    %139 = vector.broadcast %131 : vector<8x1xf32> to vector<8x32xf32>
    %140 = arith.subf %123, %139 : vector<8x32xf32>
    %cst_51 = arith.constant 9.99999974E-6 : f32
    %141 = vector.broadcast %cst_51 : f32 to vector<8x1xf32>
    %142 = arith.addf %138, %141 : vector<8x1xf32>
    %143 = math.rsqrt %142 : vector<8x1xf32>
    %144 = vector.broadcast %143 : vector<8x1xf32> to vector<8x32xf32>
    %145 = arith.mulf %140, %144 : vector<8x32xf32>
    %146 = vector.broadcast %125 : vector<1x32xf32> to vector<8x32xf32>
    %147 = arith.mulf %145, %146 : vector<8x32xf32>
    %148 = vector.broadcast %127 : vector<1x32xf32> to vector<8x32xf32>
    %149 = arith.addf %147, %148 : vector<8x32xf32>
    %c0_52 = arith.constant 0 : index
    %c0_53 = arith.constant 0 : index
    %c0_54 = arith.constant 0 : index
    %150 = vector.load %arg8[%c0_52, %c0_53, %c0_54] : memref<1x32x32xbf16, #tpu.memory_space<vmem>>, vector<1x32x32xbf16>
    %151 = vector.shape_cast %150 : vector<1x32x32xbf16> to vector<32x32xbf16>
    %152 = arith.truncf %149 : vector<8x32xf32> to vector<8x32xbf16>
    %cst_55 = arith.constant dense<0.000000e+00> : vector<8x32xf32>
    %153 = tpu.matmul %152, %151, %cst_55 {dimension_numbers = #tpu.dot_dimension_numbers<[1], [0], [0], [1], [0, 0, 1, 1], [], []>} : vector<8x32xbf16>, vector<32x32xbf16>, vector<8x32xf32> -> vector<8x32xf32>
    %c0_56 = arith.constant 0 : index
    %c0_57 = arith.constant 0 : index
    %c0_58 = arith.constant 0 : index
    %154 = vector.load %arg9[%c0_56, %c0_57, %c0_58] : memref<1x1x32xf32, #tpu.memory_space<vmem>>, vector<1x1x32xf32>
    %155 = vector.shape_cast %154 : vector<1x1x32xf32> to vector<1x32xf32>
    %156 = vector.broadcast %155 : vector<1x32xf32> to vector<8x32xf32>
    %157 = arith.addf %153, %156 : vector<8x32xf32>
    %cst_59 = arith.constant 0.353553385 : f32
    %158 = vector.broadcast %cst_59 : f32 to vector<8x32xf32>
    %159 = arith.mulf %157, %158 : vector<8x32xf32>
    %160 = vector.shape_cast %159 : vector<8x32xf32> to vector<1x8x32xf32>
    %c0_60 = arith.constant 0 : index
    %c0_61 = arith.constant 0 : index
    %c0_62 = arith.constant 0 : index
    %161 = vector.load %arg10[%c0_60, %c0_61, %c0_62] : memref<1x32x64xbf16, #tpu.memory_space<vmem>>, vector<1x32x64xbf16>
    %162 = vector.shape_cast %161 : vector<1x32x64xbf16> to vector<32x64xbf16>
    %163 = arith.truncf %5 : vector<8x32xf32> to vector<8x32xbf16>
    %cst_63 = arith.constant dense<0.000000e+00> : vector<8x64xf32>
    %164 = tpu.matmul %163, %162, %cst_63 {dimension_numbers = #tpu.dot_dimension_numbers<[1], [0], [0], [1], [0, 0, 1, 1], [], []>} : vector<8x32xbf16>, vector<32x64xbf16>, vector<8x64xf32> -> vector<8x64xf32>
    %c0_64 = arith.constant 0 : index
    %c0_65 = arith.constant 0 : index
    %c0_66 = arith.constant 0 : index
    %165 = vector.load %arg11[%c0_64, %c0_65, %c0_66] : memref<1x1x64xf32, #tpu.memory_space<vmem>>, vector<1x1x64xf32>
    %166 = vector.shape_cast %165 : vector<1x1x64xf32> to vector<1x64xf32>
    %167 = vector.broadcast %166 : vector<1x64xf32> to vector<8x64xf32>
    %168 = arith.addf %164, %167 : vector<8x64xf32>
    %169 = vector.extract_strided_slice %168 {offsets = [0, 0], sizes = [8, 32], strides = [1, 1]} : vector<8x64xf32> to vector<8x32xf32>
    %170 = vector.shape_cast %169 : vector<8x32xf32> to vector<1x8x32xf32>
    %171 = vector.extract_strided_slice %168 {offsets = [0, 32], sizes = [8, 32], strides = [1, 1]} : vector<8x64xf32> to vector<8x32xf32>
    %172 = vector.shape_cast %171 : vector<8x32xf32> to vector<1x8x32xf32>
    %c0_67 = arith.constant 0 : index
    %c0_68 = arith.constant 0 : index
    %c0_69 = arith.constant 0 : index
    %173 = vector.load %arg12[%c0_67, %c0_68, %c0_69] : memref<1x32x32xbf16, #tpu.memory_space<vmem>>, vector<1x32x32xbf16>
    %174 = vector.shape_cast %173 : vector<1x32x32xbf16> to vector<32x32xbf16>
    %c0_70 = arith.constant 0 : index
    %c0_71 = arith.constant 0 : index
    %c0_72 = arith.constant 0 : index
    %175 = vector.load %arg13[%c0_70, %c0_71, %c0_72] : memref<1x1x32xf32, #tpu.memory_space<vmem>>, vector<1x1x32xf32>
    %176 = vector.shape_cast %175 : vector<1x1x32xf32> to vector<1x32xf32>
    %177 = vector.extract_strided_slice %160 {offsets = [0, 0, 0], sizes = [1, 8, 8], strides = [1, 1, 1]} : vector<1x8x32xf32> to vector<1x8x8xf32>
    %178 = arith.truncf %177 : vector<1x8x8xf32> to vector<1x8x8xbf16>
    %179 = vector.extract_strided_slice %170 {offsets = [0, 0, 0], sizes = [1, 8, 8], strides = [1, 1, 1]} : vector<1x8x32xf32> to vector<1x8x8xf32>
    %180 = arith.truncf %179 : vector<1x8x8xf32> to vector<1x8x8xbf16>
    %181 = vector.extract_strided_slice %172 {offsets = [0, 0, 0], sizes = [1, 8, 8], strides = [1, 1, 1]} : vector<1x8x32xf32> to vector<1x8x8xf32>
    %182 = arith.truncf %181 : vector<1x8x8xf32> to vector<1x8x8xbf16>
    "tpu.trace_start"() <{level = 10 : i32, message = "btd,bsd->bts"}> : () -> ()
    %cst_73 = arith.constant dense<0.000000e+00> : vector<1x8x8xf32>
    %183 = tpu.matmul %178, %180, %cst_73 {dimension_numbers = #tpu.dot_dimension_numbers<[2], [2], [1], [1], [0, 0, 0, 1, 1, 1], [0], [0]>} : vector<1x8x8xbf16>, vector<1x8x8xbf16>, vector<1x8x8xf32> -> vector<1x8x8xf32>
    "tpu.trace_stop"() : () -> ()
    %cst_74 = arith.constant dense<0xFF800000> : vector<1x8xf32>
    %184 = vector.multi_reduction <maximumf>, %183, %cst_74 [2] : vector<1x8x8xf32> to vector<1x8xf32>
    %185 = vector.shape_cast %184 : vector<1x8xf32> to vector<1x8x1xf32>
    %186 = vector.broadcast %185 : vector<1x8x1xf32> to vector<1x8x8xf32>
    %187 = arith.subf %183, %186 : vector<1x8x8xf32>
    %188 = math.exp %187 : vector<1x8x8xf32>
    %cst_75 = arith.constant dense<0.000000e+00> : vector<1x8xf32>
    %189 = vector.multi_reduction <add>, %188, %cst_75 [2] : vector<1x8x8xf32> to vector<1x8xf32>
    %190 = vector.shape_cast %189 : vector<1x8xf32> to vector<1x8x1xf32>
    %191 = tpu.reciprocal %190 {approx = true} : vector<1x8x1xf32> -> vector<1x8x1xf32>
    %192 = vector.broadcast %191 : vector<1x8x1xf32> to vector<1x8x8xf32>
    %193 = arith.mulf %188, %192 : vector<1x8x8xf32>
    %194 = arith.truncf %193 : vector<1x8x8xf32> to vector<1x8x8xbf16>
    "tpu.trace_start"() <{level = 10 : i32, message = "bts,bsd->btd"}> : () -> ()
    %cst_76 = arith.constant dense<0.000000e+00> : vector<1x8x8xf32>
    %195 = tpu.matmul %194, %182, %cst_76 {dimension_numbers = #tpu.dot_dimension_numbers<[2], [1], [1], [2], [0, 0, 0, 1, 1, 2], [0], [0]>} : vector<1x8x8xbf16>, vector<1x8x8xbf16>, vector<1x8x8xf32> -> vector<1x8x8xf32>
    "tpu.trace_stop"() : () -> ()
    %196 = vector.extract_strided_slice %160 {offsets = [0, 0, 8], sizes = [1, 8, 8], strides = [1, 1, 1]} : vector<1x8x32xf32> to vector<1x8x8xf32>
    %197 = arith.truncf %196 : vector<1x8x8xf32> to vector<1x8x8xbf16>
    %198 = vector.extract_strided_slice %170 {offsets = [0, 0, 8], sizes = [1, 8, 8], strides = [1, 1, 1]} : vector<1x8x32xf32> to vector<1x8x8xf32>
    %199 = arith.truncf %198 : vector<1x8x8xf32> to vector<1x8x8xbf16>
    %200 = vector.extract_strided_slice %172 {offsets = [0, 0, 8], sizes = [1, 8, 8], strides = [1, 1, 1]} : vector<1x8x32xf32> to vector<1x8x8xf32>
    %201 = arith.truncf %200 : vector<1x8x8xf32> to vector<1x8x8xbf16>
    "tpu.trace_start"() <{level = 10 : i32, message = "btd,bsd->bts"}> : () -> ()
    %cst_77 = arith.constant dense<0.000000e+00> : vector<1x8x8xf32>
    %202 = tpu.matmul %197, %199, %cst_77 {dimension_numbers = #tpu.dot_dimension_numbers<[2], [2], [1], [1], [0, 0, 0, 1, 1, 1], [0], [0]>} : vector<1x8x8xbf16>, vector<1x8x8xbf16>, vector<1x8x8xf32> -> vector<1x8x8xf32>
    "tpu.trace_stop"() : () -> ()
    %cst_78 = arith.constant dense<0xFF800000> : vector<1x8xf32>
    %203 = vector.multi_reduction <maximumf>, %202, %cst_78 [2] : vector<1x8x8xf32> to vector<1x8xf32>
    %204 = vector.shape_cast %203 : vector<1x8xf32> to vector<1x8x1xf32>
    %205 = vector.broadcast %204 : vector<1x8x1xf32> to vector<1x8x8xf32>
    %206 = arith.subf %202, %205 : vector<1x8x8xf32>
    %207 = math.exp %206 : vector<1x8x8xf32>
    %cst_79 = arith.constant dense<0.000000e+00> : vector<1x8xf32>
    %208 = vector.multi_reduction <add>, %207, %cst_79 [2] : vector<1x8x8xf32> to vector<1x8xf32>
    %209 = vector.shape_cast %208 : vector<1x8xf32> to vector<1x8x1xf32>
    %210 = tpu.reciprocal %209 {approx = true} : vector<1x8x1xf32> -> vector<1x8x1xf32>
    %211 = vector.broadcast %210 : vector<1x8x1xf32> to vector<1x8x8xf32>
    %212 = arith.mulf %207, %211 : vector<1x8x8xf32>
    %213 = arith.truncf %212 : vector<1x8x8xf32> to vector<1x8x8xbf16>
    "tpu.trace_start"() <{level = 10 : i32, message = "bts,bsd->btd"}> : () -> ()
    %cst_80 = arith.constant dense<0.000000e+00> : vector<1x8x8xf32>
    %214 = tpu.matmul %213, %201, %cst_80 {dimension_numbers = #tpu.dot_dimension_numbers<[2], [1], [1], [2], [0, 0, 0, 1, 1, 2], [0], [0]>} : vector<1x8x8xbf16>, vector<1x8x8xbf16>, vector<1x8x8xf32> -> vector<1x8x8xf32>
    "tpu.trace_stop"() : () -> ()
    %215 = vector.extract_strided_slice %160 {offsets = [0, 0, 16], sizes = [1, 8, 8], strides = [1, 1, 1]} : vector<1x8x32xf32> to vector<1x8x8xf32>
    %216 = arith.truncf %215 : vector<1x8x8xf32> to vector<1x8x8xbf16>
    %217 = vector.extract_strided_slice %170 {offsets = [0, 0, 16], sizes = [1, 8, 8], strides = [1, 1, 1]} : vector<1x8x32xf32> to vector<1x8x8xf32>
    %218 = arith.truncf %217 : vector<1x8x8xf32> to vector<1x8x8xbf16>
    %219 = vector.extract_strided_slice %172 {offsets = [0, 0, 16], sizes = [1, 8, 8], strides = [1, 1, 1]} : vector<1x8x32xf32> to vector<1x8x8xf32>
    %220 = arith.truncf %219 : vector<1x8x8xf32> to vector<1x8x8xbf16>
    "tpu.trace_start"() <{level = 10 : i32, message = "btd,bsd->bts"}> : () -> ()
    %cst_81 = arith.constant dense<0.000000e+00> : vector<1x8x8xf32>
    %221 = tpu.matmul %216, %218, %cst_81 {dimension_numbers = #tpu.dot_dimension_numbers<[2], [2], [1], [1], [0, 0, 0, 1, 1, 1], [0], [0]>} : vector<1x8x8xbf16>, vector<1x8x8xbf16>, vector<1x8x8xf32> -> vector<1x8x8xf32>
    "tpu.trace_stop"() : () -> ()
    %cst_82 = arith.constant dense<0xFF800000> : vector<1x8xf32>
    %222 = vector.multi_reduction <maximumf>, %221, %cst_82 [2] : vector<1x8x8xf32> to vector<1x8xf32>
    %223 = vector.shape_cast %222 : vector<1x8xf32> to vector<1x8x1xf32>
    %224 = vector.broadcast %223 : vector<1x8x1xf32> to vector<1x8x8xf32>
    %225 = arith.subf %221, %224 : vector<1x8x8xf32>
    %226 = math.exp %225 : vector<1x8x8xf32>
    %cst_83 = arith.constant dense<0.000000e+00> : vector<1x8xf32>
    %227 = vector.multi_reduction <add>, %226, %cst_83 [2] : vector<1x8x8xf32> to vector<1x8xf32>
    %228 = vector.shape_cast %227 : vector<1x8xf32> to vector<1x8x1xf32>
    %229 = tpu.reciprocal %228 {approx = true} : vector<1x8x1xf32> -> vector<1x8x1xf32>
    %230 = vector.broadcast %229 : vector<1x8x1xf32> to vector<1x8x8xf32>
    %231 = arith.mulf %226, %230 : vector<1x8x8xf32>
    %232 = arith.truncf %231 : vector<1x8x8xf32> to vector<1x8x8xbf16>
    "tpu.trace_start"() <{level = 10 : i32, message = "bts,bsd->btd"}> : () -> ()
    %cst_84 = arith.constant dense<0.000000e+00> : vector<1x8x8xf32>
    %233 = tpu.matmul %232, %220, %cst_84 {dimension_numbers = #tpu.dot_dimension_numbers<[2], [1], [1], [2], [0, 0, 0, 1, 1, 2], [0], [0]>} : vector<1x8x8xbf16>, vector<1x8x8xbf16>, vector<1x8x8xf32> -> vector<1x8x8xf32>
    "tpu.trace_stop"() : () -> ()
    %234 = vector.extract_strided_slice %160 {offsets = [0, 0, 24], sizes = [1, 8, 8], strides = [1, 1, 1]} : vector<1x8x32xf32> to vector<1x8x8xf32>
    %235 = arith.truncf %234 : vector<1x8x8xf32> to vector<1x8x8xbf16>
    %236 = vector.extract_strided_slice %170 {offsets = [0, 0, 24], sizes = [1, 8, 8], strides = [1, 1, 1]} : vector<1x8x32xf32> to vector<1x8x8xf32>
    %237 = arith.truncf %236 : vector<1x8x8xf32> to vector<1x8x8xbf16>
    %238 = vector.extract_strided_slice %172 {offsets = [0, 0, 24], sizes = [1, 8, 8], strides = [1, 1, 1]} : vector<1x8x32xf32> to vector<1x8x8xf32>
    %239 = arith.truncf %238 : vector<1x8x8xf32> to vector<1x8x8xbf16>
    "tpu.trace_start"() <{level = 10 : i32, message = "btd,bsd->bts"}> : () -> ()
    %cst_85 = arith.constant dense<0.000000e+00> : vector<1x8x8xf32>
    %240 = tpu.matmul %235, %237, %cst_85 {dimension_numbers = #tpu.dot_dimension_numbers<[2], [2], [1], [1], [0, 0, 0, 1, 1, 1], [0], [0]>} : vector<1x8x8xbf16>, vector<1x8x8xbf16>, vector<1x8x8xf32> -> vector<1x8x8xf32>
    "tpu.trace_stop"() : () -> ()
    %cst_86 = arith.constant dense<0xFF800000> : vector<1x8xf32>
    %241 = vector.multi_reduction <maximumf>, %240, %cst_86 [2] : vector<1x8x8xf32> to vector<1x8xf32>
    %242 = vector.shape_cast %241 : vector<1x8xf32> to vector<1x8x1xf32>
    %243 = vector.broadcast %242 : vector<1x8x1xf32> to vector<1x8x8xf32>
    %244 = arith.subf %240, %243 : vector<1x8x8xf32>
    %245 = math.exp %244 : vector<1x8x8xf32>
    %cst_87 = arith.constant dense<0.000000e+00> : vector<1x8xf32>
    %246 = vector.multi_reduction <add>, %245, %cst_87 [2] : vector<1x8x8xf32> to vector<1x8xf32>
    %247 = vector.shape_cast %246 : vector<1x8xf32> to vector<1x8x1xf32>
    %248 = tpu.reciprocal %247 {approx = true} : vector<1x8x1xf32> -> vector<1x8x1xf32>
    %249 = vector.broadcast %248 : vector<1x8x1xf32> to vector<1x8x8xf32>
    %250 = arith.mulf %245, %249 : vector<1x8x8xf32>
    %251 = arith.truncf %250 : vector<1x8x8xf32> to vector<1x8x8xbf16>
    "tpu.trace_start"() <{level = 10 : i32, message = "bts,bsd->btd"}> : () -> ()
    %cst_88 = arith.constant dense<0.000000e+00> : vector<1x8x8xf32>
    %252 = tpu.matmul %251, %239, %cst_88 {dimension_numbers = #tpu.dot_dimension_numbers<[2], [1], [1], [2], [0, 0, 0, 1, 1, 2], [0], [0]>} : vector<1x8x8xbf16>, vector<1x8x8xbf16>, vector<1x8x8xf32> -> vector<1x8x8xf32>
    "tpu.trace_stop"() : () -> ()
    %253 = tpu.concatenate %195, %214, %233, %252 in 2 : vector<1x8x8xf32>, vector<1x8x8xf32>, vector<1x8x8xf32>, vector<1x8x8xf32> -> vector<1x8x32xf32>
    %254 = vector.shape_cast %253 : vector<1x8x32xf32> to vector<8x32xf32>
    %255 = arith.truncf %254 : vector<8x32xf32> to vector<8x32xbf16>
    %cst_89 = arith.constant dense<0.000000e+00> : vector<8x32xf32>
    %256 = tpu.matmul %255, %174, %cst_89 {dimension_numbers = #tpu.dot_dimension_numbers<[1], [0], [0], [1], [0, 0, 1, 1], [], []>} : vector<8x32xbf16>, vector<32x32xbf16>, vector<8x32xf32> -> vector<8x32xf32>
    %257 = vector.broadcast %176 : vector<1x32xf32> to vector<8x32xf32>
    %258 = arith.addf %256, %257 : vector<8x32xf32>
    %259 = arith.addf %149, %258 : vector<8x32xf32>
    %c0_90 = arith.constant 0 : index
    %c1 = arith.constant 1 : index
    %c0_91 = arith.constant 0 : index
    %c0_92 = arith.constant 0 : index
    %260 = vector.load %arg18[%c0_90, %c1, %c0_91, %c0_92] : memref<1x3x1x32xf32, #tpu.memory_space<vmem>>, vector<1x1x1x32xf32>
    %261 = vector.shape_cast %260 : vector<1x1x1x32xf32> to vector<1x32xf32>
    %c0_93 = arith.constant 0 : index
    %c1_94 = arith.constant 1 : index
    %c0_95 = arith.constant 0 : index
    %c0_96 = arith.constant 0 : index
    %262 = vector.load %arg19[%c0_93, %c1_94, %c0_95, %c0_96] : memref<1x3x1x32xf32, #tpu.memory_space<vmem>>, vector<1x1x1x32xf32>
    %263 = vector.shape_cast %262 : vector<1x1x1x32xf32> to vector<1x32xf32>
    %cst_97 = arith.constant dense<0.000000e+00> : vector<8xf32>
    %264 = vector.multi_reduction <add>, %259, %cst_97 [1] : vector<8x32xf32> to vector<8xf32>
    %265 = vector.shape_cast %264 : vector<8xf32> to vector<8x1xf32>
    %cst_98 = arith.constant 3.200000e+01 : f32
    %266 = vector.broadcast %cst_98 : f32 to vector<8x1xf32>
    %267 = arith.divf %265, %266 : vector<8x1xf32>
    %268 = vector.broadcast %267 : vector<8x1xf32> to vector<8x32xf32>
    %269 = arith.subf %259, %268 : vector<8x32xf32>
    %270 = arith.mulf %269, %269 : vector<8x32xf32>
    %cst_99 = arith.constant dense<0.000000e+00> : vector<8xf32>
    %271 = vector.multi_reduction <add>, %270, %cst_99 [1] : vector<8x32xf32> to vector<8xf32>
    %272 = vector.shape_cast %271 : vector<8xf32> to vector<8x1xf32>
    %cst_100 = arith.constant 3.200000e+01 : f32
    %273 = vector.broadcast %cst_100 : f32 to vector<8x1xf32>
    %274 = arith.divf %272, %273 : vector<8x1xf32>
    %275 = vector.broadcast %267 : vector<8x1xf32> to vector<8x32xf32>
    %276 = arith.subf %259, %275 : vector<8x32xf32>
    %cst_101 = arith.constant 9.99999974E-6 : f32
    %277 = vector.broadcast %cst_101 : f32 to vector<8x1xf32>
    %278 = arith.addf %274, %277 : vector<8x1xf32>
    %279 = math.rsqrt %278 : vector<8x1xf32>
    %280 = vector.broadcast %279 : vector<8x1xf32> to vector<8x32xf32>
    %281 = arith.mulf %276, %280 : vector<8x32xf32>
    %282 = vector.broadcast %261 : vector<1x32xf32> to vector<8x32xf32>
    %283 = arith.mulf %281, %282 : vector<8x32xf32>
    %284 = vector.broadcast %263 : vector<1x32xf32> to vector<8x32xf32>
    %285 = arith.addf %283, %284 : vector<8x32xf32>
    %c0_102 = arith.constant 0 : index
    %c0_103 = arith.constant 0 : index
    %c0_104 = arith.constant 0 : index
    %286 = vector.load %arg14[%c0_102, %c0_103, %c0_104] : memref<1x32x2048xbf16, #tpu.memory_space<vmem>>, vector<1x32x2048xbf16>
    %287 = vector.shape_cast %286 : vector<1x32x2048xbf16> to vector<32x2048xbf16>
    %288 = arith.truncf %285 : vector<8x32xf32> to vector<8x32xbf16>
    %cst_105 = arith.constant dense<0.000000e+00> : vector<8x2048xf32>
    %289 = tpu.matmul %288, %287, %cst_105 {dimension_numbers = #tpu.dot_dimension_numbers<[1], [0], [0], [1], [0, 0, 1, 1], [], []>} : vector<8x32xbf16>, vector<32x2048xbf16>, vector<8x2048xf32> -> vector<8x2048xf32>
    %c0_106 = arith.constant 0 : index
    %c0_107 = arith.constant 0 : index
    %c0_108 = arith.constant 0 : index
    %290 = vector.load %arg15[%c0_106, %c0_107, %c0_108] : memref<1x1x2048xf32, #tpu.memory_space<vmem>>, vector<1x1x2048xf32>
    %291 = vector.shape_cast %290 : vector<1x1x2048xf32> to vector<1x2048xf32>
    %292 = vector.broadcast %291 : vector<1x2048xf32> to vector<8x2048xf32>
    %293 = arith.addf %289, %292 : vector<8x2048xf32>
    %cst_109 = arith.constant 0.000000e+00 : f32
    %294 = vector.broadcast %cst_109 : f32 to vector<8x2048xf32>
    %295 = arith.maximumf %293, %294 : vector<8x2048xf32>
    %296 = arith.truncf %295 : vector<8x2048xf32> to vector<8x2048xbf16>
    %c0_110 = arith.constant 0 : index
    %c0_111 = arith.constant 0 : index
    %c0_112 = arith.constant 0 : index
    %297 = vector.load %arg16[%c0_110, %c0_111, %c0_112] : memref<1x2048x32xbf16, #tpu.memory_space<vmem>>, vector<1x2048x32xbf16>
    %298 = vector.shape_cast %297 : vector<1x2048x32xbf16> to vector<2048x32xbf16>
    %cst_113 = arith.constant dense<0.000000e+00> : vector<8x32xf32>
    %299 = tpu.matmul %296, %298, %cst_113 {dimension_numbers = #tpu.dot_dimension_numbers<[1], [0], [0], [1], [0, 0, 1, 1], [], []>} : vector<8x2048xbf16>, vector<2048x32xbf16>, vector<8x32xf32> -> vector<8x32xf32>
    %c0_114 = arith.constant 0 : index
    %c0_115 = arith.constant 0 : index
    %c0_116 = arith.constant 0 : index
    %300 = vector.load %arg17[%c0_114, %c0_115, %c0_116] : memref<1x1x32xf32, #tpu.memory_space<vmem>>, vector<1x1x32xf32>
    %301 = vector.shape_cast %300 : vector<1x1x32xf32> to vector<1x32xf32>
    %302 = vector.broadcast %301 : vector<1x32xf32> to vector<8x32xf32>
    %303 = arith.addf %299, %302 : vector<8x32xf32>
    %304 = arith.addf %285, %303 : vector<8x32xf32>
    %c0_117 = arith.constant 0 : index
    %c2 = arith.constant 2 : index
    %c0_118 = arith.constant 0 : index
    %c0_119 = arith.constant 0 : index
    %305 = vector.load %arg18[%c0_117, %c2, %c0_118, %c0_119] : memref<1x3x1x32xf32, #tpu.memory_space<vmem>>, vector<1x1x1x32xf32>
    %306 = vector.shape_cast %305 : vector<1x1x1x32xf32> to vector<1x32xf32>
    %c0_120 = arith.constant 0 : index
    %c2_121 = arith.constant 2 : index
    %c0_122 = arith.constant 0 : index
    %c0_123 = arith.constant 0 : index
    %307 = vector.load %arg19[%c0_120, %c2_121, %c0_122, %c0_123] : memref<1x3x1x32xf32, #tpu.memory_space<vmem>>, vector<1x1x1x32xf32>
    %308 = vector.shape_cast %307 : vector<1x1x1x32xf32> to vector<1x32xf32>
    %cst_124 = arith.constant dense<0.000000e+00> : vector<8xf32>
    %309 = vector.multi_reduction <add>, %304, %cst_124 [1] : vector<8x32xf32> to vector<8xf32>
    %310 = vector.shape_cast %309 : vector<8xf32> to vector<8x1xf32>
    %cst_125 = arith.constant 3.200000e+01 : f32
    %311 = vector.broadcast %cst_125 : f32 to vector<8x1xf32>
    %312 = arith.divf %310, %311 : vector<8x1xf32>
    %313 = vector.broadcast %312 : vector<8x1xf32> to vector<8x32xf32>
    %314 = arith.subf %304, %313 : vector<8x32xf32>
    %315 = arith.mulf %314, %314 : vector<8x32xf32>
    %cst_126 = arith.constant dense<0.000000e+00> : vector<8xf32>
    %316 = vector.multi_reduction <add>, %315, %cst_126 [1] : vector<8x32xf32> to vector<8xf32>
    %317 = vector.shape_cast %316 : vector<8xf32> to vector<8x1xf32>
    %cst_127 = arith.constant 3.200000e+01 : f32
    %318 = vector.broadcast %cst_127 : f32 to vector<8x1xf32>
    %319 = arith.divf %317, %318 : vector<8x1xf32>
    %320 = vector.broadcast %312 : vector<8x1xf32> to vector<8x32xf32>
    %321 = arith.subf %304, %320 : vector<8x32xf32>
    %cst_128 = arith.constant 9.99999974E-6 : f32
    %322 = vector.broadcast %cst_128 : f32 to vector<8x1xf32>
    %323 = arith.addf %319, %322 : vector<8x1xf32>
    %324 = math.rsqrt %323 : vector<8x1xf32>
    %325 = vector.broadcast %324 : vector<8x1xf32> to vector<8x32xf32>
    %326 = arith.mulf %321, %325 : vector<8x32xf32>
    %327 = vector.broadcast %306 : vector<1x32xf32> to vector<8x32xf32>
    %328 = arith.mulf %326, %327 : vector<8x32xf32>
    %329 = vector.broadcast %308 : vector<1x32xf32> to vector<8x32xf32>
    %330 = arith.addf %328, %329 : vector<8x32xf32>
    %c0_129 = arith.constant 0 : index
    %c0_130 = arith.constant 0 : index
    %331 = vector.load %arg23[%c0_129, %c0_130] : memref<8x32xf32, #tpu.memory_space<vmem>>, vector<8x32xf32>
    tpu.vector_store %arg23[%c0_129, %c0_130], %330 {strides = array<i32>} : memref<8x32xf32, #tpu.memory_space<vmem>>, vector<8x32xf32>,
    %c1_i32 = arith.constant 1 : i32
    %332 = arith.cmpi eq, %arg1, %c1_i32 : i32
    %333 = arith.extui %332 : i1 to i32
    %c0_i32_131 = arith.constant 0 : i32
    %334 = arith.cmpi ne, %333, %c0_i32_131 : i32
    scf.if %334 {
      %c0_132 = arith.constant 0 : index
      %c0_133 = arith.constant 0 : index
      %335 = vector.load %arg20[%c0_132, %c0_133] : memref<32x128xbf16, #tpu.memory_space<vmem>>, vector<32x128xbf16>
      %336 = arith.truncf %330 : vector<8x32xf32> to vector<8x32xbf16>
      %cst_134 = arith.constant dense<0.000000e+00> : vector<8x128xf32>
      %337 = tpu.matmul %336, %335, %cst_134 {dimension_numbers = #tpu.dot_dimension_numbers<[1], [0], [0], [1], [0, 0, 1, 1], [], []>} : vector<8x32xbf16>, vector<32x128xbf16>, vector<8x128xf32> -> vector<8x128xf32>
      %c0_135 = arith.constant 0 : index
      %c0_136 = arith.constant 0 : index
      %338 = vector.load %arg21[%c0_135, %c0_136] : memref<1x128xf32, #tpu.memory_space<vmem>>, vector<1x128xf32>
      %339 = vector.broadcast %338 : vector<1x128xf32> to vector<8x128xf32>
      %340 = arith.addf %337, %339 : vector<8x128xf32>
      %341 = vector.shape_cast %340 : vector<8x128xf32> to vector<1x8x128xf32>
      %c0_137 = arith.constant 0 : index
      %c0_138 = arith.constant 0 : index
      %c0_139 = arith.constant 0 : index
      %342 = vector.load %arg22[%c0_137, %c0_138, %c0_139] : memref<1x8x128xf32, #tpu.memory_space<vmem>>, vector<1x8x128xf32>
      tpu.vector_store %arg22[%c0_137, %c0_138, %c0_139], %341 {strides = array<i32>} : memref<1x8x128xf32, #tpu.memory_space<vmem>>, vector<1x8x128xf32>,
    } else {
    }
    return
  }
  func.func @transform_0(%arg0: i32, %arg1: i32) -> (i32, i32, i32) {
    %c0_i32 = arith.constant 0 : i32
    %c0_i32_0 = arith.constant 0 : i32
    %c0_i32_1 = arith.constant 0 : i32
    return %arg0, %c0_i32, %c0_i32_0 : i32, i32, i32
  }
  func.func @transform_1(%arg0: i32, %arg1: i32) -> (i32, i32, i32) {
    %c0_i32 = arith.constant 0 : i32
    %c0_i32_0 = arith.constant 0 : i32
    %c0_i32_1 = arith.constant 0 : i32
    return %arg0, %c0_i32, %c0_i32_0 : i32, i32, i32
  }
  func.func @transform_2(%arg0: i32, %arg1: i32) -> (i32, i32, i32) {
    %c0_i32 = arith.constant 0 : i32
    %c0_i32_0 = arith.constant 0 : i32
    %c0_i32_1 = arith.constant 0 : i32
    return %arg1, %c0_i32, %c0_i32_0 : i32, i32, i32
  }
  func.func @transform_3(%arg0: i32, %arg1: i32) -> (i32, i32, i32) {
    %c0_i32 = arith.constant 0 : i32
    %c0_i32_0 = arith.constant 0 : i32
    %c0_i32_1 = arith.constant 0 : i32
    return %arg1, %c0_i32, %c0_i32_0 : i32, i32, i32
  }
  func.func @transform_4(%arg0: i32, %arg1: i32) -> (i32, i32, i32) {
    %c0_i32 = arith.constant 0 : i32
    %c0_i32_0 = arith.constant 0 : i32
    %c0_i32_1 = arith.constant 0 : i32
    return %arg1, %c0_i32, %c0_i32_0 : i32, i32, i32
  }
  func.func @transform_5(%arg0: i32, %arg1: i32) -> (i32, i32, i32) {
    %c0_i32 = arith.constant 0 : i32
    %c0_i32_0 = arith.constant 0 : i32
    %c0_i32_1 = arith.constant 0 : i32
    return %arg1, %c0_i32, %c0_i32_0 : i32, i32, i32
  }
  func.func @transform_6(%arg0: i32, %arg1: i32) -> (i32, i32, i32) {
    %c0_i32 = arith.constant 0 : i32
    %c0_i32_0 = arith.constant 0 : i32
    %c0_i32_1 = arith.constant 0 : i32
    return %arg1, %c0_i32, %c0_i32_0 : i32, i32, i32
  }
  func.func @transform_7(%arg0: i32, %arg1: i32) -> (i32, i32, i32) {
    %c0_i32 = arith.constant 0 : i32
    %c0_i32_0 = arith.constant 0 : i32
    %c0_i32_1 = arith.constant 0 : i32
    return %arg1, %c0_i32, %c0_i32_0 : i32, i32, i32
  }
  func.func @transform_8(%arg0: i32, %arg1: i32) -> (i32, i32, i32) {
    %c0_i32 = arith.constant 0 : i32
    %c0_i32_0 = arith.constant 0 : i32
    %c0_i32_1 = arith.constant 0 : i32
    return %arg1, %c0_i32, %c0_i32_0 : i32, i32, i32
  }
  func.func @transform_9(%arg0: i32, %arg1: i32) -> (i32, i32, i32) {
    %c0_i32 = arith.constant 0 : i32
    %c0_i32_0 = arith.constant 0 : i32
    %c0_i32_1 = arith.constant 0 : i32
    return %arg1, %c0_i32, %c0_i32_0 : i32, i32, i32
  }
  func.func @transform_10(%arg0: i32, %arg1: i32) -> (i32, i32, i32) {
    %c0_i32 = arith.constant 0 : i32
    %c0_i32_0 = arith.constant 0 : i32
    %c0_i32_1 = arith.constant 0 : i32
    return %arg1, %c0_i32, %c0_i32_0 : i32, i32, i32
  }
  func.func @transform_11(%arg0: i32, %arg1: i32) -> (i32, i32, i32) {
    %c0_i32 = arith.constant 0 : i32
    %c0_i32_0 = arith.constant 0 : i32
    %c0_i32_1 = arith.constant 0 : i32
    return %arg1, %c0_i32, %c0_i32_0 : i32, i32, i32
  }
  func.func @transform_12(%arg0: i32, %arg1: i32) -> (i32, i32, i32) {
    %c0_i32 = arith.constant 0 : i32
    %c0_i32_0 = arith.constant 0 : i32
    %c0_i32_1 = arith.constant 0 : i32
    return %arg1, %c0_i32, %c0_i32_0 : i32, i32, i32
  }
  func.func @transform_13(%arg0: i32, %arg1: i32) -> (i32, i32, i32) {
    %c0_i32 = arith.constant 0 : i32
    %c0_i32_0 = arith.constant 0 : i32
    %c0_i32_1 = arith.constant 0 : i32
    return %arg1, %c0_i32, %c0_i32_0 : i32, i32, i32
  }
  func.func @transform_14(%arg0: i32, %arg1: i32) -> (i32, i32, i32) {
    %c0_i32 = arith.constant 0 : i32
    %c0_i32_0 = arith.constant 0 : i32
    %c0_i32_1 = arith.constant 0 : i32
    return %arg1, %c0_i32, %c0_i32_0 : i32, i32, i32
  }
  func.func @transform_15(%arg0: i32, %arg1: i32) -> (i32, i32, i32) {
    %c0_i32 = arith.constant 0 : i32
    %c0_i32_0 = arith.constant 0 : i32
    %c0_i32_1 = arith.constant 0 : i32
    return %arg1, %c0_i32, %c0_i32_0 : i32, i32, i32
  }
  func.func @transform_16(%arg0: i32, %arg1: i32) -> (i32, i32, i32, i32) {
    %c0_i32 = arith.constant 0 : i32
    %c0_i32_0 = arith.constant 0 : i32
    %c0_i32_1 = arith.constant 0 : i32
    %c0_i32_2 = arith.constant 0 : i32
    return %arg1, %c0_i32, %c0_i32_0, %c0_i32_1 : i32, i32, i32, i32
  }
  func.func @transform_17(%arg0: i32, %arg1: i32) -> (i32, i32, i32, i32) {
    %c0_i32 = arith.constant 0 : i32
    %c0_i32_0 = arith.constant 0 : i32
    %c0_i32_1 = arith.constant 0 : i32
    %c0_i32_2 = arith.constant 0 : i32
    return %arg1, %c0_i32, %c0_i32_0, %c0_i32_1 : i32, i32, i32, i32
  }
  func.func @transform_18(%arg0: i32, %arg1: i32) -> (i32, i32) {
    %c0_i32 = arith.constant 0 : i32
    %c0_i32_0 = arith.constant 0 : i32
    %c0_i32_1 = arith.constant 0 : i32
    return %c0_i32, %c0_i32_0 : i32, i32
  }
  func.func @transform_19(%arg0: i32, %arg1: i32) -> (i32, i32) {
    %c0_i32 = arith.constant 0 : i32
    %c0_i32_0 = arith.constant 0 : i32
    %c0_i32_1 = arith.constant 0 : i32
    return %c0_i32, %c0_i32_0 : i32, i32
  }
  func.func @transform_20(%arg0: i32, %arg1: i32) -> (i32, i32, i32) {
    %c0_i32 = arith.constant 0 : i32
    %c0_i32_0 = arith.constant 0 : i32
    %c0_i32_1 = arith.constant 0 : i32
    return %arg0, %c0_i32, %c0_i32_0 : i32, i32, i32
  }
}

</mosaic_0001>

<bundles_post_ra>
// kernel: tpu_custom_call.1
= control target key start
LH: loop header
LB: loop body
LE: loop exit
PB: predicated region body
PF: predicated region fallthrough
CT: control target
= control target key end

     0   :  { %s6490_s0 = inlined_call_operand.vmem [shape: f32[2,8,32], index: 0, kind: input, shape index: {}]   ;;  %s6491_s1 = inlined_call_operand.vmem [shape: f32[2,8,32], index: 1, kind: input, shape index: {}]   ;;  %s6492_s2 = inlined_call_operand.vmem [shape: bf16[2,32,96], index: 2, kind: input, shape index: {}]   ;;  %s6493_s3 = inlined_call_operand.vmem [shape: f32[2,1,96], index: 3, kind: input, shape index: {}]   ;;  %s6494_s4 = inlined_call_operand.vmem [shape: bf16[2,32,32], index: 4, kind: input, shape index: {}]   ;;  %s6495_s5 = inlined_call_operand.vmem [shape: f32[2,1,32], index: 5, kind: input, shape index: {}]   ;;  %s6496_s6 = inlined_call_operand.vmem [shape: bf16[2,32,32], index: 6, kind: input, shape index: {}]   ;;  %s6497_s7 = inlined_call_operand.vmem [shape: f32[2,1,32], index: 7, kind: input, shape index: {}]   ;;  %s6498_s8 = inlined_call_operand.vmem [shape: bf16[2,32,64], index: 8, kind: input, shape index: {}]   ;;  %s6499_s9 = inlined_call_operand.vmem [shape: f32[2,1,64], index: 9, kind: input, shape index: {}]   ;;  %s6500_s10 = inlined_call_operand.vmem [shape: bf16[2,32,32], index: 10, kind: input, shape index: {}]   ;;  %s6501_s11 = inlined_call_operand.vmem [shape: f32[2,1,32], index: 11, kind: input, shape index: {}]   ;;  %s6502_s12 = inlined_call_operand.vmem [shape: bf16[2,32,2048], index: 12, kind: input, shape index: {}]   ;;  %s6503_s13 = inlined_call_operand.vmem [shape: f32[2,1,2048], index: 13, kind: input, shape index: {}]   ;;  %s6504_s14 = inlined_call_operand.vmem [shape: bf16[2,2048,32], index: 14, kind: input, shape index: {}]   ;;  %s6505_s15 = inlined_call_operand.vmem [shape: f32[2,1,32], index: 15, kind: input, shape index: {}]   ;;  %s6506_s16 = inlined_call_operand.vmem [shape: f32[2,3,1,32], index: 16, kind: input, shape index: {}]   ;;  %s6507_s17 = inlined_call_operand.vmem [shape: f32[2,3,1,32], index: 17, kind: input, shape index: {}]   ;;  %s6508_s18 = inlined_call_operand.vmem [shape: bf16[32,128], index: 18, kind: input, shape index: {}]   ;;  %s6509_s19 = inlined_call_operand.vmem [shape: f32[1,128], index: 19, kind: input, shape index: {}]   ;;  %s6510_s20 = inlined_call_operand.hbm [shape: f32[2,8,128], index: 20, kind: output, shape index: {}]  }
   0x1   :  { %6529 = sst [smem:[#allocation22_spill]] %s6490_s0 }
   0x2   :  { %6530 = sst [smem:[#allocation23_spill]] %s6491_s1 }
   0x3   :  { %6531 = sst [smem:[#allocation24_spill]] %s6492_s2 }
   0x4   :  { %6532 = sst [smem:[#allocation25_spill]] %s6493_s3 }
   0x5   :  { %6533 = sst [smem:[#allocation26_spill]] %s6494_s4 }
   0x6   :  { %6534 = sst [smem:[#allocation27_spill]] %s6496_s6 }
   0x7   :  { %6535 = sst [smem:[#allocation28_spill]] %s6498_s8 }
   0x8   :  { %6536 = sst [smem:[#allocation29_spill]] %s6500_s10 }
   0x9   :  { %6537 = sst [smem:[#allocation30_spill]] %s6501_s11 }
   0xa   :  { %6538 = sst [smem:[#allocation31_spill]] %s6502_s12 }
   0xb   :  { %6539 = sst [smem:[#allocation32_spill]] %s6503_s13 }
   0xc   :  { %6540 = sst [smem:[#allocation33_spill]] %s6504_s14 }
   0xd   :  { %6541 = sst [smem:[#allocation34_spill]] %s6506_s16 }
   0xe   :  { %6542 = sst [smem:[#allocation35_spill]] %s6507_s17 }
   0xf   :  { %6543 = sst [smem:[#allocation36_spill]] %s6508_s18 }
  0x10   :  { %6544 = sst [smem:[#allocation37_spill]] %s6509_s19 }
  0x11   :  { %6545 = sst [smem:[#allocation38_spill]] %s6510_s20 }
  0x12   :  { %25 = vsyncpa [#allocation4], 0 }
  0x13   :  { %27 = vsyncpa [#allocation4 + $0x1], 0  ;;  %s5744_s1 = smov 0   ;;  %s5746_s22 = smov 0  }
  0x14   :  { %s5748_s23 = smov 0   ;;  %s5750_s24 = smov 0  }
  0x15   :  { %s5752_s2 = smov 0   ;;  %s5754_s25 = smov 0  }
  0x16   :  { %s5756_s3 = smov 0   ;;  %s5758_s26 = smov 0  }
  0x17 LB: > { %6546 = sst [smem:[#allocation6_spill]] %s5589_s1  ;;  %s4631_s27 = sadd.s32 4294967295, %s5617_s26   ;;  %s5617_s26 = sphi %s5758_s26, %s33_s26   ;;  %s5613_s3 = sphi %s5756_s3, %s6606_s3   ;;  %s5609_s25 = sphi %s5754_s25, %s6605_s25   ;;  %s5605_s2 = sphi %s5752_s2, %s6604_s2   ;;  %s5601_s24 = sphi %s5750_s24, %s6603_s24   ;;  %s5597_s23 = sphi %s5748_s23, %s6602_s23   ;;  %s5593_s22 = sphi %s5746_s22, %s6601_s22   ;;  %s5589_s1 = sphi %s5744_s1, %s6600_s1  }
  0x18   : > { %6547 = sst [smem:[#allocation7_spill]] %s5593_s22  ;;  %s4632_s28 = sadd.s32 4294967294, %s5617_s26  }
  0x19   : > { %6548 = sst [smem:[#allocation8_spill]] %s5597_s23  ;;  %s42_s4 = sadd.s32 1, %s5609_s25 }
  0x1a   : > { %6549 = sst [smem:[#allocation9_spill]] %s5601_s24  ;;  %p43_p0 = scmp.ge.s32.totalorder %s42_s4, 2 }
  0x1b   : > { %6550 = sst [smem:[#allocation10_spill]] %s5605_s2  ;;  %s45_s29 = sadd.s32 1, %s5613_s3 }
  0x1c   : > { %6551 = sst [smem:[#allocation11_spill]] %s5609_s25  ;;  %p572_p1 = scmp.ne.s32.totalorder %s5597_s23, %s5593_s22 }
  0x1d   : > { %6552 = sst [smem:[#allocation12_spill]] %s5613_s3  ;;  %p573_p2 = scmp.eq.s32.totalorder %s4631_s27, 3 }
  0x1e   : > { %6553 = sst [smem:[#allocation13_spill]] %s5617_s26  ;;  %s6608_s4 = smov (%p43_p0, %s42_s4), 0 }
  0x1f   : > { %6554 = sst [smem:[#allocation14_spill]] %s6608_s4  ;;  %s6610_s29 = smov (!%p43_p0, %s45_s29), %s5613_s3 }
  0x20   : > { %p5793_p3 = por %p573_p2, %p572_p1  ;;  %p578_p4 = scmp.ne.s32.totalorder %s5593_s22, %s5589_s1 }
  0x21   : > { %p47_p5 = scmp.ge.s32.totalorder %s6610_s29, 2  ;;  %p579_p6 = scmp.eq.s32.totalorder %s4632_s28, 3 }
  0x22   : > { %s6555_s30 = scalar_select %p5793_p3, 1, 0 }
  0x23   : > { %p4635_p7 = scmp.ge.s32.totalorder %s5617_s26, 1  ;;  %p730_p8 = scmp.lt.s32.totalorder %s5617_s26, 5 }
  0x24   : > { %6556 = sst [smem:[#allocation15_spill]] %s6555_s30  ;;  %s6612_s29 = smov (%p47_p5, %s6610_s29), 0 }
  0x25   : > { %6557 = sst [smem:[#allocation16_spill]] %s6612_s29  ;;  %p5803_p9 = por %p579_p6, %p578_p4 }
  0x26   : > { %p731_p10 = pnand %p4635_p7, %p730_p8  ;;  %s559_s21 = ssub.s32 %s5613_s3, %s6612_s29 }
  0x27   : > { %s6558_s0 = scalar_select %p5803_p9, 1, 0 }
  0x28   : > { %s562_s27 = sadd.s32 1, %s5597_s23  ;;  %p560_p11 = scmp.eq.s32.totalorder %s559_s21, 0 }
  0x29   : > { %6559 = sst [smem:[#allocation17_spill]] %s6558_s0  ;;  %734 = sbr.rel (%p731_p10) target bundleno = 4502 (0x1196), region = 100 }
  0x2a   : > { %s5811_s4 = scalar_select %p560_p11, %s5597_s23, %s562_s27  }
  0x2c   : > { %6560 = sst [smem:[#allocation18_spill]] %s5811_s4 }
  0x2e   : > { %s6519_s28 = sand.u32 1, %s5593_s22   ;;  %p856_p12 = scmp.lt.s32.totalorder %s5605_s2, 1 }
  0x2f   : > { %s5817_s25 = sshll.u32 %s6519_s28, 3  ;;  %p864_p13 = scmp.lt.s32.totalorder %s5601_s24, 1 }
  0x30   : > { %s857_s0 = scalar_select %p856_p12, %s5605_s2, 1 }
  0x31   : > { %s5822_s1 = scalar_select %p864_p13, %s5601_s24, 1 }
  0x32   : > { %s4637_s21 = sshll.u32 %s857_s0, 3  ;;  %s6561_s3 = sld [smem:[#allocation22_spill]] }
  0x33   : > { %s6562_s28 = sld [smem:[#allocation23_spill]]  ;;  %s4879_s30 = sshll.u32 %s5822_s1, 4 }
  0x34   : > { %s6565_s16 = sld [smem:[#allocation24_spill]]  ;;  %s4884_s19 = sshll.u32 %s5822_s1, 8 }
  0x35   : > { %s6567_s6 = sld [smem:[#allocation27_spill]]  ;;  %s920_s26 = scalar_lea.vmem %s6505_s15, %s5822_s1 }
  0x36   : > { %s6568_s8 = sld [smem:[#allocation28_spill]] }
  0x37   : > { %s6569_s10 = sld [smem:[#allocation29_spill]] }
  0x38   : > { %s859_s4 = scalar_lea.vmem %s6561_s3, %s4637_s21  ;;  %s6566_s3 = sld [smem:[#allocation26_spill]] }
  0x39   : > { %s5830_s20 = scalar_lea.vmem %s6562_s28, %s4637_s21  ;;  %s6572_s12 = sld [smem:[#allocation31_spill]] }
  0x3a   : > { %6563 = sst [smem:[#allocation19_spill]] %s5830_s20  ;;  %s868_s0 = scalar_lea.vmem %s6565_s16, %s4879_s30 }
  0x3b   : > { %s5852_s22 = scalar_lea.vmem %s6567_s6, %s4879_s30  ;;  %s6573_s13 = sld [smem:[#allocation32_spill]] }
  0x3c   : > { %s5861_s14 = scalar_lea.vmem %s6568_s8, %s4879_s30  ;;  %s6575_s18 = sld [smem:[#allocation33_spill]] }
  0x3d   : > { %s5870_s20 = scalar_lea.vmem %s6569_s10, %s4879_s30  ;;  %s5256_s6 = smul.u32 3, %s5822_s1 }
  0x3e   : > { %s5843_s27 = scalar_lea.vmem %s6566_s3, %s4879_s30  ;;  %6570 = sst [smem:[#allocation20_spill]] %s5870_s20 }
  0x3f   : > { %s5880_s16 = scalar_lea.vmem %s6572_s12, %s4884_s19  ;;  %s4885_s3 = sshll.u32 %s5822_s1, 10 }
  0x40   : > { %s6576_s19 = sld [smem:[#allocation34_spill]] }
  0x41   : > { %s5885_s29 = scalar_lea.vmem %s6573_s13, %s4879_s30  ;;  %s6577_s30 = sld [smem:[#allocation35_spill]] }
  0x42   : > { %6574 = sst [smem:[#allocation21_spill]] %s5885_s29  ;;  %s5895_s21 = scalar_lea.vmem %s6575_s18, %s4885_s3 }
  0x43   : > { %s855_s13 = scalar_lea.vmem [#allocation3], %s5817_s25  ;;  %s6578_s29 = sld [smem:[#allocation9_spill]] }
  0x46   : > { %s5901_s2 = scalar_lea.vmem %s6576_s19, %s5256_s6 }
  0x47   : > { %s5906_s24 = scalar_lea.vmem %s6577_s30, %s5256_s6 }
  0x49   : > { %p4654_p0 = scmp.ne.s32.totalorder %s6578_s29, 0 }
  0x4b   : > { %933 = sbr.rel (%p4654_p0) target bundleno = 82 (0x52), region = 104 }
  0x50   : > { %v934_v0 = vld [vmem:[%s859_s4] sm:$0xff]  ;;  %vm935_vm0 = vcmask 261120  }
  0x51   : > { %936 = vst.msk [vmem:[#allocation2] sm:$0xff] %vm935_vm0, %v934_v0 }
  0x52 PF: > { %v5347_v1 = vld [vmem:[%s868_s0 + $0x8] sm:$0xff]   ;;  %v5619_v2 = vmov 0.0   ;;  %v5348_v3 = vld [vmem:[%s868_s0] sm:$0xff]   ;;  %vm5620_vm1 = vmmov 0   ;;  %vm968_vm2 = vcmask 261120   ;;  %s6579_s11 = sld [smem:[#allocation25_spill]]  ;;  %v939_v26 = vlaneseq }
  0x53   : > { %5112 = vmatprep.subr.bf16.mxu0 %v5619_v2  ;;  %5120 = vmatprep.subr.bf16.mxu1 %v5619_v2  ;;  %s5621_s4 = smov 96   ;;  %s5622_s0 = smov 120   ;;  %vm1023_vm3 = vcmask 64512   ;;  %vm1088_vm5 = vcmask 1043456   ;;  %vm1479_vm6 = vcmask 130048   ;;  %vm1481_vm7 = vcmask 195584  }
  0x54   : > { %5113 = vmatpush3.bf16.msra.mxu0 %v5347_v1  ;;  %5116 = vmatprep.mubr.msk.bf16.mxu0 %vm5620_vm1, %v5619_v2  ;;  %s5623_s23 = smov 88   ;;  %s5624_s20 = smov 80   ;;  %v5963_v27 = vshrl.u32 %v939_v26, 7  ;;  %v942_v28 = vand.u32 127, %v939_v26 }
  0x55   : > { %5114 = vmatprep.subr.bf16.mxu0 %v5619_v2  ;;  %5122 = vmatprep.mubr.msk.bf16.mxu1 %vm5620_vm1, %v5619_v2  ;;  %s5625_s29 = smov 112   ;;  %s5626_s3 = smov 72  }
  0x56   : > { %s5627_s28 = smov 104   ;;  %vm943_vm4 = vcmp.le.s32.totalorder %v942_v28, %v5963_v27  ;;  %s5628_s18 = smov 56  }
  0x57   : > { %s5629_s17 = smov 64   ;;  %s5630_s19 = smov 40  }
  0x58   : > { %v5914_v4 = vld [vmem:[#allocation2] sm:$0xff]  ;;  %5115 = vmatpush3.bf16.msra.mxu0 %v5348_v3  ;;  %s6580_s12 = scalar_lea.vmem %s6579_s11, %s5822_s1  ;;  %s5631_s8 = smov 48  }
  0x59   : > { %v948_v5 = vpack.c.bf16 %v5914_v4, %v5914_v4  ;;  %5126 = vmatprep.subr.bf16.mxu0 %v5619_v2  ;;  %v4655_v6 = vld [vmem:[%s6580_s12] ss:$0 sm:$0xff]  ;;  %s5632_s30 = smov 8   ;;  %s5633_s6 = smov 16  }
  0x5a   : > { %s5634_s10 = smov 24   ;;  %s6581_s12 = scalar_lea.vmem %s6495_s5, %s5822_s1 }
  0x5b   : > { %5117 = vmatmul.mubr.msk.bf16.vlgmr.msra.gmra.mxu0 %vm968_vm2, %v948_v5 }
  0x5c   : > { %5128 = vmatprep.mubr.msk.bf16.mxu0 %vm5620_vm1, %v5619_v2 }
 0x11b   : > { %v1006_v7 = vpop.f32.mrf.mxu0 }
 0x11c   : > { %v1007_v8 = vadd.f32 %v4655_v6, %v1006_v7 }
 0x11d   : > { %v5118_v9 = vpop.f32.mrf.mxu0 }
 0x11e   : > { %v1012_v10 = vmul.f32 0.35355338, %v1007_v8  ;;  %v5930_v11 = vpack.c.bf16 %v1007_v8, %v1007_v8 }
 0x11f   : > { %v1009_v12 = vpop.f32.mrf.mxu0 }
 0x120   : > { %v1018_v13 = vpack.c.bf16 %v1012_v10, %v1012_v10  ;;  %1021 = vrot.lane.b32.xlu0 %v5930_v11, %s5621_s4 }
 0x121   : > { %v5119_v14 = vpop.f32.mrf.mxu0 }
 0x122   : > { %1133 = vrot.lane.b32.xlu1 %v1018_v13, %s5622_s0 }
 0x124   : > { %1135 = vrot.lane.b32.xlu0 %v5930_v11, %s5623_s23 }
 0x126   : > { %1246 = vrot.lane.b32.xlu1 %v5930_v11, %s5624_s20 }
 0x128   : > { %1244 = vrot.lane.b32.xlu0 %v1018_v13, %s5625_s29 }
 0x12a   : > { %1357 = vrot.lane.b32.xlu1 %v5930_v11, %s5626_s3 }
 0x12c   : > { %1355 = vrot.lane.b32.xlu0 %v1018_v13, %s5627_s28 }
 0x192   : > { %v1022_v15 = vpop.permute.xlu0 %1021 }
 0x193   : > { %v1028_v16 = vsel %vm1023_vm3, %v1022_v15, 0 }
 0x194   : > { %5121 = vmatpush3.bf16.xpose.msra.mxu1 %v1028_v16  ;;  %v1134_v18 = vpop.permute.xlu1 %1133 }
 0x195   : > { %5132 = vmatprep.subr.bf16.mxu1 %v5619_v2 }
 0x196   : > { %v1136_v17 = vpop.permute.xlu0 %1135 }
 0x197   : > { %v1141_v19 = vsel %vm1023_vm3, %v1136_v17, 0 }
 0x198   : > { %v1247_v20 = vpop.permute.xlu1 %1246 }
 0x199   : > { %v1252_v21 = vsel %vm1023_vm3, %v1247_v20, 0 }
 0x19a   : > { %v1245_v23 = vpop.permute.xlu0 %1244 }
 0x19b   : > { %5123 = vmatmul.mubr.msk.bf16.vlgmr.msra.gmra.mxu1 %vm1023_vm3, %v1018_v13 }
 0x19c   : > { %5133 = vmatpush3.bf16.xpose.msra.mxu1 %v1141_v19  ;;  %5134 = vmatprep.mubr.msk.bf16.mxu1 %vm5620_vm1, %v5619_v2  ;;  %v1358_v22 = vpop.permute.xlu1 %1357 }
 0x19d   : > { %5144 = vmatprep.subr.bf16.mxu1 %v5619_v2  ;;  %v1363_v24 = vsel %vm1023_vm3, %v1358_v22, 0 }
 0x19e   : > { %v1356_v25 = vpop.permute.xlu0 %1355 }
 0x1a3   : > { %5135 = vmatmul.mubr.msk.bf16.vlgmr.msra.gmra.mxu1 %vm1023_vm3, %v1134_v18 }
 0x1a4   : > { %5145 = vmatpush3.bf16.xpose.msra.mxu1 %v1252_v21  ;;  %5146 = vmatprep.mubr.msk.bf16.mxu1 %vm5620_vm1, %v5619_v2 }
 0x1a5   : > { %5156 = vmatprep.subr.bf16.mxu1 %v5619_v2 }
 0x1ab   : > { %5147 = vmatmul.mubr.msk.bf16.vlgmr.msra.gmra.mxu1 %vm1023_vm3, %v1245_v23 }
 0x1ac   : > { %5157 = vmatpush3.bf16.xpose.msra.mxu1 %v1363_v24  ;;  %5158 = vmatprep.mubr.msk.bf16.mxu1 %vm5620_vm1, %v5619_v2 }
 0x1ad   : > { %5168 = vmatprep.subr.bf16.mxu1 %v5619_v2 }
 0x1b3   : > { %5159 = vmatmul.mubr.msk.bf16.vlgmr.msra.gmra.mxu1 %vm1023_vm3, %v1356_v25 }
 0x1b4   : > { %5172 = vmatprep.mubr.msk.bf16.mxu1 %vm5620_vm1, %v5619_v2 }
 0x25b   : > { %v1064_v29 = vpop.f32.mrf.mxu1 }
 0x25c   : > { %v1070_v30 = vsel %vm943_vm4, %v1064_v29, -1e+30 }
 0x25d   : > { %v5124_v31 = vpop.f32.mrf.mxu1  ;;  %v1071_v32 = vsel %vm1023_vm3, %v1070_v30, -inf }
 0x25e   : > { %1072 = vmax.xlane.f32.xlu1 %v1071_v32 }
 0x25f   : > { %v1067_v33 = vpop.f32.mrf.mxu1 }
 0x261   : > { %v5125_v34 = vpop.f32.mrf.mxu1 }
 0x263   : > { %v1177_v35 = vpop.f32.mrf.mxu1 }
 0x264   : > { %v1183_v36 = vsel %vm943_vm4, %v1177_v35, -1e+30 }
 0x265   : > { %v5136_v37 = vpop.f32.mrf.mxu1  ;;  %v1184_v38 = vsel %vm1023_vm3, %v1183_v36, -inf }
 0x266   : > { %1185 = vmax.xlane.f32.xlu0 %v1184_v38 }
 0x267   : > { %v1180_v39 = vpop.f32.mrf.mxu1 }
 0x269   : > { %v5137_v40 = vpop.f32.mrf.mxu1 }
 0x26b   : > { %v1288_v41 = vpop.f32.mrf.mxu1 }
 0x26c   : > { %v1294_v42 = vsel %vm943_vm4, %v1288_v41, -1e+30 }
 0x26d   : > { %v5148_v43 = vpop.f32.mrf.mxu1  ;;  %v1295_v44 = vsel %vm1023_vm3, %v1294_v42, -inf }
 0x26e   : > { %1296 = vmax.xlane.f32.xlu0 %v1295_v44  ;;  %v5349_v44 = vld [vmem:[%s5843_s27 + $0x8] sm:$0xff]  }
 0x26f   : > { %v1291_v45 = vpop.f32.mrf.mxu1  ;;  %5169 = vmatpush3.bf16.msra.mxu1 %v5349_v44 }
 0x270   : > { %5170 = vmatprep.subr.bf16.mxu1 %v5619_v2  ;;  %v5350_v45 = vld [vmem:[%s5843_s27] sm:$0xff]   ;;  %s6584_s27 = scalar_lea.vmem %s6497_s7, %s5822_s1 }
 0x271   : > { %v5149_v46 = vpop.f32.mrf.mxu1 }
 0x273   : > { %v1399_v47 = vpop.f32.mrf.mxu1  ;;  %5171 = vmatpush3.bf16.msra.mxu1 %v5350_v45 }
 0x274   : > { %v1405_v48 = vsel %vm943_vm4, %v1399_v47, -1e+30  ;;  %5184 = vmatprep.subr.bf16.mxu1 %v5619_v2 }
 0x275   : > { %v5160_v49 = vpop.f32.mrf.mxu1  ;;  %v1406_v50 = vsel %vm1023_vm3, %v1405_v48, -inf }
 0x276   : > { %1407 = vmax.xlane.f32.xlu1 %v1406_v50 }
 0x277   : > { %v1402_v51 = vpop.f32.mrf.mxu1 }
 0x279   : > { %v5161_v52 = vpop.f32.mrf.mxu1 }
 0x2e7   : > { %v1073_v53 = vpop.xlane.xlu1 %1072 }
 0x2e8   : > { %v1074_v54 = vsub.f32 %v1070_v30, %v1073_v53 }
 0x2ea   : > { %v1075_v55 = vmul.f32 1.442695, %v1074_v54 }
 0x2ec   : > { %5485 = vpow2.f32 %v1075_v55 }
 0x2ef   : > { %v1186_v56 = vpop.xlane.xlu0 %1185 }
 0x2f0   : > { %v1187_v57 = vsub.f32 %v1183_v36, %v1186_v56 }
 0x2f2   : > { %v1188_v58 = vmul.f32 1.442695, %v1187_v57 }
 0x2f4   : > { %5487 = vpow2.f32 %v1188_v58 }
 0x2f7   : > { %v1297_v59 = vpop.xlane.xlu0 %1296 }
 0x2f8   : > { %v1298_v60 = vsub.f32 %v1294_v42, %v1297_v59 }
 0x2f9   : > { %v5486_v61 = vpop.eup %5485 }
 0x2fa   : > { %v1299_v62 = vmul.f32 1.442695, %v1298_v60  ;;  %v1077_v63 = vsel %vm1023_vm3, %v5486_v61, 0.0 }
 0x2fb   : > { %1078 = vadd.xlane.f32.xlu0 %v1077_v63 }
 0x2fc   : > { %5489 = vpow2.f32 %v1299_v62 }
 0x2ff   : > { %v1408_v6 = vpop.xlane.xlu1 %1407 }
 0x300   : > { %v1409_v7 = vsub.f32 %v1405_v48, %v1408_v6 }
 0x301   : > { %v5488_v0 = vpop.eup %5487 }
 0x302   : > { %v1190_v1 = vsel %vm1023_vm3, %v5488_v0, 0.0  ;;  %v1410_v8 = vmul.f32 1.442695, %v1409_v7 }
 0x303   : > { %1191 = vadd.xlane.f32.xlu1 %v1190_v1 }
 0x304   : > { %5491 = vpow2.f32 %v1410_v8 }
 0x309   : > { %v5490_v3 = vpop.eup %5489 }
 0x30a   : > { %v1301_v5 = vsel %vm1023_vm3, %v5490_v3, 0.0 }
 0x30b   : > { %1302 = vadd.xlane.f32.xlu0 %v1301_v5 }
 0x311   : > { %v5492_v9 = vpop.eup %5491 }
 0x312   : > { %v1412_v10 = vsel %vm1023_vm3, %v5492_v9, 0.0 }
 0x314   : > { %1196 = vrot.lane.b32.xlu1 %v5930_v11, %s5628_s18  ;;  %s6582_s18 = sld [smem:[#allocation19_spill]] }
 0x321   : > { %1083 = vrot.lane.b32.xlu0 %v5930_v11, %s5629_s17  ;;  %s6583_s17 = scalar_lea.vmem %s6499_s9, %s5822_s1 }
 0x325   : > { %1418 = vrot.lane.b32.xlu0 %v5930_v11, %s5630_s19 }
 0x338   : > { %1413 = vadd.xlane.f32.xlu1 %v1412_v10 }
 0x349   : > { %1307 = vrot.lane.b32.xlu1 %v5930_v11, %s5631_s8 }
 0x384   : > { %v1079_v12 = vpop.xlane.xlu0 %1078 }
 0x385   : > { %5493 = vrcp.f32 %v1079_v12 }
 0x38c   : > { %v1192_v13 = vpop.xlane.xlu1 %1191 }
 0x38d   : > { %5495 = vrcp.f32 %v1192_v13  ;;  %v5351_v13 = vld [vmem:[%s5861_s14 + $0x8] sm:$0xff]  }
 0x390   : > { %v1197_v19 = vpop.permute.xlu1 %1196 }
 0x391   : > { %v1202_v22 = vsel %vm1088_vm5, %v1197_v19, 0 }
 0x392   : > { %v5494_v14 = vpop.eup %5493 }
 0x393   : > { %v1081_v16 = vmul.f32 %v5494_v14, %v5486_v61  ;;  %v4667_v61 = vld [vmem:[%s6581_s12] ss:$0 sm:$0xff] }
 0x394   : > { %v1303_v15 = vpop.xlane.xlu0 %1302  ;;  %v938_v14 = vld [vmem:[%s6582_s18] sm:$0xff] }
 0x395   : > { %v1082_v20 = vpack.c.bf16 %v1081_v16, %v1081_v16  ;;  %5497 = vrcp.f32 %v1303_v15  ;;  %v1648_v15 = vpack.c.bf16 %v938_v14, %v938_v14  ;;  %v5353_v16 = vld [vmem:[%s5852_s22 + $0x8] sm:$0xff]  }
 0x398   : > { %v1084_v17 = vpop.permute.xlu0 %1083 }
 0x399   : > { %v1090_v18 = vsel %vm1088_vm5, %v1084_v17, 0  ;;  %v5354_v17 = vld [vmem:[%s5852_s22] sm:$0xff]  }
 0x39a   : > { %5127 = vmatpush3.bf16.msra.mxu0 %v1090_v18  ;;  %v5496_v21 = vpop.eup %5495 }
 0x39b   : > { %5138 = vmatprep.subr.bf16.mxu0 %v5619_v2  ;;  %v1194_v11 = vmul.f32 %v5496_v21, %v5488_v0 }
 0x39c   : > { %v1419_v30 = vpop.permute.xlu0 %1418 }
 0x39d   : > { %5129 = vmatmul.mubr.msk.bf16.vlgmr.msra.gmra.mxu0 %vm1023_vm3, %v1082_v20  ;;  %v1195_v23 = vpack.c.bf16 %v1194_v11, %v1194_v11  ;;  %v1424_v32 = vsel %vm1088_vm5, %v1419_v30, 0 }
 0x39e   : > { %5139 = vmatpush3.bf16.msra.mxu0 %v1202_v22  ;;  %5140 = vmatprep.mubr.msk.bf16.mxu0 %vm5620_vm1, %v5619_v2  ;;  %v4671_v22 = vld [vmem:[%s5901_s2] ss:$0 sm:$0xff] }
 0x39f   : > { %5150 = vmatprep.subr.bf16.mxu0 %v5619_v2 }
 0x3a2   : > { %v5498_v24 = vpop.eup %5497 }
 0x3a3   : > { %v1305_v26 = vmul.f32 %v5498_v24, %v5490_v3 }
 0x3a5   : > { %5141 = vmatmul.mubr.msk.bf16.vlgmr.msra.gmra.mxu0 %vm1023_vm3, %v1195_v23  ;;  %v1306_v31 = vpack.c.bf16 %v1305_v26, %v1305_v26  ;;  %v4672_v23 = vld [vmem:[%s5906_s24] ss:$0 sm:$0xff] }
 0x3a6   : > { %5152 = vmatprep.mubr.msk.bf16.mxu0 %vm5620_vm1, %v5619_v2 }
 0x3c1   : > { %v1414_v25 = vpop.xlane.xlu1 %1413 }
 0x3c2   : > { %5499 = vrcp.f32 %v1414_v25 }
 0x3c5   : > { %v1308_v28 = vpop.permute.xlu1 %1307 }
 0x3c6   : > { %v1313_v29 = vsel %vm1088_vm5, %v1308_v28, 0  ;;  %v4677_v28 = vld [vmem:[%s6583_s17] ss:$0 sm:$0xff] }
 0x3c7   : > { %5151 = vmatpush3.bf16.msra.mxu0 %v1313_v29 }
 0x3c8   : > { %5162 = vmatprep.subr.bf16.mxu0 %v5619_v2 }
 0x3ca   : > { %5153 = vmatmul.mubr.msk.bf16.vlgmr.msra.gmra.mxu0 %vm1023_vm3, %v1306_v31 }
 0x3cb   : > { %5163 = vmatpush3.bf16.msra.mxu0 %v1424_v32  ;;  %5164 = vmatprep.mubr.msk.bf16.mxu0 %vm5620_vm1, %v5619_v2 }
 0x3cc   : > { %5176 = vmatprep.subr.bf16.mxu0 %v5619_v2 }
 0x3cf   : > { %v5500_v33 = vpop.eup %5499 }
 0x3d0   : > { %v1416_v34 = vmul.f32 %v5500_v33, %v5492_v9 }
 0x3d2   : > { %v1417_v35 = vpack.c.bf16 %v1416_v34, %v1416_v34 }
 0x3d4   : > { %5165 = vmatmul.mubr.msk.bf16.vlgmr.msra.gmra.mxu0 %vm1023_vm3, %v1417_v35 }
 0x3d5   : > { %5180 = vmatprep.mubr.msk.bf16.mxu0 %vm5620_vm1, %v5619_v2  ;;  %5177 = vmatpush3.bf16.msra.mxu0 %v5353_v16 }
 0x3d6   : > { %5178 = vmatprep.subr.bf16.mxu0 %v5619_v2 }
 0x3d9   : > { %5179 = vmatpush3.bf16.msra.mxu0 %v5354_v17 }
 0x3da   : > { %5192 = vmatprep.subr.bf16.mxu0 %v5619_v2 }
 0x45d   : > { %v1126_v36 = vpop.f32.mrf.mxu0 }
 0x45f   : > { %v5130_v37 = vpop.f32.mrf.mxu0 }
 0x461   : > { %v1129_v38 = vpop.f32.mrf.mxu0 }
 0x463   : > { %v5131_v39 = vpop.f32.mrf.mxu0 }
 0x465   : > { %v1238_v40 = vpop.f32.mrf.mxu0 }
 0x466   : > { %1467 = vrot.lane.b32.xlu1 %v1238_v40, %s5632_s30 }
 0x467   : > { %v5142_v41 = vpop.f32.mrf.mxu0 }
 0x469   : > { %v1241_v42 = vpop.f32.mrf.mxu0 }
 0x46b   : > { %v5143_v43 = vpop.f32.mrf.mxu0 }
 0x48a   : > { %v1349_v46 = vpop.f32.mrf.mxu0 }
 0x48b   : > { %1471 = vrot.lane.b32.xlu0 %v1349_v46, %s5633_s6 }
 0x48c   : > { %v5154_v47 = vpop.f32.mrf.mxu0 }
 0x48e   : > { %v1352_v48 = vpop.f32.mrf.mxu0 }
 0x490   : > { %v5155_v49 = vpop.f32.mrf.mxu0 }
 0x494   : > { %v1460_v50 = vpop.f32.mrf.mxu0 }
 0x495   : > { %1475 = vrot.lane.b32.xlu1 %v1460_v50, %s5634_s10 }
 0x496   : > { %v5166_v51 = vpop.f32.mrf.mxu0 }
 0x498   : > { %v1463_v52 = vpop.f32.mrf.mxu0 }
 0x49a   : > { %v5167_v53 = vpop.f32.mrf.mxu0 }
 0x4d8   : > { %v1468_v54 = vpop.permute.xlu1 %1467 }
 0x4d9   : > { %v1478_v56 = vsel %vm1023_vm3, %v1126_v36, %v1468_v54  ;;  %v4673_v36 = vld [vmem:[%s6584_s27] ss:$0 sm:$0xff] }
 0x4fd   : > { %v1472_v55 = vpop.permute.xlu0 %1471 }
 0x4fe   : > { %v1480_v57 = vsel %vm1479_vm6, %v1478_v56, %v1472_v55 }
 0x507   : > { %v1476_v58 = vpop.permute.xlu1 %1475 }
 0x508   : > { %v1482_v59 = vsel %vm1481_vm7, %v1480_v57, %v1476_v58 }
 0x509   : > { %v1483_v60 = vpack.c.bf16 %v1482_v59, %v1482_v59 }
 0x50b   : > { %5173 = vmatmul.mubr.msk.bf16.vlgmr.msra.gmra.mxu1 %vm968_vm2, %v1483_v60 }
 0x50c   : > { %5188 = vmatprep.mubr.msk.bf16.mxu1 %vm5620_vm1, %v5619_v2  ;;  %5185 = vmatpush3.bf16.msra.mxu1 %v5351_v13 }
 0x50d   : > { %5186 = vmatprep.subr.bf16.mxu1 %v5619_v2 }
 0x5cb   : > { %v1539_v62 = vpop.f32.mrf.mxu1 }
 0x5cc   : > { %v1540_v63 = vadd.f32 %v4667_v61, %v1539_v62 }
 0x5cd   : > { %v5174_v0 = vpop.f32.mrf.mxu1 }
 0x5ce   : > { %v1545_v1 = vadd.f32 %v1540_v63, %v5914_v4  ;;  %v5352_v4 = vld [vmem:[%s5861_s14] sm:$0xff]  }
 0x5cf   : > { %v1542_v3 = vpop.f32.mrf.mxu1  ;;  %5187 = vmatpush3.bf16.msra.mxu1 %v5352_v4 }
 0x5d0   : > { %v1548_v5 = vsel %vm968_vm2, %v1545_v1, 0.0  ;;  %5198 = vmatprep.subr.bf16.mxu1 %v5619_v2 }
 0x5d1   : > { %1549 = vadd.xlane.f32.xlu0 %v1548_v5  ;;  %v5175_v6 = vpop.f32.mrf.mxu1 }
 0x5d2   : > { %5189 = vmatmul.mubr.msk.bf16.vlgmr.msra.gmra.mxu1 %vm968_vm2, %v1648_v15 }
 0x5d3   : > { %5200 = vmatprep.mubr.msk.bf16.mxu1 %vm5620_vm1, %v5619_v2 }
 0x65a   : > { %v1550_v7 = vpop.xlane.xlu0 %1549 }
 0x65b   : > { %v1552_v8 = vmul.f32 0.03125, %v1550_v7 }
 0x65d   : > { %v1553_v9 = vsub.f32 %v1545_v1, %v1552_v8 }
 0x65f   : > { %v1554_v10 = vmul.f32 %v1553_v9, %v1553_v9 }
 0x661   : > { %v1555_v12 = vsel %vm968_vm2, %v1554_v10, 0.0 }
 0x662   : > { %1556 = vadd.xlane.f32.xlu1 %v1555_v12 }
 0x692   : > { %v1705_v29 = vpop.f32.mrf.mxu1 }
 0x693   : > { %v1706_v30 = vadd.f32 %v4677_v28, %v1705_v29 }
 0x694   : > { %v5190_v31 = vpop.f32.mrf.mxu1 }
 0x695   : > { %v6053_v32 = vpack.c.bf16 %v1706_v30, %v1706_v30 }
 0x696   : > { %v1708_v33 = vpop.f32.mrf.mxu1 }
 0x697   : > { %1828 = vrot.lane.b32.xlu0 %v6053_v32, %s5622_s0  ;;  %v1722_v35 = vsel %vm1023_vm3, %v6053_v32, 0 }
 0x698   : > { %v5191_v34 = vpop.f32.mrf.mxu1 }
 0x69b   : > { %1938 = vrot.lane.b32.xlu0 %v6053_v32, %s5625_s29 }
 0x69f   : > { %2048 = vrot.lane.b32.xlu0 %v6053_v32, %s5627_s28 }
 0x6eb   : > { %v1557_v18 = vpop.xlane.xlu1 %1556 }
 0x6ec   : > { %v1558_v19 = vmul.f32 0.03125, %v1557_v18 }
 0x6ee   : > { %v1559_v20 = vadd.f32 1e-05, %v1558_v19 }
 0x6f0   : > { %5501 = vrsqrt.f32 %v1559_v20 }
 0x6fd   : > { %v5502_v21 = vpop.eup %5501 }
 0x6fe   : > { %v1561_v11 = vmul.f32 %v5502_v21, %v1553_v9 }
 0x700   : > { %v1568_v24 = vmul.f32 %v4671_v22, %v1561_v11 }
 0x702   : > { %v6041_v25 = vadd.f32 %v4672_v23, %v1568_v24 }
 0x704   : > { %v1580_v26 = vpack.c.bf16 %v6041_v25, %v6041_v25 }
 0x706   : > { %5181 = vmatmul.mubr.msk.bf16.vlgmr.msra.gmra.mxu0 %vm968_vm2, %v1580_v26 }
 0x707   : > { %5194 = vmatprep.mubr.msk.bf16.mxu0 %vm5620_vm1, %v5619_v2  ;;  %5193 = vmatpush3.bf16.xpose.msra.mxu0 %v1722_v35 }
 0x708   : > { %5204 = vmatprep.subr.bf16.mxu0 %v5619_v2 }
 0x709   : > { %v1829_v42 = vpop.permute.xlu0 %1828 }
 0x70a   : > { %v1834_v44 = vsel %vm1023_vm3, %v1829_v42, 0 }
 0x70d   : > { %v1939_v46 = vpop.permute.xlu0 %1938 }
 0x70e   : > { %v1944_v48 = vsel %vm1023_vm3, %v1939_v46, 0 }
 0x711   : > { %v2049_v49 = vpop.permute.xlu0 %2048 }
 0x712   : > { %v2054_v51 = vsel %vm1023_vm3, %v2049_v49, 0 }
 0x7c6   : > { %v1637_v37 = vpop.f32.mrf.mxu0 }
 0x7c7   : > { %v1638_v38 = vadd.f32 %v4673_v36, %v1637_v37 }
 0x7c8   : > { %v5182_v39 = vpop.f32.mrf.mxu0 }
 0x7c9   : > { %v1643_v40 = vmul.f32 0.35355338, %v1638_v38 }
 0x7ca   : > { %v1640_v41 = vpop.f32.mrf.mxu0 }
 0x7cb   : > { %v1716_v43 = vpack.c.bf16 %v1643_v40, %v1643_v40 }
 0x7cc   : > { %v5183_v45 = vpop.f32.mrf.mxu0 }
 0x7cd   : > { %1826 = vrot.lane.b32.xlu1 %v1716_v43, %s5622_s0  ;;  %5195 = vmatmul.mubr.msk.bf16.vlgmr.msra.gmra.mxu0 %vm1023_vm3, %v1716_v43 }
 0x7ce   : > { %5205 = vmatpush3.bf16.xpose.msra.mxu0 %v1834_v44  ;;  %5206 = vmatprep.mubr.msk.bf16.mxu0 %vm5620_vm1, %v5619_v2 }
 0x7cf   : > { %5216 = vmatprep.subr.bf16.mxu0 %v5619_v2 }
 0x7d1   : > { %1936 = vrot.lane.b32.xlu1 %v1716_v43, %s5625_s29 }
 0x7d5   : > { %2046 = vrot.lane.b32.xlu1 %v1716_v43, %s5627_s28 }
 0x83f   : > { %v1827_v47 = vpop.permute.xlu1 %1826 }
 0x840   : > { %5207 = vmatmul.mubr.msk.bf16.vlgmr.msra.gmra.mxu0 %vm1023_vm3, %v1827_v47 }
 0x841   : > { %5217 = vmatpush3.bf16.xpose.msra.mxu0 %v1944_v48  ;;  %5218 = vmatprep.mubr.msk.bf16.mxu0 %vm5620_vm1, %v5619_v2 }
 0x842   : > { %5228 = vmatprep.subr.bf16.mxu0 %v5619_v2 }
 0x843   : > { %v1937_v50 = vpop.permute.xlu1 %1936 }
 0x847   : > { %v2047_v52 = vpop.permute.xlu1 %2046 }
 0x848   : > { %5219 = vmatmul.mubr.msk.bf16.vlgmr.msra.gmra.mxu0 %vm1023_vm3, %v1937_v50 }
 0x849   : > { %5229 = vmatpush3.bf16.xpose.msra.mxu0 %v2054_v51  ;;  %5230 = vmatprep.mubr.msk.bf16.mxu0 %vm5620_vm1, %v5619_v2 }
 0x84a   : > { %5240 = vmatprep.subr.bf16.mxu0 %v5619_v2 }
 0x850   : > { %5231 = vmatmul.mubr.msk.bf16.vlgmr.msra.gmra.mxu0 %vm1023_vm3, %v2047_v52 }
 0x851   : > { %5244 = vmatprep.mubr.msk.bf16.mxu0 %vm5620_vm1, %v5619_v2 }
 0x88d   : > { %v1758_v53 = vpop.f32.mrf.mxu0 }
 0x88e   : > { %v1764_v54 = vsel %vm1023_vm3, %v1758_v53, -inf }
 0x88f   : > { %1765 = vmax.xlane.f32.xlu0 %v1764_v54  ;;  %v5196_v55 = vpop.f32.mrf.mxu0 }
 0x891   : > { %v1761_v56 = vpop.f32.mrf.mxu0 }
 0x893   : > { %v5197_v57 = vpop.f32.mrf.mxu0 }
 0x900   : > { %v1870_v58 = vpop.f32.mrf.mxu0 }
 0x901   : > { %v1876_v59 = vsel %vm1023_vm3, %v1870_v58, -inf }
 0x902   : > { %1877 = vmax.xlane.f32.xlu1 %v1876_v59  ;;  %v5208_v60 = vpop.f32.mrf.mxu0 }
 0x904   : > { %v1873_v61 = vpop.f32.mrf.mxu0 }
 0x906   : > { %v5209_v62 = vpop.f32.mrf.mxu0 }
 0x908   : > { %v1980_v63 = vpop.f32.mrf.mxu0 }
 0x909   : > { %v1986_v0 = vsel %vm1023_vm3, %v1980_v63, -inf }
 0x90a   : > { %1987 = vmax.xlane.f32.xlu0 %v1986_v0  ;;  %v5220_v1 = vpop.f32.mrf.mxu0 }
 0x90c   : > { %v1983_v3 = vpop.f32.mrf.mxu0 }
 0x90e   : > { %v5221_v5 = vpop.f32.mrf.mxu0 }
 0x910   : > { %v2090_v6 = vpop.f32.mrf.mxu0 }
 0x911   : > { %v2096_v7 = vsel %vm1023_vm3, %v2090_v6, -inf }
 0x912   : > { %2097 = vmax.xlane.f32.xlu0 %v2096_v7  ;;  %v5232_v8 = vpop.f32.mrf.mxu0 }
 0x914   : > { %v2093_v9 = vpop.f32.mrf.mxu0 }
 0x916   : > { %v5233_v10 = vpop.f32.mrf.mxu0 }
 0x918   : > { %v1766_v12 = vpop.xlane.xlu0 %1765 }
 0x919   : > { %v1767_v13 = vsub.f32 %v1758_v53, %v1766_v12 }
 0x91b   : > { %v1768_v4 = vmul.f32 1.442695, %v1767_v13 }
 0x91d   : > { %5503 = vpow2.f32 %v1768_v4 }
 0x92a   : > { %v5504_v14 = vpop.eup %5503 }
 0x92b   : > { %v1770_v15 = vsel %vm1023_vm3, %v5504_v14, 0.0 }
 0x92c   : > { %1771 = vadd.xlane.f32.xlu1 %v1770_v15 }
 0x93d   : > { %1777 = vrot.lane.b32.xlu1 %v6053_v32, %s5621_s4  ;;  %s6585_s4 = sld [smem:[#allocation20_spill]] }
 0x943   : > { %v5355_v60 = vld [vmem:[%s6585_s4 + $0x8] sm:$0xff]  }
 0x944   : > { %5241 = vmatpush3.bf16.msra.mxu0 %v5355_v60  ;;  %v4695_v60 = vld [vmem:[%s5901_s2 + $0x1] ss:$0 sm:$0xff] }
 0x945   : > { %5242 = vmatprep.subr.bf16.mxu0 %v5619_v2 }
 0x98b   : > { %v1878_v16 = vpop.xlane.xlu1 %1877 }
 0x98c   : > { %v1879_v17 = vsub.f32 %v1870_v58, %v1878_v16 }
 0x98e   : > { %v1880_v18 = vmul.f32 1.442695, %v1879_v17 }
 0x990   : > { %5505 = vpow2.f32 %v1880_v18 }
 0x993   : > { %v1988_v19 = vpop.xlane.xlu0 %1987 }
 0x994   : > { %v1989_v20 = vsub.f32 %v1980_v63, %v1988_v19  ;;  %v5356_v63 = vld [vmem:[%s6585_s4] sm:$0xff]  }
 0x995   : > { %5243 = vmatpush3.bf16.msra.mxu0 %v5356_v63 }
 0x996   : > { %v1990_v21 = vmul.f32 1.442695, %v1989_v20 }
 0x998   : > { %5507 = vpow2.f32 %v1990_v21 }
 0x99b   : > { %v2098_v22 = vpop.xlane.xlu0 %2097 }
 0x99c   : > { %v2099_v11 = vsub.f32 %v2090_v6, %v2098_v22 }
 0x99d   : > { %v5506_v23 = vpop.eup %5505 }
 0x99e   : > { %v2100_v24 = vmul.f32 1.442695, %v2099_v11  ;;  %v1882_v26 = vsel %vm1023_vm3, %v5506_v23, 0.0 }
 0x99f   : > { %1883 = vadd.xlane.f32.xlu0 %v1882_v26 }
 0x9a0   : > { %5509 = vpow2.f32 %v2100_v24 }
 0x9a5   : > { %v5508_v28 = vpop.eup %5507 }
 0x9a6   : > { %v1992_v29 = vsel %vm1023_vm3, %v5508_v28, 0.0 }
 0x9a7   : > { %1993 = vadd.xlane.f32.xlu1 %v1992_v29 }
 0x9ad   : > { %v5510_v30 = vpop.eup %5509 }
 0x9ae   : > { %v2102_v31 = vsel %vm1023_vm3, %v5510_v30, 0.0 }
 0x9af   : > { %2103 = vadd.xlane.f32.xlu0 %v2102_v31 }
 0x9b5   : > { %v1772_v33 = vpop.xlane.xlu1 %1771 }
 0x9b6   : > { %5511 = vrcp.f32 %v1772_v33  ;;  %v2281_v33 = vld [vmem:[%s5880_s16 + $0x80] sm:$0xff] }
 0x9b8   : > { %1998 = vrot.lane.b32.xlu1 %v6053_v32, %s5624_s20  ;;  %s6586_s20 = sld [smem:[#allocation30_spill]] }
 0x9b9   : > { %v1778_v34 = vpop.permute.xlu1 %1777 }
 0x9ba   : > { %v1783_v35 = vsel %vm1088_vm5, %v1778_v34, 0  ;;  %v2289_v34 = vld [vmem:[%s5880_s16 + $0xc0] sm:$0xff] }
 0x9bb   : > { %5199 = vmatpush3.bf16.msra.mxu1 %v1783_v35  ;;  %v2282_v35 = vld [vmem:[%s5880_s16 + $0x88] sm:$0xff] }
 0x9bc   : > { %2108 = vrot.lane.b32.xlu1 %v6053_v32, %s5626_s3  ;;  %5210 = vmatprep.subr.bf16.mxu1 %v5619_v2 }
 0x9be   : > { %s6587_s29 = scalar_lea.vmem %s6586_s20, %s5822_s1  ;;  %s6589_s1 = sld [smem:[#allocation9_spill]] }
 0x9bf   : > { %v4689_v18 = vld [vmem:[%s6587_s29] ss:$0 sm:$0xff] }
 0x9c3   : > { %v5512_v36 = vpop.eup %5511 }
 0x9c4   : > { %v1774_v37 = vmul.f32 %v5512_v36, %v5504_v14  ;;  %v2290_v36 = vld [vmem:[%s5880_s16 + $0xc8] sm:$0xff]  ;;  %p4870_p1 = scmp.ne.s32.totalorder %s6589_s1, 1 }
 0x9c5   : > { %1888 = vrot.lane.b32.xlu0 %v6053_v32, %s5623_s23  ;;  %s6591_s11 = sld [smem:[#allocation37_spill]] (!%p4870_p1) }
 0x9c6   : > { %v1775_v38 = vpack.c.bf16 %v1774_v37, %v1774_v37  ;;  %v4713_v37 = vcombine.low %v2281_v33, %v2289_v34 }
 0x9c8   : > { %5201 = vmatmul.mubr.msk.bf16.vlgmr.msra.gmra.mxu1 %vm1023_vm3, %v1775_v38  ;;  %v4715_v38 = vcombine.low %v2282_v35, %v2290_v36 }
 0x9c9   : > { %5212 = vmatprep.mubr.msk.bf16.mxu1 %vm5620_vm1, %v5619_v2 }
 0xa28   : > { %v1884_v39 = vpop.xlane.xlu0 %1883 }
 0xa29   : > { %5513 = vrcp.f32 %v1884_v39  ;;  %v4716_v39 = vcombine.high %v2282_v35, %v2290_v36  ;;  %v2271_v35 = vld [vmem:[%s5880_s16 + $0x30] sm:$0xff]  ;;  %v2272_v36 = vld [vmem:[%s5880_s16 + $0x38] sm:$0xff] }
 0xa2b   : > { %2598 = vmatprep.subr.bf16.mxu0 %v4716_v39 }
 0xa30   : > { %v1994_v40 = vpop.xlane.xlu1 %1993 }
 0xa31   : > { %5515 = vrcp.f32 %v1994_v40  ;;  %v2265_v40 = vld [vmem:[%s5880_s16] sm:$0xff] }
 0xa34   : > { %v1999_v46 = vpop.permute.xlu1 %1998 }
 0xa35   : > { %v2004_v48 = vsel %vm1088_vm5, %v1999_v46, 0 }
 0xa36   : > { %v5514_v41 = vpop.eup %5513 }
 0xa37   : > { %v1886_v43 = vmul.f32 %v5514_v41, %v5506_v23  ;;  %v2273_v41 = vld [vmem:[%s5880_s16 + $0x40] sm:$0xff] }
 0xa38   : > { %v2104_v42 = vpop.xlane.xlu0 %2103  ;;  %v2109_v50 = vpop.permute.xlu1 %2108 }
 0xa39   : > { %5517 = vrcp.f32 %v2104_v42  ;;  %v1887_v32 = vpack.c.bf16 %v1886_v43, %v1886_v43  ;;  %v2114_v53 = vsel %vm1088_vm5, %v2109_v50, 0  ;;  %v2266_v42 = vld [vmem:[%s5880_s16 + $0x8] sm:$0xff]  ;;  %v4698_v43 = vcombine.high %v2265_v40, %v2273_v41 }
 0xa3a   : > { %v5635_v50 = vmov 0  }
 0xa3c   : > { %v1889_v44 = vpop.permute.xlu0 %1888 }
 0xa3d   : > { %v1894_v45 = vsel %vm1088_vm5, %v1889_v44, 0  ;;  %v2274_v44 = vld [vmem:[%s5880_s16 + $0x48] sm:$0xff] }
 0xa3e   : > { %5211 = vmatpush3.bf16.msra.mxu1 %v1894_v45  ;;  %v5516_v47 = vpop.eup %5515  ;;  %v4697_v45 = vcombine.low %v2265_v40, %v2273_v41  ;;  %v4699_v46 = vcombine.low %v2266_v42, %v2274_v44 }
 0xa3f   : > { %5222 = vmatprep.subr.bf16.mxu1 %v5619_v2  ;;  %v1996_v49 = vmul.f32 %v5516_v47, %v5508_v28  ;;  %v2283_v47 = vld [vmem:[%s5880_s16 + $0x90] sm:$0xff] }
 0xa41   : > { %5213 = vmatmul.mubr.msk.bf16.vlgmr.msra.gmra.mxu1 %vm1023_vm3, %v1887_v32  ;;  %v1997_v51 = vpack.c.bf16 %v1996_v49, %v1996_v49  ;;  %v4700_v32 = vcombine.high %v2266_v42, %v2274_v44  ;;  %v2284_v49 = vld [vmem:[%s5880_s16 + $0x98] sm:$0xff] }
 0xa42   : > { %5223 = vmatpush3.bf16.msra.mxu1 %v2004_v48  ;;  %5224 = vmatprep.mubr.msk.bf16.mxu1 %vm5620_vm1, %v5619_v2  ;;  %v2291_v48 = vld [vmem:[%s5880_s16 + $0xd0] sm:$0xff]  ;;  %v5357_v44 = vld [vmem:[%s5895_s21 + $0x78] sm:$0xff]  }
 0xa43   : > { %5234 = vmatprep.subr.bf16.mxu1 %v5619_v2 }
 0xa46   : > { %v5518_v52 = vpop.eup %5517 }
 0xa47   : > { %v2106_v54 = vmul.f32 %v5518_v52, %v5510_v30  ;;  %v2292_v52 = vld [vmem:[%s5880_s16 + $0xd8] sm:$0xff] }
 0xa49   : > { %5225 = vmatmul.mubr.msk.bf16.vlgmr.msra.gmra.mxu1 %vm1023_vm3, %v1997_v51  ;;  %v2107_v55 = vpack.c.bf16 %v2106_v54, %v2106_v54  ;;  %v4718_v51 = vcombine.high %v2283_v47, %v2291_v48  ;;  %v4719_v54 = vcombine.low %v2284_v49, %v2292_v52 }
 0xa4a   : > { %5235 = vmatpush3.bf16.msra.mxu1 %v2114_v53  ;;  %5236 = vmatprep.mubr.msk.bf16.mxu1 %vm5620_vm1, %v5619_v2  ;;  %v4717_v53 = vcombine.low %v2283_v47, %v2291_v48  ;;  %v5361_v47 = vld [vmem:[%s5895_s21 + $0x70] sm:$0xff]  }
 0xa4b   : > { %v5362_v48 = vld [vmem:[%s5895_s21 + $0xf0] sm:$0xff]  }
 0xa51   : > { %5237 = vmatmul.mubr.msk.bf16.vlgmr.msra.gmra.mxu1 %vm1023_vm3, %v2107_v55  ;;  %v4720_v55 = vcombine.high %v2284_v49, %v2292_v52  ;;  %v5363_v49 = vld [vmem:[%s5895_s21 + $0x30] sm:$0xff]   ;;  %v5366_v52 = vld [vmem:[%s5895_s21 + $0xe8] sm:$0xff]  }
 0xa52   : > { %2577 = vmatprep.mubr.bf16.mxu1 %v5635_v50 }
 0xa88   : > { %v1819_v56 = vpop.f32.mrf.mxu1 }
 0xa8a   : > { %v5202_v57 = vpop.f32.mrf.mxu1 }
 0xa8c   : > { %v1822_v58 = vpop.f32.mrf.mxu1 }
 0xa8e   : > { %v5203_v59 = vpop.f32.mrf.mxu1 }
 0xb01   : > { %v1930_v61 = vpop.f32.mrf.mxu1 }
 0xb02   : > { %2157 = vrot.lane.b32.xlu0 %v1930_v61, %s5632_s30  ;;  %s6590_s30 = sld [smem:[#allocation36_spill]] (!%p4870_p1) }
 0xb03   : > { %v5214_v62 = vpop.f32.mrf.mxu1 }
 0xb04   : > { %v4696_v62 = vld [vmem:[%s5906_s24 + $0x1] ss:$0 sm:$0xff] }
 0xb05   : > { %v1933_v0 = vpop.f32.mrf.mxu1 }
 0xb06   : > { %v2267_v0 = vld [vmem:[%s5880_s16 + $0x10] sm:$0xff] }
 0xb07   : > { %v5215_v1 = vpop.f32.mrf.mxu1 }
 0xb08   : > { %v2275_v1 = vld [vmem:[%s5880_s16 + $0x50] sm:$0xff] }
 0xb09   : > { %v2040_v3 = vpop.f32.mrf.mxu1 }
 0xb0a   : > { %2161 = vrot.lane.b32.xlu1 %v2040_v3, %s5633_s6  ;;  %v2268_v3 = vld [vmem:[%s5880_s16 + $0x18] sm:$0xff] }
 0xb0b   : > { %v5226_v5 = vpop.f32.mrf.mxu1 }
 0xb0c   : > { %v2276_v5 = vld [vmem:[%s5880_s16 + $0x58] sm:$0xff] }
 0xb0d   : > { %v2043_v6 = vpop.f32.mrf.mxu1 }
 0xb0f   : > { %v5227_v7 = vpop.f32.mrf.mxu1 }
 0xb11   : > { %v2150_v8 = vpop.f32.mrf.mxu1 }
 0xb12   : > { %2165 = vrot.lane.b32.xlu0 %v2150_v8, %s5634_s10  ;;  %v4702_v8 = vcombine.high %v2267_v0, %v2275_v1 }
 0xb13   : > { %v5238_v9 = vpop.f32.mrf.mxu1 }
 0xb14   : > { %v4704_v9 = vcombine.high %v2268_v3, %v2276_v5 }
 0xb15   : > { %v2153_v2 = vpop.f32.mrf.mxu1 }
 0xb16   : > { %v2285_v2 = vld [vmem:[%s5880_s16 + $0xa0] sm:$0xff] }
 0xb17   : > { %v5239_v10 = vpop.f32.mrf.mxu1 }
 0xb18   : > { %v2293_v10 = vld [vmem:[%s5880_s16 + $0xe0] sm:$0xff] }
 0xb74   : > { %v2158_v12 = vpop.permute.xlu0 %2157 }
 0xb75   : > { %v2168_v4 = vsel %vm1023_vm3, %v1819_v56, %v2158_v12  ;;  %v2286_v12 = vld [vmem:[%s5880_s16 + $0xa8] sm:$0xff] }
 0xb7c   : > { %v2162_v13 = vpop.permute.xlu1 %2161 }
 0xb7d   : > { %v2169_v14 = vsel %vm1479_vm6, %v2168_v4, %v2162_v13  ;;  %v2294_v13 = vld [vmem:[%s5880_s16 + $0xe8] sm:$0xff]  ;;  %v4701_v4 = vcombine.low %v2267_v0, %v2275_v1  ;;  %v5378_v0 = vld [vmem:[%s5895_s21 + $0xd0] sm:$0xff]  }
 0xb7e   : > { %v5379_v1 = vld [vmem:[%s5895_s21 + $0x10] sm:$0xff]  }
 0xb84   : > { %v2166_v15 = vpop.permute.xlu0 %2165 }
 0xb85   : > { %v2170_v16 = vsel %vm1481_vm7, %v2169_v14, %v2166_v15  ;;  %v4703_v14 = vcombine.low %v2268_v3, %v2276_v5  ;;  %v4722_v15 = vcombine.high %v2285_v2, %v2293_v10  ;;  %v5380_v3 = vld [vmem:[%s5895_s21 + $0x90] sm:$0xff]   ;;  %v5381_v5 = vld [vmem:[%s5895_s21 + $0x48] sm:$0xff]  }
 0xb86   : > { %v2171_v17 = vpack.c.bf16 %v2170_v16, %v2170_v16  ;;  %v4724_v16 = vcombine.high %v2286_v12, %v2294_v13 }
 0xb88   : > { %5245 = vmatmul.mubr.msk.bf16.vlgmr.msra.gmra.mxu0 %vm968_vm2, %v2171_v17  ;;  %v2269_v17 = vld [vmem:[%s5880_s16 + $0x20] sm:$0xff] }
 0xb89   : > { %2599 = vmatpush1.bf16.msra.mxu0 %v4715_v38  ;;  %2618 = vmatprep.mubr.bf16.mxu0 %v5635_v50 }
 0xb8a   : > { %2600 = vmatprep.subr.bf16.mxu0 %v4700_v32  ;;  %v5360_v32 = vld [vmem:[%s5895_s21 + $0xb8] sm:$0xff]  }
 0xb8d   : > { %2601 = vmatpush1.bf16.msra.mxu0 %v4699_v46  ;;  %v5359_v46 = vld [vmem:[%s5895_s21 + $0x38] sm:$0xff]  }
 0xb8e   : > { %2680 = vmatprep.subr.bf16.mxu0 %v4720_v55  ;;  %v5369_v55 = vld [vmem:[%s5895_s21 + $0x60] sm:$0xff]  }
 0xc48   : > { %v2227_v19 = vpop.f32.mrf.mxu0 }
 0xc49   : > { %v2228_v20 = vadd.f32 %v4689_v18, %v2227_v19  ;;  %v2277_v18 = vld [vmem:[%s5880_s16 + $0x60] sm:$0xff]  ;;  %v2270_v19 = vld [vmem:[%s5880_s16 + $0x28] sm:$0xff] }
 0xc4a   : > { %v5246_v21 = vpop.f32.mrf.mxu0 }
 0xc4b   : > { %v2233_v22 = vadd.f32 %v2228_v20, %v6041_v25  ;;  %v4714_v25 = vcombine.high %v2281_v33, %v2289_v34  ;;  %v2278_v20 = vld [vmem:[%s5880_s16 + $0x68] sm:$0xff]  ;;  %v4721_v21 = vcombine.low %v2285_v2, %v2293_v10  ;;  %v5385_v2 = vld [vmem:[%s5895_s21 + $0x40] sm:$0xff]  }
 0xc4c   : > { %v2230_v11 = vpop.f32.mrf.mxu0  ;;  %v5386_v10 = vld [vmem:[%s5895_s21 + $0xc0] sm:$0xff]  }
 0xc4d   : > { %v2238_v23 = vsel %vm968_vm2, %v2233_v22, 0.0  ;;  %2557 = vmatprep.subr.bf16.mxu1 %v4714_v25  ;;  %v4706_v11 = vcombine.high %v2269_v17, %v2277_v18  ;;  %v2279_v25 = vld [vmem:[%s5880_s16 + $0x70] sm:$0xff] }
 0xc4e   : > { %2239 = vadd.xlane.f32.xlu1 %v2238_v23  ;;  %v5247_v24 = vpop.f32.mrf.mxu0  ;;  %2558 = vmatpush1.bf16.msra.mxu1 %v4713_v37  ;;  %v4708_v23 = vcombine.high %v2270_v19, %v2278_v20  ;;  %v2280_v37 = vld [vmem:[%s5880_s16 + $0x78] sm:$0xff]  ;;  %v4710_v40 = vcombine.high %v2271_v35, %v2279_v25  ;;  %v4709_v42 = vcombine.low %v2271_v35, %v2279_v25 }
 0xc4f   : > { %2559 = vmatprep.subr.bf16.mxu1 %v4698_v43  ;;  %v2287_v24 = vld [vmem:[%s5880_s16 + $0xb0] sm:$0xff]  ;;  %v4712_v41 = vcombine.high %v2272_v36, %v2280_v37  ;;  %v4711_v43 = vcombine.low %v2272_v36, %v2280_v37  ;;  %v2324_v36 = vsub.s32 5, %v5963_v27  ;;  %v2332_v37 = vsub.s32 7, %v5963_v27 }
 0xc52   : > { %2560 = vmatpush1.bf16.msra.mxu1 %v4697_v45  ;;  %v5358_v45 = vld [vmem:[%s5895_s21 + $0xf8] sm:$0xff]  }
 0xc53   : > { %2639 = vmatprep.subr.bf16.mxu1 %v4718_v51  ;;  %v5365_v51 = vld [vmem:[%s5895_s21 + $0x68] sm:$0xff]  }
 0xcd7   : > { %v2240_v26 = vpop.xlane.xlu1 %2239 }
 0xcd8   : > { %v2241_v28 = vmul.f32 0.03125, %v2240_v26  ;;  %v2295_v26 = vld [vmem:[%s5880_s16 + $0xf0] sm:$0xff] }
 0xcd9   : > { %v4726_v33 = vcombine.high %v2287_v24, %v2295_v26  ;;  %v4725_v38 = vcombine.low %v2287_v24, %v2295_v26 }
 0xcda   : > { %v2242_v29 = vsub.f32 %v2233_v22, %v2241_v28  ;;  %v4723_v22 = vcombine.low %v2286_v12, %v2294_v13  ;;  %v2288_v28 = vld [vmem:[%s5880_s16 + $0xb8] sm:$0xff]  ;;  %v5387_v12 = vld [vmem:[%s5895_s21] sm:$0xff]  }
 0xcdb   : > { %v5388_v13 = vld [vmem:[%s5895_s21 + $0x80] sm:$0xff]  }
 0xcdc   : > { %v2243_v30 = vmul.f32 %v2242_v29, %v2242_v29 }
 0xcde   : > { %v2244_v31 = vsel %vm968_vm2, %v2243_v30, 0.0  ;;  %v4705_v30 = vcombine.low %v2269_v17, %v2277_v18  ;;  %v2304_v18 = vsub.s32 0, %v5963_v27 }
 0xcdf   : > { %2245 = vadd.xlane.f32.xlu0 %v2244_v31  ;;  %v4707_v31 = vcombine.low %v2270_v19, %v2278_v20  ;;  %v2312_v19 = vsub.s32 2, %v5963_v27 }
 0xd68   : > { %v2246_v56 = vpop.xlane.xlu0 %2245 }
 0xd69   : > { %v2247_v57 = vmul.f32 0.03125, %v2246_v56  ;;  %v5370_v56 = vld [vmem:[%s5895_s21 + $0xe0] sm:$0xff]  }
 0xd6b   : > { %v2248_v58 = vadd.f32 1e-05, %v2247_v57  ;;  %v5371_v57 = vld [vmem:[%s5895_s21 + $0x20] sm:$0xff]  }
 0xd6d   : > { %5519 = vrsqrt.f32 %v2248_v58  ;;  %v5372_v58 = vld [vmem:[%s5895_s21 + $0xa0] sm:$0xff]  }
 0xd7a   : > { %v5520_v59 = vpop.eup %5519 }
 0xd7b   : > { %v2250_v61 = vmul.f32 %v5520_v59, %v2242_v29  ;;  %v2296_v29 = vld [vmem:[%s5880_s16 + $0xf8] sm:$0xff]  ;;  %s6588_s16 = sld [smem:[#allocation21_spill]] }
 0xd7c   : > { %v4728_v34 = vcombine.high %v2288_v28, %v2296_v29  ;;  %v4727_v39 = vcombine.low %v2288_v28, %v2296_v29  ;;  %v5373_v59 = vld [vmem:[%s5895_s21 + $0x58] sm:$0xff]  }
 0xd7d   : > { %v2257_v63 = vmul.f32 %v4695_v60, %v2250_v61  ;;  %v5374_v60 = vld [vmem:[%s5895_s21 + $0xd8] sm:$0xff]  }
 0xd7e   : > { %v5375_v61 = vld [vmem:[%s5895_s21 + $0x18] sm:$0xff]  }
 0xd7f   : > { %v6161_v6 = vadd.f32 %v4696_v62, %v2257_v63  ;;  %v5376_v62 = vld [vmem:[%s5895_s21 + $0x98] sm:$0xff]   ;;  %v5377_v63 = vld [vmem:[%s5895_s21 + $0x50] sm:$0xff]  }
 0xd81   : > { %v6165_v7 = vpack.c.bf16 %v6161_v6, %v6161_v6  ;;  %v6251_v20 = vld [vmem:[%s6588_s16] sm:$0xff] }
 0xd83   : > { %4729 = vmatmul.mubr.msk.bf16.vlgmr.msra.gmra.mxu1 %vm968_vm2, %v6165_v7  ;;  %4730 = vmatmul.mubr.msk.bf16.vlgmr.msra.gmra.mxu0 %vm968_vm2, %v6165_v7 }
 0xd84   : > { %2640 = vmatpush1.bf16.msra.mxu1 %v4717_v53  ;;  %2681 = vmatpush1.bf16.msra.mxu0 %v4719_v54  ;;  %v5367_v53 = vld [vmem:[%s5895_s21 + $0x28] sm:$0xff]  }
 0xd85   : > { %2641 = vmatprep.subr.bf16.mxu1 %v4702_v8  ;;  %2682 = vmatprep.subr.bf16.mxu0 %v4704_v9  ;;  %v5368_v54 = vld [vmem:[%s5895_s21 + $0xa8] sm:$0xff]  }
 0xd86   : > { %2659 = vmatprep.mubr.bf16.mxu1 %v5635_v50  ;;  %2700 = vmatprep.mubr.bf16.mxu0 %v5635_v50  ;;  %v5383_v8 = vld [vmem:[%s5895_s21 + $0x8] sm:$0xff]  }
 0xd87   : > { %v5384_v9 = vld [vmem:[%s5895_s21 + $0x88] sm:$0xff]  }
 0xd88   : > { %2642 = vmatpush1.bf16.msra.mxu1 %v4701_v4  ;;  %2683 = vmatpush1.bf16.msra.mxu0 %v4703_v14  ;;  %v5389_v4 = vld [vmem:[%s5895_s21 + $0x178] sm:$0xff]  }
 0xd89   : > { %2721 = vmatprep.subr.bf16.mxu1 %v4722_v15  ;;  %2762 = vmatprep.subr.bf16.mxu0 %v4724_v16  ;;  %v5390_v14 = vld [vmem:[%s5895_s21 + $0x1f8] sm:$0xff]   ;;  %v2328_v15 = vsub.s32 6, %v5963_v27  ;;  %v6241_v16 = vld [vmem:[%s6588_s16 + $0x8] sm:$0xff] }
 0xd8b   : > { %4731 = vmatmul.mubr.msk.bf16.vlgmr.msra.gmra.mxu1 %vm968_vm2, %v6165_v7  ;;  %4732 = vmatmul.mubr.msk.bf16.vlgmr.msra.gmra.mxu0 %vm968_vm2, %v6165_v7  ;;  %v6246_v17 = vrot.slane %v6241_v16, %v2328_v15 }
 0xd8c   : > { %2722 = vmatpush1.bf16.msra.mxu1 %v4721_v21  ;;  %2763 = vmatpush1.bf16.msra.mxu0 %v4723_v22  ;;  %v2308_v21 = vsub.s32 1, %v5963_v27  ;;  %v2316_v22 = vsub.s32 3, %v5963_v27 }
 0xd8d   : > { %2723 = vmatprep.subr.bf16.mxu1 %v4706_v11  ;;  %2764 = vmatprep.subr.bf16.mxu0 %v4708_v23  ;;  %v2305_v11 = vrot.slane %v6251_v20, %v2304_v18  ;;  %v2313_v23 = vrot.slane %v6251_v20, %v2312_v19 }
 0xd8e   : > { %2741 = vmatprep.mubr.bf16.mxu1 %v5635_v50  ;;  %2782 = vmatprep.mubr.bf16.mxu0 %v5635_v50  ;;  %v2309_v24 = vrot.slane %v6251_v20, %v2308_v21  ;;  %v2317_v26 = vrot.slane %v6251_v20, %v2316_v22 }
 0xd90   : > { %2724 = vmatpush1.bf16.msra.mxu1 %v4705_v30  ;;  %2765 = vmatpush1.bf16.msra.mxu0 %v4707_v31 }
 0xd91   : > { %2803 = vmatprep.subr.bf16.mxu1 %v4726_v33  ;;  %2844 = vmatprep.subr.bf16.mxu0 %v4728_v34 }
 0xd93   : > { %4733 = vmatmul.mubr.msk.bf16.vlgmr.msra.gmra.mxu1 %vm968_vm2, %v6165_v7  ;;  %4734 = vmatmul.mubr.msk.bf16.vlgmr.msra.gmra.mxu0 %vm968_vm2, %v6165_v7 }
 0xd94   : > { %2804 = vmatpush1.bf16.msra.mxu1 %v4725_v38  ;;  %2845 = vmatpush1.bf16.msra.mxu0 %v4727_v39 }
 0xd95   : > { %2805 = vmatprep.subr.bf16.mxu1 %v4710_v40  ;;  %2846 = vmatprep.subr.bf16.mxu0 %v4712_v41 }
 0xd96   : > { %2823 = vmatprep.mubr.bf16.mxu1 %v5635_v50  ;;  %2864 = vmatprep.mubr.bf16.mxu0 %v5635_v50  ;;  %v5364_v50 = vld [vmem:[%s5895_s21 + $0xb0] sm:$0xff]  }
 0xd98   : > { %2806 = vmatpush1.bf16.msra.mxu1 %v4709_v42  ;;  %2847 = vmatpush1.bf16.msra.mxu0 %v4711_v43 }
 0xd99   : > { %4933 = vmatprep.subr.bf16.mxu1 %v5357_v44  ;;  %4955 = vmatprep.subr.bf16.mxu0 %v5358_v45 }
 0xd9b   : > { %4735 = vmatmul.mubr.msk.bf16.vlgmr.msra.gmra.mxu1 %vm968_vm2, %v6165_v7  ;;  %4736 = vmatmul.mubr.msk.bf16.vlgmr.msra.gmra.mxu0 %vm968_vm2, %v6165_v7  ;;  %v5382_v7 = vld [vmem:[%s5895_s21 + $0xc8] sm:$0xff]  }
 0xd9c   : > { %4934 = vmatpush3.bf16.msra.mxu1 %v5359_v46  ;;  %4956 = vmatpush3.bf16.msra.mxu0 %v5360_v32 }
 0xd9d   : > { %4935 = vmatprep.subr.bf16.mxu1 %v5361_v47  ;;  %4957 = vmatprep.subr.bf16.mxu0 %v5362_v48  ;;  %v2325_v47 = vrot.slane %v6251_v20, %v2324_v36  ;;  %v2333_v48 = vrot.slane %v6251_v20, %v2332_v37 }
 0xda0   : > { %4936 = vmatpush3.bf16.msra.mxu1 %v5363_v49  ;;  %4958 = vmatpush3.bf16.msra.mxu0 %v5364_v50  ;;  %v5391_v49 = vld [vmem:[%s5895_s21 + $0x138] sm:$0xff]  }
 0xda1   : > { %4937 = vmatprep.subr.bf16.mxu1 %v5365_v51  ;;  %4959 = vmatprep.subr.bf16.mxu0 %v5366_v52  ;;  %v5392_v50 = vld [vmem:[%s5895_s21 + $0x1b8] sm:$0xff]  }
 0xda4   : > { %4938 = vmatpush3.bf16.msra.mxu1 %v5367_v53  ;;  %4960 = vmatpush3.bf16.msra.mxu0 %v5368_v54 }
 0xda5   : > { %4939 = vmatprep.subr.bf16.mxu1 %v5369_v55  ;;  %4961 = vmatprep.subr.bf16.mxu0 %v5370_v56  ;;  %v5393_v55 = vld [vmem:[%s5895_s21 + $0x170] sm:$0xff]  }
 0xda6   : > { %v5394_v56 = vld [vmem:[%s5895_s21 + $0x1f0] sm:$0xff]  }
 0xda8   : > { %4940 = vmatpush3.bf16.msra.mxu1 %v5371_v57  ;;  %4962 = vmatpush3.bf16.msra.mxu0 %v5372_v58 }
 0xda9   : > { %4941 = vmatprep.subr.bf16.mxu1 %v5373_v59  ;;  %4963 = vmatprep.subr.bf16.mxu0 %v5374_v60 }
 0xdac   : > { %4942 = vmatpush3.bf16.msra.mxu1 %v5375_v61  ;;  %4964 = vmatpush3.bf16.msra.mxu0 %v5376_v62  ;;  %v5395_v61 = vld [vmem:[%s5895_s21 + $0x130] sm:$0xff]  }
 0xdad   : > { %4943 = vmatprep.subr.bf16.mxu1 %v5377_v63  ;;  %4965 = vmatprep.subr.bf16.mxu0 %v5378_v0  ;;  %v5396_v62 = vld [vmem:[%s5895_s21 + $0x1b0] sm:$0xff]  }
 0xdb0   : > { %4944 = vmatpush3.bf16.msra.mxu1 %v5379_v1  ;;  %4966 = vmatpush3.bf16.msra.mxu0 %v5380_v3  ;;  %v5397_v1 = vld [vmem:[%s5895_s21 + $0x168] sm:$0xff]  }
 0xdb1   : > { %4945 = vmatprep.subr.bf16.mxu1 %v5381_v5  ;;  %4967 = vmatprep.subr.bf16.mxu0 %v5382_v7  ;;  %v5398_v3 = vld [vmem:[%s5895_s21 + $0x1e8] sm:$0xff]  }
 0xdb4   : > { %4946 = vmatpush3.bf16.msra.mxu1 %v5383_v8  ;;  %4968 = vmatpush3.bf16.msra.mxu0 %v5384_v9 }
 0xdb5   : > { %4947 = vmatprep.subr.bf16.mxu1 %v5385_v2  ;;  %4969 = vmatprep.subr.bf16.mxu0 %v5386_v10 }
 0xdb8   : > { %4948 = vmatpush3.bf16.msra.mxu1 %v5387_v12  ;;  %4970 = vmatpush3.bf16.msra.mxu0 %v5388_v13  ;;  %v5399_v12 = vld [vmem:[%s5895_s21 + $0x128] sm:$0xff]  }
 0xdb9   : > { %4977 = vmatprep.subr.bf16.mxu1 %v5389_v4  ;;  %4999 = vmatprep.subr.bf16.mxu0 %v5390_v14  ;;  %v5400_v13 = vld [vmem:[%s5895_s21 + $0x1a8] sm:$0xff]  }
 0xe43   : > { %v2579_v28 = vpop.f32.mrf.mxu1  ;;  %v2620_v29 = vpop.f32.mrf.mxu0 }
 0xe44   : > { %v2580_v30 = vadd.f32 %v2579_v28, %v2305_v11  ;;  %v2621_v31 = vadd.f32 %v2620_v29, %v2313_v23  ;;  %v5401_v11 = vld [vmem:[%s5895_s21 + $0x160] sm:$0xff]   ;;  %v2320_v28 = vsub.s32 4, %v5963_v27 }
 0xe45   : > { %v2581_v33 = vpop.f32.mrf.mxu1  ;;  %v2622_v34 = vpop.f32.mrf.mxu0  ;;  %v5402_v23 = vld [vmem:[%s5895_s21 + $0x1e0] sm:$0xff]  }
 0xe46   : > { %v2582_v35 = vadd.f32 %v2581_v33, %v2309_v24  ;;  %v2623_v25 = vadd.f32 %v2622_v34, %v2317_v26  ;;  %v2873_v38 = vmax.f32 %v2580_v30, 0.0  ;;  %v2875_v39 = vmax.f32 %v2621_v31, 0.0  ;;  %v5403_v29 = vld [vmem:[%s5895_s21 + $0x120] sm:$0xff]   ;;  %v5405_v34 = vld [vmem:[%s5895_s21 + $0x158] sm:$0xff]  }
 0xe47   : > { %v2583_v40 = vpop.f32.mrf.mxu1  ;;  %v2624_v41 = vpop.f32.mrf.mxu0  ;;  %v5404_v30 = vld [vmem:[%s5895_s21 + $0x1a0] sm:$0xff]  }
 0xe48   : > { %v2874_v42 = vmax.f32 %v2582_v35, 0.0  ;;  %v2876_v43 = vmax.f32 %v2623_v25, 0.0  ;;  %v2889_v51 = vpack.c.bf16 %v2873_v38, %v2873_v38  ;;  %v2891_v52 = vpack.c.bf16 %v2875_v39, %v2875_v39  ;;  %v5406_v35 = vld [vmem:[%s5895_s21 + $0x1d8] sm:$0xff]  }
 0xe49   : > { %v2584_v44 = vpop.f32.mrf.mxu1  ;;  %v2625_v45 = vpop.f32.mrf.mxu0  ;;  %v2353_v25 = vrot.slane %v6241_v16, %v2320_v28  ;;  %v5407_v40 = vld [vmem:[%s5895_s21 + $0x118] sm:$0xff]  }
 0xe4a   : > { %v2890_v46 = vpack.c.bf16 %v2874_v42, %v2874_v42  ;;  %v2892_v32 = vpack.c.bf16 %v2876_v43, %v2876_v43  ;;  %v5408_v41 = vld [vmem:[%s5895_s21 + $0x198] sm:$0xff]   ;;  %v5409_v44 = vld [vmem:[%s5895_s21 + $0x150] sm:$0xff]  }
 0xe4b   : > { %v6277_v53 = vpop.f32.mrf.mxu1  ;;  %v6279_v54 = vpop.f32.mrf.mxu0  ;;  %v5410_v45 = vld [vmem:[%s5895_s21 + $0x1d0] sm:$0xff]  }
 0xe4c   : > { %3968 = vmatprep.mubr.bf16.mxu1 %v2890_v46  ;;  %4008 = vmatprep.mubr.bf16.mxu0 %v2892_v32 }
 0xe4d   : > { %v2663_v57 = vpop.f32.mrf.mxu1  ;;  %v2704_v58 = vpop.f32.mrf.mxu0  ;;  %3969 = vmatmul.mubr.bf16.vlgmr.msra.gmra.mxu1 %v2889_v51  ;;  %4009 = vmatmul.mubr.bf16.vlgmr.msra.gmra.mxu0 %v2891_v52  ;;  %v2321_v51 = vrot.slane %v6251_v20, %v2320_v28  ;;  %v2329_v52 = vrot.slane %v6251_v20, %v2328_v15  ;;  %v5415_v15 = vld [vmem:[%s5895_s21 + $0x108] sm:$0xff]  }
 0xe4e   : > { %v2664_v59 = vadd.f32 %v2663_v57, %v2325_v47  ;;  %v2705_v60 = vadd.f32 %v2704_v58, %v2333_v48  ;;  %4978 = vmatpush3.bf16.msra.mxu1 %v5391_v49  ;;  %5000 = vmatpush3.bf16.msra.mxu0 %v5392_v50  ;;  %v5411_v49 = vld [vmem:[%s5895_s21 + $0x110] sm:$0xff]   ;;  %v5414_v57 = vld [vmem:[%s5895_s21 + $0x1c8] sm:$0xff]   ;;  %v2341_v58 = vrot.slane %v6241_v16, %v2308_v21  ;;  %v5417_v21 = vld [vmem:[%s5895_s21 + $0x140] sm:$0xff]  }
 0xe4f   : > { %v2665_v63 = vpop.f32.mrf.mxu1  ;;  %v2706_v0 = vpop.f32.mrf.mxu0  ;;  %4979 = vmatprep.subr.bf16.mxu1 %v5393_v55  ;;  %5001 = vmatprep.subr.bf16.mxu0 %v5394_v56  ;;  %v5412_v50 = vld [vmem:[%s5895_s21 + $0x190] sm:$0xff]   ;;  %v5416_v20 = vld [vmem:[%s5895_s21 + $0x188] sm:$0xff]  }
 0xe50   : > { %v2878_v5 = vmax.f32 %v2664_v59, 0.0  ;;  %v2880_v7 = vmax.f32 %v2705_v60, 0.0  ;;  %v2349_v59 = vrot.slane %v6241_v16, %v2316_v22  ;;  %v2703_v63 = vadd.f32 %v6279_v54, %v2329_v52  ;;  %v5418_v0 = vld [vmem:[%s5895_s21 + $0x1c0] sm:$0xff]   ;;  %v5422_v54 = vld [vmem:[%s5895_s21 + $0x2f8] sm:$0xff]   ;;  %v5444_v52 = vld [vmem:[%s5895_s21 + $0x290] sm:$0xff]  }
 0xe51   : > { %v2666_v8 = vpop.f32.mrf.mxu1  ;;  %v2707_v9 = vpop.f32.mrf.mxu0 }
 0xe52   : > { %v2894_v2 = vpack.c.bf16 %v2878_v5, %v2878_v5  ;;  %v2896_v10 = vpack.c.bf16 %v2880_v7, %v2880_v7  ;;  %4980 = vmatpush3.bf16.msra.mxu1 %v5395_v61  ;;  %5002 = vmatpush3.bf16.msra.mxu0 %v5396_v62  ;;  %v2662_v62 = vadd.f32 %v6277_v53, %v2321_v51  ;;  %v5420_v5 = vld [vmem:[%s5895_s21 + $0x180] sm:$0xff]   ;;  %v2879_v8 = vmax.f32 %v2703_v63, 0.0  ;;  %v5421_v53 = vld [vmem:[%s5895_s21 + $0x278] sm:$0xff]  }
 0xe53   : > { %v6289_v4 = vpop.f32.mrf.mxu1  ;;  %v6291_v14 = vpop.f32.mrf.mxu0  ;;  %4981 = vmatprep.subr.bf16.mxu1 %v5397_v1  ;;  %5003 = vmatprep.subr.bf16.mxu0 %v5398_v3  ;;  %v5419_v3 = vld [vmem:[%s5895_s21 + $0x100] sm:$0xff]   ;;  %v2337_v51 = vrot.slane %v6241_v16, %v2304_v18  ;;  %v2365_v18 = vrot.slane %v6241_v16, %v2332_v37 }
 0xe54   : > { %4048 = vmatprep.mubr.bf16.mxu1 %v2894_v2  ;;  %4088 = vmatprep.mubr.bf16.mxu0 %v2896_v10  ;;  %v2877_v7 = vmax.f32 %v2662_v62, 0.0  ;;  %v5423_v10 = vld [vmem:[%s5895_s21 + $0x238] sm:$0xff]  }
 0xe55   : > { %v2745_v24 = vpop.f32.mrf.mxu1  ;;  %v2786_v26 = vpop.f32.mrf.mxu0 }
 0xe56   : > { %4982 = vmatpush3.bf16.msra.mxu1 %v5399_v12  ;;  %5004 = vmatpush3.bf16.msra.mxu0 %v5400_v13  ;;  %v2746_v1 = vadd.f32 %v2745_v24, %v2341_v58  ;;  %v2787_v22 = vadd.f32 %v2786_v26, %v2349_v59  ;;  %v2893_v12 = vpack.c.bf16 %v2877_v7, %v2877_v7  ;;  %v5425_v24 = vld [vmem:[%s5895_s21 + $0x270] sm:$0xff]   ;;  %v5447_v58 = vld [vmem:[%s5895_s21 + $0x208] sm:$0xff]  }
 0xe57   : > { %v2747_v31 = vpop.f32.mrf.mxu1  ;;  %v2788_v33 = vpop.f32.mrf.mxu0  ;;  %4983 = vmatprep.subr.bf16.mxu1 %v5401_v11  ;;  %5005 = vmatprep.subr.bf16.mxu0 %v5402_v23  ;;  %v2895_v13 = vpack.c.bf16 %v2879_v8, %v2879_v8  ;;  %v5424_v11 = vld [vmem:[%s5895_s21 + $0x2b8] sm:$0xff]   ;;  %v5426_v26 = vld [vmem:[%s5895_s21 + $0x2f0] sm:$0xff]   ;;  %v2744_v59 = vadd.f32 %v6289_v4, %v2337_v51  ;;  %v5452_v4 = vld [vmem:[%s5895_s21 + $0x280] sm:$0xff]  }
 0xe58   : > { %v2882_v9 = vmax.f32 %v2746_v1, 0.0  ;;  %v2884_v2 = vmax.f32 %v2787_v22, 0.0  ;;  %v5429_v31 = vld [vmem:[%s5895_s21 + $0x268] sm:$0xff]   ;;  %v5457_v22 = vld [vmem:[%s5895_s21 + $0x370] sm:$0xff]  }
 0xe59   : > { %v2748_v38 = vpop.f32.mrf.mxu1  ;;  %v2789_v39 = vpop.f32.mrf.mxu0  ;;  %v5430_v33 = vld [vmem:[%s5895_s21 + $0x2e8] sm:$0xff]   ;;  %v2881_v37 = vmax.f32 %v2744_v59, 0.0  ;;  %v5459_v8 = vld [vmem:[%s5895_s21 + $0x330] sm:$0xff]  }
 0xe5a   : > { %4984 = vmatpush3.bf16.msra.mxu1 %v5403_v29  ;;  %5006 = vmatpush3.bf16.msra.mxu0 %v5404_v30  ;;  %v2898_v23 = vpack.c.bf16 %v2882_v9, %v2882_v9  ;;  %v2900_v28 = vpack.c.bf16 %v2884_v2, %v2884_v2  ;;  %v5427_v29 = vld [vmem:[%s5895_s21 + $0x230] sm:$0xff]   ;;  %v5434_v38 = vld [vmem:[%s5895_s21 + $0x2e0] sm:$0xff]   ;;  %v5462_v9 = vld [vmem:[%s5895_s21 + $0x3e8] sm:$0xff]  }
 0xe5b   : > { %v2825_v42 = vpop.f32.mrf.mxu1  ;;  %v2866_v43 = vpop.f32.mrf.mxu0  ;;  %4985 = vmatprep.subr.bf16.mxu1 %v5405_v34  ;;  %5007 = vmatprep.subr.bf16.mxu0 %v5406_v35  ;;  %v5428_v30 = vld [vmem:[%s5895_s21 + $0x2b0] sm:$0xff]   ;;  %v5431_v34 = vld [vmem:[%s5895_s21 + $0x228] sm:$0xff]   ;;  %v5435_v39 = vld [vmem:[%s5895_s21 + $0x220] sm:$0xff]  }
 0xe5c   : > { %v6305_v46 = vadd.f32 %v2825_v42, %v2353_v25  ;;  %v6308_v32 = vadd.f32 %v2866_v43, %v6246_v17  ;;  %v5413_v17 = vld [vmem:[%s5895_s21 + $0x148] sm:$0xff]   ;;  %v5433_v25 = vld [vmem:[%s5895_s21 + $0x260] sm:$0xff]   ;;  %v5438_v42 = vld [vmem:[%s5895_s21 + $0x2d8] sm:$0xff]  }
 0xe5d   : > { %v6310_v47 = vpop.f32.mrf.mxu1  ;;  %v6312_v48 = vpop.f32.mrf.mxu0  ;;  %v5432_v35 = vld [vmem:[%s5895_s21 + $0x2a8] sm:$0xff]   ;;  %v5439_v43 = vld [vmem:[%s5895_s21 + $0x218] sm:$0xff]  }
 0xe5e   : > { %4986 = vmatpush3.bf16.msra.mxu1 %v5407_v40  ;;  %5008 = vmatpush3.bf16.msra.mxu0 %v5408_v41  ;;  %v5436_v40 = vld [vmem:[%s5895_s21 + $0x2a0] sm:$0xff]   ;;  %v5437_v41 = vld [vmem:[%s5895_s21 + $0x258] sm:$0xff]   ;;  %v5463_v2 = vld [vmem:[%s5895_s21 + $0x328] sm:$0xff]  }
 0xe5f   : > { %v2829_v55 = vpop.f32.mrf.mxu1  ;;  %v2870_v56 = vpop.f32.mrf.mxu0  ;;  %4987 = vmatprep.subr.bf16.mxu1 %v5409_v44  ;;  %5009 = vmatprep.subr.bf16.mxu0 %v5410_v45  ;;  %v5440_v44 = vld [vmem:[%s5895_s21 + $0x298] sm:$0xff]   ;;  %v5441_v45 = vld [vmem:[%s5895_s21 + $0x250] sm:$0xff]  }
 0xe60   : > { %v5445_v55 = vld [vmem:[%s5895_s21 + $0x248] sm:$0xff]   ;;  %v2345_v56 = vrot.slane %v6241_v16, %v2312_v19 }
 0xe61   : > { %v2830_v60 = vpop.f32.mrf.mxu1  ;;  %v2871_v61 = vpop.f32.mrf.mxu0  ;;  %v5448_v19 = vld [vmem:[%s5895_s21 + $0x288] sm:$0xff]  }
 0xe62   : > { %4988 = vmatpush3.bf16.msra.mxu1 %v5411_v49  ;;  %5010 = vmatpush3.bf16.msra.mxu0 %v5412_v50  ;;  %v5442_v49 = vld [vmem:[%s5895_s21 + $0x2d0] sm:$0xff]   ;;  %v5449_v60 = vld [vmem:[%s5895_s21 + $0x240] sm:$0xff]   ;;  %v2785_v61 = vadd.f32 %v6291_v14, %v2345_v56  ;;  %v5454_v14 = vld [vmem:[%s5895_s21 + $0x3f8] sm:$0xff]  }
 0xe63   : > { %4989 = vmatprep.subr.bf16.mxu1 %v5413_v17  ;;  %5011 = vmatprep.subr.bf16.mxu0 %v5414_v57  ;;  %v5443_v50 = vld [vmem:[%s5895_s21 + $0x210] sm:$0xff]   ;;  %v5446_v17 = vld [vmem:[%s5895_s21 + $0x2c8] sm:$0xff]   ;;  %v2357_v57 = vrot.slane %v6241_v16, %v2324_v36  ;;  %v2869_v16 = vadd.f32 %v6312_v48, %v2365_v18  ;;  %v5451_v36 = vld [vmem:[%s5895_s21 + $0x200] sm:$0xff]  }
 0xe64   : > { %v2883_v62 = vmax.f32 %v2785_v61, 0.0  ;;  %v5456_v48 = vld [vmem:[%s5895_s21 + $0x3b8] sm:$0xff]  }
 0xe65   : > { %v2828_v27 = vadd.f32 %v6310_v47, %v2357_v57  ;;  %v5455_v47 = vld [vmem:[%s5895_s21 + $0x338] sm:$0xff]  }
 0xe66   : > { %4990 = vmatpush3.bf16.msra.mxu1 %v5415_v15  ;;  %5012 = vmatpush3.bf16.msra.mxu0 %v5416_v20  ;;  %v5450_v15 = vld [vmem:[%s5895_s21 + $0x2c0] sm:$0xff]   ;;  %v5453_v20 = vld [vmem:[%s5895_s21 + $0x378] sm:$0xff]   ;;  %v2899_v1 = vpack.c.bf16 %v2883_v62, %v2883_v62 }
 0xe67   : > { %4991 = vmatprep.subr.bf16.mxu1 %v5417_v21  ;;  %5013 = vmatprep.subr.bf16.mxu0 %v5418_v0  ;;  %v2886_v63 = vmax.f32 %v2828_v27, 0.0  ;;  %v2888_v21 = vmax.f32 %v2869_v16, 0.0  ;;  %v2897_v0 = vpack.c.bf16 %v2881_v37, %v2881_v37 }
 0xe69   : > { %v2904_v7 = vpack.c.bf16 %v2888_v21, %v2888_v21 }
 0xe6a   : > { %4992 = vmatpush3.bf16.msra.mxu1 %v5419_v3  ;;  %5014 = vmatpush3.bf16.msra.mxu0 %v5420_v5  ;;  %v2902_v3 = vpack.c.bf16 %v2886_v63, %v2886_v63  ;;  %v5458_v5 = vld [vmem:[%s5895_s21 + $0x3f0] sm:$0xff]  }
 0xe6b   : > { %5021 = vmatprep.subr.bf16.mxu1 %v5421_v53  ;;  %5043 = vmatprep.subr.bf16.mxu0 %v5422_v54  ;;  %v5460_v53 = vld [vmem:[%s5895_s21 + $0x3b0] sm:$0xff]   ;;  %v5461_v54 = vld [vmem:[%s5895_s21 + $0x368] sm:$0xff]  }
 0xe6d   : > { %4049 = vmatmul.mubr.bf16.vlgmr.msra.gmra.mxu1 %v2893_v12  ;;  %4089 = vmatmul.mubr.bf16.vlgmr.msra.gmra.mxu0 %v2895_v13  ;;  %v5465_v12 = vld [vmem:[%s5895_s21 + $0x360] sm:$0xff]  }
 0xe6e   : > { %5022 = vmatpush3.bf16.msra.mxu1 %v5423_v10  ;;  %4128 = vmatprep.mubr.bf16.mxu1 %v2898_v23  ;;  %v5464_v10 = vld [vmem:[%s5895_s21 + $0x3a8] sm:$0xff]   ;;  %v5466_v13 = vld [vmem:[%s5895_s21 + $0x3e0] sm:$0xff]  }
 0xe6f   : > { %5044 = vmatpush3.bf16.msra.mxu0 %v5424_v11  ;;  %4168 = vmatprep.mubr.bf16.mxu0 %v2900_v28  ;;  %v5467_v11 = vld [vmem:[%s5895_s21 + $0x320] sm:$0xff]   ;;  %v5471_v28 = vld [vmem:[%s5895_s21 + $0x318] sm:$0xff]  }
 0xe70   : > { %5023 = vmatprep.subr.bf16.mxu1 %v5425_v24  ;;  %5045 = vmatprep.subr.bf16.mxu0 %v5426_v26  ;;  %v5468_v23 = vld [vmem:[%s5895_s21 + $0x3a0] sm:$0xff]   ;;  %v5469_v24 = vld [vmem:[%s5895_s21 + $0x358] sm:$0xff]  }
 0xe71   : > { %v5470_v26 = vld [vmem:[%s5895_s21 + $0x3d8] sm:$0xff]  }
 0xe72   : > { %5024 = vmatpush3.bf16.msra.mxu1 %v5427_v29  ;;  %v5472_v29 = vld [vmem:[%s5895_s21 + $0x398] sm:$0xff]  }
 0xe73   : > { %5046 = vmatpush3.bf16.msra.mxu0 %v5428_v30  ;;  %5025 = vmatprep.subr.bf16.mxu1 %v5429_v31  ;;  %v5473_v30 = vld [vmem:[%s5895_s21 + $0x350] sm:$0xff]  }
 0xe74   : > { %5047 = vmatprep.subr.bf16.mxu0 %v5430_v33  ;;  %v5474_v31 = vld [vmem:[%s5895_s21 + $0x3d0] sm:$0xff]  }
 0xe75   : > { %v5475_v33 = vld [vmem:[%s5895_s21 + $0x310] sm:$0xff]  }
 0xe76   : > { %5026 = vmatpush3.bf16.msra.mxu1 %v5431_v34  ;;  %v5476_v34 = vld [vmem:[%s5895_s21 + $0x390] sm:$0xff]  }
 0xe77   : > { %5048 = vmatpush3.bf16.msra.mxu0 %v5432_v35  ;;  %5027 = vmatprep.subr.bf16.mxu1 %v5433_v25  ;;  %v5477_v35 = vld [vmem:[%s5895_s21 + $0x348] sm:$0xff]  }
 0xe78   : > { %5049 = vmatprep.subr.bf16.mxu0 %v5434_v38  ;;  %v5478_v25 = vld [vmem:[%s5895_s21 + $0x3c8] sm:$0xff]  }
 0xe79   : > { %v5479_v38 = vld [vmem:[%s5895_s21 + $0x308] sm:$0xff]  }
 0xe7a   : > { %5028 = vmatpush3.bf16.msra.mxu1 %v5435_v39  ;;  %v5480_v39 = vld [vmem:[%s5895_s21 + $0x388] sm:$0xff]  }
 0xe7b   : > { %5050 = vmatpush3.bf16.msra.mxu0 %v5436_v40  ;;  %5029 = vmatprep.subr.bf16.mxu1 %v5437_v41  ;;  %v5481_v40 = vld [vmem:[%s5895_s21 + $0x340] sm:$0xff]  }
 0xe7c   : > { %5051 = vmatprep.subr.bf16.mxu0 %v5438_v42  ;;  %v5482_v41 = vld [vmem:[%s5895_s21 + $0x3c0] sm:$0xff]  }
 0xe7d   : > { %v5483_v42 = vld [vmem:[%s5895_s21 + $0x300] sm:$0xff]  }
 0xe7e   : > { %5030 = vmatpush3.bf16.msra.mxu1 %v5439_v43  ;;  %v2885_v43 = vmax.f32 %v6305_v46, 0.0 }
 0xe7f   : > { %5052 = vmatpush3.bf16.msra.mxu0 %v5440_v44  ;;  %5031 = vmatprep.subr.bf16.mxu1 %v5441_v45  ;;  %v5484_v44 = vld [vmem:[%s5895_s21 + $0x380] sm:$0xff]   ;;  %v2887_v45 = vmax.f32 %v6308_v32, 0.0 }
 0xe80   : > { %5053 = vmatprep.subr.bf16.mxu0 %v5442_v49  ;;  %v2901_v49 = vpack.c.bf16 %v2885_v43, %v2885_v43 }
 0xe82   : > { %5032 = vmatpush3.bf16.msra.mxu1 %v5443_v50  ;;  %v2903_v50 = vpack.c.bf16 %v2887_v45, %v2887_v45  ;;  %v4868_v45 = vld [vmem:[%s5901_s2 + $0x2] ss:$0 sm:$0xff] }
 0xe83   : > { %5054 = vmatpush3.bf16.msra.mxu0 %v5444_v52  ;;  %5033 = vmatprep.subr.bf16.mxu1 %v5445_v55  ;;  %v4737_v55 = vld [vmem:[%s920_s26] ss:$0 sm:$0xff] }
 0xe84   : > { %5055 = vmatprep.subr.bf16.mxu0 %v5446_v17 }
 0xe86   : > { %5034 = vmatpush3.bf16.msra.mxu1 %v5447_v58 }
 0xe87   : > { %5056 = vmatpush3.bf16.msra.mxu0 %v5448_v19  ;;  %5035 = vmatprep.subr.bf16.mxu1 %v5449_v60 }
 0xe88   : > { %5057 = vmatprep.subr.bf16.mxu0 %v5450_v15 }
 0xe8a   : > { %5036 = vmatpush3.bf16.msra.mxu1 %v5451_v36 }
 0xe8b   : > { %5058 = vmatpush3.bf16.msra.mxu0 %v5452_v4  ;;  %5065 = vmatprep.subr.bf16.mxu1 %v5453_v20 }
 0xe8c   : > { %5087 = vmatprep.subr.bf16.mxu0 %v5454_v14 }
 0xe8d   : > { %4129 = vmatmul.mubr.bf16.vlgmr.msra.gmra.mxu1 %v2897_v0 }
 0xe8e   : > { %4169 = vmatmul.mubr.bf16.vlgmr.msra.gmra.mxu0 %v2899_v1  ;;  %5066 = vmatpush3.bf16.msra.mxu1 %v5455_v47 }
 0xe8f   : > { %4208 = vmatprep.mubr.bf16.mxu1 %v2902_v3  ;;  %5088 = vmatpush3.bf16.msra.mxu0 %v5456_v48 }
 0xe90   : > { %4248 = vmatprep.mubr.bf16.mxu0 %v2904_v7  ;;  %5067 = vmatprep.subr.bf16.mxu1 %v5457_v22 }
 0xe91   : > { %5089 = vmatprep.subr.bf16.mxu0 %v5458_v5 }
 0xe92   : > { %5068 = vmatpush3.bf16.msra.mxu1 %v5459_v8 }
 0xe93   : > { %5090 = vmatpush3.bf16.msra.mxu0 %v5460_v53  ;;  %5069 = vmatprep.subr.bf16.mxu1 %v5461_v54 }
 0xe94   : > { %5091 = vmatprep.subr.bf16.mxu0 %v5462_v9 }
 0xe96   : > { %5070 = vmatpush3.bf16.msra.mxu1 %v5463_v2 }
 0xe97   : > { %5092 = vmatpush3.bf16.msra.mxu0 %v5464_v10  ;;  %5071 = vmatprep.subr.bf16.mxu1 %v5465_v12 }
 0xe98   : > { %5093 = vmatprep.subr.bf16.mxu0 %v5466_v13 }
 0xe9a   : > { %5072 = vmatpush3.bf16.msra.mxu1 %v5467_v11 }
 0xe9b   : > { %5094 = vmatpush3.bf16.msra.mxu0 %v5468_v23  ;;  %5073 = vmatprep.subr.bf16.mxu1 %v5469_v24 }
 0xe9c   : > { %5095 = vmatprep.subr.bf16.mxu0 %v5470_v26 }
 0xe9e   : > { %5074 = vmatpush3.bf16.msra.mxu1 %v5471_v28 }
 0xe9f   : > { %5096 = vmatpush3.bf16.msra.mxu0 %v5472_v29  ;;  %5075 = vmatprep.subr.bf16.mxu1 %v5473_v30 }
 0xea0   : > { %5097 = vmatprep.subr.bf16.mxu0 %v5474_v31 }
 0xea2   : > { %5076 = vmatpush3.bf16.msra.mxu1 %v5475_v33 }
 0xea3   : > { %5098 = vmatpush3.bf16.msra.mxu0 %v5476_v34  ;;  %5077 = vmatprep.subr.bf16.mxu1 %v5477_v35 }
 0xea4   : > { %5099 = vmatprep.subr.bf16.mxu0 %v5478_v25 }
 0xea6   : > { %5078 = vmatpush3.bf16.msra.mxu1 %v5479_v38 }
 0xea7   : > { %5100 = vmatpush3.bf16.msra.mxu0 %v5480_v39  ;;  %5079 = vmatprep.subr.bf16.mxu1 %v5481_v40 }
 0xea8   : > { %5101 = vmatprep.subr.bf16.mxu0 %v5482_v41 }
 0xeaa   : > { %5080 = vmatpush3.bf16.msra.mxu1 %v5483_v42 }
 0xeab   : > { %5102 = vmatpush3.bf16.msra.mxu0 %v5484_v44 }
 0xead   : > { %4209 = vmatmul.mubr.bf16.vlgmr.msra.gmra.mxu1 %v2901_v49 }
 0xeae   : > { %4249 = vmatmul.mubr.bf16.vlgmr.msra.gmra.mxu0 %v2903_v50  ;;  %v4869_v50 = vld [vmem:[%s5906_s24 + $0x2] ss:$0 sm:$0xff] }
 0xf0d   : > { %v4949_v51 = vpop.f32.mrf.mxu1  ;;  %v4971_v52 = vpop.f32.mrf.mxu0 }
 0xf0f   : > { %v4950_v46 = vpop.f32.mrf.mxu1  ;;  %v4972_v56 = vpop.f32.mrf.mxu0 }
 0xf10   : > { %v4951_v17 = vadd.f32 %v4950_v46, %v4949_v51  ;;  %v4973_v57 = vadd.f32 %v4972_v56, %v4971_v52 }
 0xf11   : > { %v4952_v18 = vpop.f32.mrf.mxu1  ;;  %v4974_v32 = vpop.f32.mrf.mxu0 }
 0xf12   : > { %v3971_v58 = vadd.f32 %v4951_v17, %v4737_v55 }
 0xf13   : > { %v4953_v59 = vpop.f32.mrf.mxu1  ;;  %v4975_v19 = vpop.f32.mrf.mxu0 }
 0xf14   : > { %v4011_v60 = vadd.f32 %v4973_v57, %v3971_v58 }
 0xf2d   : > { %v4993_v61 = vpop.f32.mrf.mxu1  ;;  %v5015_v15 = vpop.f32.mrf.mxu0 }
 0xf2f   : > { %v4994_v27 = vpop.f32.mrf.mxu1  ;;  %v5016_v16 = vpop.f32.mrf.mxu0 }
 0xf30   : > { %v4995_v22 = vadd.f32 %v4994_v27, %v4993_v61  ;;  %v5017_v5 = vadd.f32 %v5016_v16, %v5015_v15 }
 0xf31   : > { %v4996_v36 = vpop.f32.mrf.mxu1  ;;  %v5018_v37 = vpop.f32.mrf.mxu0 }
 0xf32   : > { %v4051_v3 = vadd.f32 %v4995_v22, %v4011_v60 }
 0xf33   : > { %v4997_v4 = vpop.f32.mrf.mxu1  ;;  %v5019_v20 = vpop.f32.mrf.mxu0 }
 0xf34   : > { %v4091_v8 = vadd.f32 %v5017_v5, %v4051_v3 }
 0xf4d   : > { %v5037_v62 = vpop.f32.mrf.mxu1 }
 0xf4e   : > { %v5059_v14 = vpop.f32.mrf.mxu0 }
 0xf4f   : > { %v5038_v63 = vpop.f32.mrf.mxu1 }
 0xf50   : > { %v5060_v21 = vpop.f32.mrf.mxu0  ;;  %v5039_v7 = vadd.f32 %v5038_v63, %v5037_v62 }
 0xf51   : > { %v5040_v47 = vpop.f32.mrf.mxu1  ;;  %v5061_v9 = vadd.f32 %v5060_v21, %v5059_v14 }
 0xf52   : > { %v5062_v0 = vpop.f32.mrf.mxu0  ;;  %v4131_v53 = vadd.f32 %v5039_v7, %v4091_v8 }
 0xf53   : > { %v5041_v48 = vpop.f32.mrf.mxu1 }
 0xf54   : > { %v5063_v1 = vpop.f32.mrf.mxu0  ;;  %v4171_v12 = vadd.f32 %v5061_v9, %v4131_v53 }
 0xf6d   : > { %v5081_v54 = vpop.f32.mrf.mxu1 }
 0xf6e   : > { %v5103_v2 = vpop.f32.mrf.mxu0 }
 0xf6f   : > { %v5082_v10 = vpop.f32.mrf.mxu1 }
 0xf70   : > { %v5083_v13 = vadd.f32 %v5082_v10, %v5081_v54  ;;  %v5104_v11 = vpop.f32.mrf.mxu0 }
 0xf71   : > { %v5084_v23 = vpop.f32.mrf.mxu1  ;;  %v5105_v26 = vadd.f32 %v5104_v11, %v5103_v2 }
 0xf72   : > { %v4211_v24 = vadd.f32 %v5083_v13, %v4171_v12  ;;  %v5106_v28 = vpop.f32.mrf.mxu0 }
 0xf73   : > { %v5085_v29 = vpop.f32.mrf.mxu1 }
 0xf74   : > { %v4251_v30 = vadd.f32 %v5105_v26, %v4211_v24  ;;  %v5107_v31 = vpop.f32.mrf.mxu0 }
 0xf76   : > { %v4256_v33 = vadd.f32 %v4251_v30, %v6161_v6 }
 0xf78   : > { %v4261_v34 = vsel %vm968_vm2, %v4256_v33, 0.0 }
 0xf79   : > { %4262 = vadd.xlane.f32.xlu0 %v4261_v34 }
0x1002   : > { %v4263_v35 = vpop.xlane.xlu0 %4262 }
0x1003   : > { %v4264_v25 = vmul.f32 0.03125, %v4263_v35 }
0x1005   : > { %v4265_v38 = vsub.f32 %v4256_v33, %v4264_v25 }
0x1007   : > { %v4266_v39 = vmul.f32 %v4265_v38, %v4265_v38 }
0x1009   : > { %v4267_v40 = vsel %vm968_vm2, %v4266_v39, 0.0 }
0x100a   : > { %4268 = vadd.xlane.f32.xlu1 %v4267_v40 }
0x1093   : > { %v4269_v41 = vpop.xlane.xlu1 %4268 }
0x1094   : > { %v4270_v42 = vmul.f32 0.03125, %v4269_v41 }
0x1096   : > { %v4271_v43 = vadd.f32 1e-05, %v4270_v42 }
0x1098   : > { %5521 = vrsqrt.f32 %v4271_v43 }
0x10a5   : > { %v5522_v44 = vpop.eup %5521 }
0x10a6   : > { %v4273_v49 = vmul.f32 %v5522_v44, %v4265_v38 }
0x10a8   : > { %v4280_v6 = vmul.f32 %v4868_v45, %v4273_v49  ;;  %4292 = sbr.rel (%p4870_p1) target bundleno = 4477 (0x117d), region = 108 }
0x10aa   : > { %v4287_v51 = vadd.f32 %v4869_v50, %v4280_v6 }
0x10ac   : > { %4288 = vst.msk [vmem:[#allocation2] sm:$0xff] %vm968_vm2, %v4287_v51 }
0x10ad   : > { %v5523_v52 = vld [vmem:[%s6590_s30 + $0x8] sm:$0xff]   ;;  %v5636_v55 = vmov 0.0   ;;  %v5524_v46 = vld [vmem:[%s6590_s30] sm:$0xff]   ;;  %vm5637_vm8 = vmmov 0   ;;  %v4297_v56 = vpack.c.bf16 %v4287_v51, %v4287_v51 }
0x10ae   : > { %5248 = vmatprep.subr.bf16.mxu0 %v5636_v55  ;;  %5252 = vmatprep.mubr.msk.bf16.mxu0 %vm5637_vm8, %v5636_v55  ;;  %v4871_v17 = vld [vmem:[%s6591_s11] ss:$0 sm:$0xff] }
0x10af   : > { %5249 = vmatpush3.bf16.msra.mxu0 %v5523_v52 }
0x10b0   : > { %5250 = vmatprep.subr.bf16.mxu0 %v5636_v55 }
0x10b3   : > { %5251 = vmatpush3.bf16.msra.mxu0 %v5524_v46 }
0x10b6   : > { %5253 = vmatmul.mubr.msk.bf16.vlgmr.msra.gmra.mxu0 %vm968_vm2, %v4297_v56 }
0x1176   : > { %v4354_v57 = vpop.f32.mrf.mxu0 }
0x1177   : > { %v4355_v18 = vadd.f32 %v4871_v17, %v4354_v57 }
0x1178   : > { %v5254_v32 = vpop.f32.mrf.mxu0 }
0x1179   : > { %4360 = vst [vmem:[%s855_s13] sm:$0xff] %v4355_v18 }
0x117a   : > { %v4357_v58 = vpop.f32.mrf.mxu0 }
0x117c   : > { %v5255_v59 = vpop.f32.mrf.mxu0 }
0x117d PF: > { %s6592_s12 = sld [smem:[#allocation10_spill]]  ;;  %s4375_s4 = sshll.u32 %s855_s13, 4  ;;  %s4376_s4 = int_to_ptr.vmem [resolvable:$true] %s4375_s4 }
0x117e   : > { %s6593_s18 = sld [smem:[#allocation7_spill]]  ;;  %s5525_s20 = scalar_lea.vmem %s4376_s4, 128 }
0x117f   : > { %s6595_s8 = sld [smem:[#allocation38_spill]]  ;;  %p5526_p2 = scmp.ne.s32.totalorder %s4376_s4, %s5525_s20 }
0x1180   : > { %s5638_s29 = smov [#allocation3]  }
0x1181   : > { %p5527_p4 = pnand %p5526_p2, %p5793_p3  ;;  %s5529_s16 = sshll.u32 %s5638_s29, 4  ;;  %s5530_s16 = int_to_ptr.vmem [resolvable:$false] %s5529_s16 }
0x1182   : > { %s5531_s3 = scalar_lea.vmem %s5530_s16, 256  ;;  %p5532_p6 = scmp.lt.s32.totalorder %s4376_s4, %s5530_s16 }
0x1183   : > { %s4876_s14 = sshll.u32 %s6592_s12, 7  ;;  %p5528_p5 = pneg %p5527_p4 }
0x1184   : > { %s6596_s0 = sand.u32 1, %s6593_s18   ;;  %p5533_p7 = scmp.lt.s32.totalorder %s5531_s3, %s5525_s20 }
0x1185   : > { %s4373_s27 = scalar_lea.hbm %s6595_s8, %s4876_s14  ;;  %s4362_s23 = scalar_lea.sflag [#allocation4], %s6596_s0 }
0x1186   : > { %p5534_p8 = por %p5533_p7, %p5532_p6 }
0x1188   : > { %p5535_p10 = pnand %p5534_p8, %p5528_p5 }
0x118a   : > { %5538 = shalt.err (!%p5535_p10)
}
0x118b   : > { %s5539_s28 = scalar_lea.hbm %s4373_s27, 128  ;;  %s5543_s1 = scalar_lea.hbm %s6595_s8, 256 }
0x118c   : > { %p5540_p11 = scmp.ne.s32.totalorder %s4373_s27, %s5539_s28  ;;  %p5544_p0 = scmp.lt.s32.totalorder %s4373_s27, %s6595_s8 }
0x118d   : > { %p5545_p1 = scmp.lt.s32.totalorder %s5543_s1, %s5539_s28 }
0x118e   : > { %p5541_p12 = pnand %p5540_p11, %p5793_p3 }
0x118f   : > { %p5546_p2 = por %p5545_p1, %p5544_p0 }
0x1190   : > { %p5542_p13 = pneg %p5541_p12 }
0x1192   : > { %p5547_p4 = pnand %p5546_p2, %p5542_p13 }
0x1194   : > { %5550 = shalt.err (!%p5547_p4)
}
0x1195   : > { %5257 = dma.vmem_to_hbm [thread:$0]  (%p5793_p3), %s4376_s4, 128, %s4373_s27, %s4362_s23  }
0x1196 PF: > { %s6597_s6 = sld [smem:[#allocation13_spill]] }
0x1197   : > { %s6598_s10 = sld [smem:[#allocation6_spill]] }
0x119c   : > { %p5263_p5 = scmp.ge.s32.totalorder %s6597_s6, 2 }
0x119d   : > { %s4387_s24 = sand.u32 1, %s6598_s10  }
0x119e   : > { %p5260_p6 = pnand %p5263_p5, %p5803_p9  ;;  %s4388_s11 = scalar_lea.sflag [#allocation4], %s4387_s24 }
0x11a0   : > { %p5261_p7 = pneg %p5260_p6 }
0x11a2   : > { %5584 = dma.done.wait (%p5261_p7), %s4388_s11, 128  }
0x11a3   : > { %5586 = vsyncadd (%p5261_p7), %s4388_s11, 4294967168  ;;  %s33_s26 = sadd.s32 1, %s6597_s6   ;;  %s6600_s1 = sld [smem:[#allocation7_spill]] }
0x11a4   : > { %p30_p8 = scmp.ge.s32.totalorder %s33_s26, 6   ;;  %s6601_s22 = sld [smem:[#allocation8_spill]] }
0x11a5   : > { %s6602_s23 = sld [smem:[#allocation18_spill]] }
0x11a6   : > { %s6603_s24 = sld [smem:[#allocation11_spill]]  ;;  %32 = sbr.rel (!%p30_p8) target bundleno = 23 (0x17), region = 198 }
0x11a7   : > { %s6604_s2 = sld [smem:[#allocation12_spill]] }
0x11a8   : > { %s6605_s25 = sld [smem:[#allocation14_spill]] }
0x11a9   : > { %s6606_s3 = sld [smem:[#allocation16_spill]] }
0x11ab   :  { %4393 = vsyncpa [#allocation4], 1 }
0x11ac   :  { %4395 = vsyncpa [#allocation4 + $0x1], 1 }

</bundles_post_ra>
